<compile_context>
chip_gen: v6e
topology: v6e:2x2x1
jax: 0.10.0
libtpu: 0.0.40
codegen_flags: <defaults>
</compile_context>

<pallas_src>
import functools

import jax
import jax.numpy as jnp
import numpy as np
from jax import lax
from jax.experimental import pallas as pl
from jax.experimental.pallas import tpu as pltpu

IN_FEAT = 39
ENC_DIM = 32
HID = 64
ATT_DIM = 32
OUT_DIM = 2


def attention_lstm_kernel(
    c_ref,        # (T, B, 39)   time-major input
    wxg_ref,      # (39, 512)    W_enc @ [W_ih_f | W_ih_b]   (gate order [i|f|o|g])
    bxg_ref,      # (1, 512)     b_enc @ [W_ih_f | W_ih_b] + [b_f | b_b]
    whh_f_ref,    # (64, 256)    recurrent weights, forward   (gate order [i|f|o|g])
    whh_b_ref,    # (64, 256)    recurrent weights, backward
    watt_f_ref,   # (64, 32)     attention_w rows 0:64   (applied to forward h)
    watt_b_ref,   # (64, 32)     attention_w rows 64:128 (applied to backward h)
    batt_ref,     # (1, 32)
    wfin_ref,     # (32, 2)
    bfin_ref,     # (1, 2)
    out_ref,      # (B, 2)
    xgf_scr,      # scratch (T, B, 256): precomputed input-gate activations, fwd
    xgb_scr,      # scratch (T, B, 256): precomputed input-gate activations, bwd
    attf_scr,     # scratch (T, B, 32): hf @ W_att_top
    attb_scr,     # scratch (T, B, 32): hb @ W_att_bot
    *,
    seq_len,
    batch,
):
    T, B, H = seq_len, batch, HID
    unroll = T if T <= 16 else 8

    # ---- Phase 1: fused encoder + input-gate projection (independent of the carry) ---
    wxg = wxg_ref[...]
    bxg = bxg_ref[...]

    def project(t, carry):
        xg = jnp.dot(c_ref[t], wxg, preferred_element_type=jnp.float32) + bxg  # (B, 512)
        xgf_scr[t] = xg[:, 0:4 * H]
        xgb_scr[t] = xg[:, 4 * H:8 * H]
        return carry

    lax.fori_loop(0, T, project, 0, unroll=unroll)

    # ---- Phase 2: bidirectional recurrence (latency-bound serial chain) --------------
    whh_f = whh_f_ref[...]
    whh_b = whh_b_ref[...]
    watt_f = watt_f_ref[...]
    watt_b = watt_b_ref[...]

    def lstm_step(xg_t, h, c, whh):
        # Only the recurrent projection sits on the carry chain: (B,64)@(64,256).
        g = xg_t + jnp.dot(h, whh, preferred_element_type=jnp.float32)
        sig = jax.nn.sigmoid(g[:, 0:3 * H])          # one fused sigmoid over [i|f|o]
        gg = jnp.tanh(g[:, 3 * H:4 * H])
        i = sig[:, 0:H]
        f = sig[:, H:2 * H]
        o = sig[:, 2 * H:3 * H]
        c_new = f * c + i * gg
        h_new = o * jnp.tanh(c_new)
        return h_new, c_new

    zeros = jnp.zeros((B, H), jnp.float32)

    def recurrence(t, carry):
        hf, cf, hb, cb = carry
        tb = T - 1 - t
        hf, cf = lstm_step(xgf_scr[t], hf, cf, whh_f)
        hb, cb = lstm_step(xgb_scr[tb], hb, cb, whh_b)
        # Attention pre-activations: MXU slack work, does not feed the carry.
        attf_scr[t] = jnp.dot(hf, watt_f, preferred_element_type=jnp.float32)
        attb_scr[tb] = jnp.dot(hb, watt_b, preferred_element_type=jnp.float32)
        return hf, cf, hb, cb

    lax.fori_loop(0, T, recurrence, (zeros, zeros, zeros, zeros), unroll=unroll)

    # ---- Phase 3: attention accumulation (pure VPU/EUP, no matmul) -------------------
    batt = batt_ref[...]

    def attend(t, beta):
        a = jnp.tanh(attf_scr[t] + attb_scr[t] + batt)
        # tanh output is bounded in [-1, 1] -> exp is safe without max-subtraction.
        e = jnp.exp(a)
        inv = pl.reciprocal(jnp.sum(e, axis=-1, keepdims=True), approx=True)
        return beta + e * inv

    beta = lax.fori_loop(0, T, attend, jnp.zeros((B, ATT_DIM), jnp.float32),
                         unroll=unroll)

    # (prefinal_fc + relu result is unused in the reference forward -> not computed)
    out_ref[...] = (
        jnp.dot(beta, wfin_ref[...], preferred_element_type=jnp.float32) + bfin_ref[...]
    )


def _reorder_gates(w):
    """PyTorch LSTM gate order [i|f|g|o] -> [i|f|o|g] along the last axis."""
    i, f, g, o = jnp.split(w, 4, axis=-1)
    return jnp.concatenate([i, f, o, g], axis=-1)


def attention_lstm_forward(c_btf, params):
    """c_btf: (B, T, 39) float32, batch-first like the PyTorch module."""
    (w_enc, b_enc, w_ih_f, w_hh_f, b_f, w_ih_b, w_hh_b, b_b,
     w_att, b_att, w_fin, b_fin) = params
    B, T, _ = c_btf.shape
    hp = jax.lax.Precision.HIGHEST

    # Time-major layout so each step is a leading-axis slice (no in-kernel reshape).
    c_tbf = jnp.transpose(c_btf, (1, 0, 2))

    # Fold encoder Linear into the input-gate projection of both directions:
    #   (c @ W_enc + b_enc) @ W_ih + b  ==  c @ (W_enc @ W_ih) + (b_enc @ W_ih + b)
    # Gate columns permuted to [i|f|o|g] so the kernel uses one fused sigmoid.
    w_ih = jnp.concatenate([_reorder_gates(w_ih_f), _reorder_gates(w_ih_b)], axis=1)
    w_xg = jnp.dot(w_enc, w_ih, precision=hp)                        # (39, 512)
    b_xg = (jnp.dot(b_enc, w_ih, precision=hp)
            + jnp.concatenate([_reorder_gates(b_f), _reorder_gates(b_b)], axis=1))

    whh_f = _reorder_gates(w_hh_f)                                   # (64, 256)
    whh_b = _reorder_gates(w_hh_b)

    # Split the attention projection by direction (separability over the h concat).
    w_att_f = w_att[:HID, :]                                         # (64, 32)
    w_att_b = w_att[HID:, :]                                         # (64, 32)

    # Scoped-VMEM limit sized from the actual (padded) footprint; cap well below the
    # v7x per-TC 64 MiB so the compiler keeps headroom.
    b_pad = max(8, -(-B // 8) * 8)
    resident = 4 * T * b_pad * (128 + 2 * 4 * HID + 2 * 128)   # c + xg scratches + att scratches
    weights = 4 * (64 * 512 + 2 * HID * 4 * HID + 2 * HID * 128 + 4 * 512) + (1 << 20)
    vmem_limit = int(min(max(2 * resident + weights + (2 << 20), 8 << 20), 48 << 20))

    kernel = functools.partial(attention_lstm_kernel, seq_len=T, batch=B)
    vmem = pl.BlockSpec(memory_space=pltpu.MemorySpace.VMEM)

    return pl.pallas_call(
        kernel,
        out_shape=jax.ShapeDtypeStruct((B, OUT_DIM), jnp.float32),
        in_specs=[vmem] * 10,
        out_specs=vmem,
        scratch_shapes=[
            pltpu.VMEM((T, B, 4 * HID), jnp.float32),   # xg forward
            pltpu.VMEM((T, B, 4 * HID), jnp.float32),   # xg backward
            pltpu.VMEM((T, B, ATT_DIM), jnp.float32),   # attention pre-act, forward
            pltpu.VMEM((T, B, ATT_DIM), jnp.float32),   # attention pre-act, backward
        ],
        compiler_params=pltpu.CompilerParams(vmem_limit_bytes=vmem_limit),
    )(c_tbf, w_xg, b_xg, whh_f, whh_b, w_att_f, w_att_b, b_att, w_fin, b_fin)


def reference_forward(c_btf, params):
    """Pure-JAX reference with identical semantics (for verification)."""
    (w_enc, b_enc, w_ih_f, w_hh_f, b_f, w_ih_b, w_hh_b, b_b,
     w_att, b_att, w_fin, b_fin) = params
    B, T, _ = c_btf.shape
    H = HID
    x = c_btf @ w_enc + b_enc[0]  # (B, T, 32)

    def run_dir(xs, w_ih, w_hh, b):
        def body(carry, xt):
            h, c = carry
            g = xt @ w_ih + h @ w_hh + b[0]
            i = jax.nn.sigmoid(g[:, :H])
            f = jax.nn.sigmoid(g[:, H:2 * H])
            gg = jnp.tanh(g[:, 2 * H:3 * H])
            o = jax.nn.sigmoid(g[:, 3 * H:])
            c = f * c + i * gg
            h = o * jnp.tanh(c)
            return (h, c), h

        init = (jnp.zeros((B, H)), jnp.zeros((B, H)))
        _, hs = lax.scan(body, init, jnp.transpose(xs, (1, 0, 2)))
        return jnp.transpose(hs, (1, 0, 2))  # (B, T, H)

    out_f = run_dir(x, w_ih_f, w_hh_f, b_f)
    out_b = run_dir(x[:, ::-1], w_ih_b, w_hh_b, b_b)[:, ::-1]
    lstm_out = jnp.concatenate([out_f, out_b], axis=-1)  # (B, T, 128)
    alpha = jnp.tanh(lstm_out @ w_att + b_att[0])
    alpha = jax.nn.softmax(alpha, axis=-1)
    beta = jnp.sum(alpha, axis=1)  # (B, 32)
    return beta @ w_fin + b_fin[0]


def init_params(key):
    ks = jax.random.split(key, 12)

    def u(k, shape, scale=0.1):
        return jax.random.uniform(k, shape, jnp.float32, -1.0, 1.0) * scale

    w_enc = u(ks[0], (IN_FEAT, ENC_DIM))
    b_enc = u(ks[1], (1, ENC_DIM))
    w_ih_f = u(ks[2], (ENC_DIM, 4 * HID))
    w_hh_f = u(ks[3], (HID, 4 * HID))
    b_f = u(ks[4], (1, 4 * HID))
    w_ih_b = u(ks[5], (ENC_DIM, 4 * HID))
    w_hh_b = u(ks[6], (HID, 4 * HID))
    b_b = u(ks[7], (1, 4 * HID))
    w_att = u(ks[8], (2 * HID, ATT_DIM))
    b_att = u(ks[9], (1, ATT_DIM))
    w_fin = u(ks[10], (ATT_DIM, OUT_DIM))
    b_fin = u(ks[11], (1, OUT_DIM))
    return (w_enc, b_enc, w_ih_f, w_hh_f, b_f, w_ih_b, w_hh_b, b_b,
            w_att, b_att, w_fin, b_fin)


if __name__ == "__main__":
    B, T = 2, 8
    key = jax.random.PRNGKey(0)
    k_in, k_par = jax.random.split(key)
    c = jax.random.normal(k_in, (B, T, IN_FEAT), jnp.float32)
    params = init_params(k_par)

    out = jax.block_until_ready(attention_lstm_forward(c, params))

    with jax.default_matmul_precision("float32"):
        ref = jax.block_until_ready(reference_forward(c, params))

    assert out.shape == (B, OUT_DIM)
    np.testing.assert_allclose(np.asarray(out), np.asarray(ref), atol=1e-2, rtol=1e-2)

    print("KERNEL_OK")
</pallas_src>

<mosaic_0001>
module attributes {stable_mosaic.version = 11 : i64} {
  func.func @attention_lstm_kernel(%arg0: memref<8x2x39xf32, #tpu.memory_space<vmem>>, %arg1: memref<39x512xf32, #tpu.memory_space<vmem>>, %arg2: memref<1x512xf32, #tpu.memory_space<vmem>>, %arg3: memref<64x256xf32, #tpu.memory_space<vmem>>, %arg4: memref<64x256xf32, #tpu.memory_space<vmem>>, %arg5: memref<64x32xf32, #tpu.memory_space<vmem>>, %arg6: memref<64x32xf32, #tpu.memory_space<vmem>>, %arg7: memref<1x32xf32, #tpu.memory_space<vmem>>, %arg8: memref<32x2xf32, #tpu.memory_space<vmem>>, %arg9: memref<1x2xf32, #tpu.memory_space<vmem>>, %arg10: memref<2x2xf32, #tpu.memory_space<vmem>>, %arg11: memref<8x2x256xf32, #tpu.memory_space<vmem>>, %arg12: memref<8x2x256xf32, #tpu.memory_space<vmem>>, %arg13: memref<8x2x32xf32, #tpu.memory_space<vmem>>, %arg14: memref<8x2x32xf32, #tpu.memory_space<vmem>>) attributes {dimension_semantics = [], scalar_prefetch = 0 : i64, scratch_operands = 4 : i64, tpu.core_type = #tpu.core_type<tc>} {
    %c0 = arith.constant 0 : index
    %c0_0 = arith.constant 0 : index
    %0 = vector.load %arg1[%c0, %c0_0] : memref<39x512xf32, #tpu.memory_space<vmem>>, vector<39x512xf32>
    %c0_1 = arith.constant 0 : index
    %c0_2 = arith.constant 0 : index
    %1 = vector.load %arg2[%c0_1, %c0_2] : memref<1x512xf32, #tpu.memory_space<vmem>>, vector<1x512xf32>
    %c0_i32 = arith.constant 0 : i32
    %2 = arith.index_cast %c0_i32 : i32 to index
    %c0_3 = arith.constant 0 : index
    %c0_4 = arith.constant 0 : index
    %3 = vector.load %arg0[%2, %c0_3, %c0_4] : memref<8x2x39xf32, #tpu.memory_space<vmem>>, vector<1x2x39xf32>
    %4 = vector.shape_cast %3 : vector<1x2x39xf32> to vector<2x39xf32>
    %cst = arith.constant dense<0.000000e+00> : vector<2x512xf32>
    %5 = tpu.matmul %4, %0, %cst {dimension_numbers = #tpu.dot_dimension_numbers<[1], [0], [0], [1], [0, 0, 1, 1], [], []>} : vector<2x39xf32>, vector<39x512xf32>, vector<2x512xf32> -> vector<2x512xf32>
    %6 = vector.broadcast %1 : vector<1x512xf32> to vector<2x512xf32>
    %7 = arith.addf %5, %6 : vector<2x512xf32>
    %8 = vector.extract_strided_slice %7 {offsets = [0, 0], sizes = [2, 256], strides = [1, 1]} : vector<2x512xf32> to vector<2x256xf32>
    %9 = arith.index_cast %c0_i32 : i32 to index
    %c0_5 = arith.constant 0 : index
    %c0_6 = arith.constant 0 : index
    %10 = vector.load %arg11[%9, %c0_5, %c0_6] : memref<8x2x256xf32, #tpu.memory_space<vmem>>, vector<1x2x256xf32>
    %11 = vector.shape_cast %10 : vector<1x2x256xf32> to vector<2x256xf32>
    %12 = vector.shape_cast %8 : vector<2x256xf32> to vector<1x2x256xf32>
    tpu.vector_store %arg11[%9, %c0_5, %c0_6], %12 {strides = array<i32>} : memref<8x2x256xf32, #tpu.memory_space<vmem>>, vector<1x2x256xf32>,
    %13 = vector.extract_strided_slice %7 {offsets = [0, 256], sizes = [2, 256], strides = [1, 1]} : vector<2x512xf32> to vector<2x256xf32>
    %14 = arith.index_cast %c0_i32 : i32 to index
    %c0_7 = arith.constant 0 : index
    %c0_8 = arith.constant 0 : index
    %15 = vector.load %arg12[%14, %c0_7, %c0_8] : memref<8x2x256xf32, #tpu.memory_space<vmem>>, vector<1x2x256xf32>
    %16 = vector.shape_cast %15 : vector<1x2x256xf32> to vector<2x256xf32>
    %17 = vector.shape_cast %13 : vector<2x256xf32> to vector<1x2x256xf32>
    tpu.vector_store %arg12[%14, %c0_7, %c0_8], %17 {strides = array<i32>} : memref<8x2x256xf32, #tpu.memory_space<vmem>>, vector<1x2x256xf32>,
    %c1_i32 = arith.constant 1 : i32
    %18 = arith.index_cast %c1_i32 : i32 to index
    %c0_9 = arith.constant 0 : index
    %c0_10 = arith.constant 0 : index
    %19 = vector.load %arg0[%18, %c0_9, %c0_10] : memref<8x2x39xf32, #tpu.memory_space<vmem>>, vector<1x2x39xf32>
    %20 = vector.shape_cast %19 : vector<1x2x39xf32> to vector<2x39xf32>
    %cst_11 = arith.constant dense<0.000000e+00> : vector<2x512xf32>
    %21 = tpu.matmul %20, %0, %cst_11 {dimension_numbers = #tpu.dot_dimension_numbers<[1], [0], [0], [1], [0, 0, 1, 1], [], []>} : vector<2x39xf32>, vector<39x512xf32>, vector<2x512xf32> -> vector<2x512xf32>
    %22 = vector.broadcast %1 : vector<1x512xf32> to vector<2x512xf32>
    %23 = arith.addf %21, %22 : vector<2x512xf32>
    %24 = vector.extract_strided_slice %23 {offsets = [0, 0], sizes = [2, 256], strides = [1, 1]} : vector<2x512xf32> to vector<2x256xf32>
    %25 = arith.index_cast %c1_i32 : i32 to index
    %c0_12 = arith.constant 0 : index
    %c0_13 = arith.constant 0 : index
    %26 = vector.load %arg11[%25, %c0_12, %c0_13] : memref<8x2x256xf32, #tpu.memory_space<vmem>>, vector<1x2x256xf32>
    %27 = vector.shape_cast %26 : vector<1x2x256xf32> to vector<2x256xf32>
    %28 = vector.shape_cast %24 : vector<2x256xf32> to vector<1x2x256xf32>
    tpu.vector_store %arg11[%25, %c0_12, %c0_13], %28 {strides = array<i32>} : memref<8x2x256xf32, #tpu.memory_space<vmem>>, vector<1x2x256xf32>,
    %29 = vector.extract_strided_slice %23 {offsets = [0, 256], sizes = [2, 256], strides = [1, 1]} : vector<2x512xf32> to vector<2x256xf32>
    %30 = arith.index_cast %c1_i32 : i32 to index
    %c0_14 = arith.constant 0 : index
    %c0_15 = arith.constant 0 : index
    %31 = vector.load %arg12[%30, %c0_14, %c0_15] : memref<8x2x256xf32, #tpu.memory_space<vmem>>, vector<1x2x256xf32>
    %32 = vector.shape_cast %31 : vector<1x2x256xf32> to vector<2x256xf32>
    %33 = vector.shape_cast %29 : vector<2x256xf32> to vector<1x2x256xf32>
    tpu.vector_store %arg12[%30, %c0_14, %c0_15], %33 {strides = array<i32>} : memref<8x2x256xf32, #tpu.memory_space<vmem>>, vector<1x2x256xf32>,
    %c2_i32 = arith.constant 2 : i32
    %34 = arith.index_cast %c2_i32 : i32 to index
    %c0_16 = arith.constant 0 : index
    %c0_17 = arith.constant 0 : index
    %35 = vector.load %arg0[%34, %c0_16, %c0_17] : memref<8x2x39xf32, #tpu.memory_space<vmem>>, vector<1x2x39xf32>
    %36 = vector.shape_cast %35 : vector<1x2x39xf32> to vector<2x39xf32>
    %cst_18 = arith.constant dense<0.000000e+00> : vector<2x512xf32>
    %37 = tpu.matmul %36, %0, %cst_18 {dimension_numbers = #tpu.dot_dimension_numbers<[1], [0], [0], [1], [0, 0, 1, 1], [], []>} : vector<2x39xf32>, vector<39x512xf32>, vector<2x512xf32> -> vector<2x512xf32>
    %38 = vector.broadcast %1 : vector<1x512xf32> to vector<2x512xf32>
    %39 = arith.addf %37, %38 : vector<2x512xf32>
    %40 = vector.extract_strided_slice %39 {offsets = [0, 0], sizes = [2, 256], strides = [1, 1]} : vector<2x512xf32> to vector<2x256xf32>
    %41 = arith.index_cast %c2_i32 : i32 to index
    %c0_19 = arith.constant 0 : index
    %c0_20 = arith.constant 0 : index
    %42 = vector.load %arg11[%41, %c0_19, %c0_20] : memref<8x2x256xf32, #tpu.memory_space<vmem>>, vector<1x2x256xf32>
    %43 = vector.shape_cast %42 : vector<1x2x256xf32> to vector<2x256xf32>
    %44 = vector.shape_cast %40 : vector<2x256xf32> to vector<1x2x256xf32>
    tpu.vector_store %arg11[%41, %c0_19, %c0_20], %44 {strides = array<i32>} : memref<8x2x256xf32, #tpu.memory_space<vmem>>, vector<1x2x256xf32>,
    %45 = vector.extract_strided_slice %39 {offsets = [0, 256], sizes = [2, 256], strides = [1, 1]} : vector<2x512xf32> to vector<2x256xf32>
    %46 = arith.index_cast %c2_i32 : i32 to index
    %c0_21 = arith.constant 0 : index
    %c0_22 = arith.constant 0 : index
    %47 = vector.load %arg12[%46, %c0_21, %c0_22] : memref<8x2x256xf32, #tpu.memory_space<vmem>>, vector<1x2x256xf32>
    %48 = vector.shape_cast %47 : vector<1x2x256xf32> to vector<2x256xf32>
    %49 = vector.shape_cast %45 : vector<2x256xf32> to vector<1x2x256xf32>
    tpu.vector_store %arg12[%46, %c0_21, %c0_22], %49 {strides = array<i32>} : memref<8x2x256xf32, #tpu.memory_space<vmem>>, vector<1x2x256xf32>,
    %c3_i32 = arith.constant 3 : i32
    %50 = arith.index_cast %c3_i32 : i32 to index
    %c0_23 = arith.constant 0 : index
    %c0_24 = arith.constant 0 : index
    %51 = vector.load %arg0[%50, %c0_23, %c0_24] : memref<8x2x39xf32, #tpu.memory_space<vmem>>, vector<1x2x39xf32>
    %52 = vector.shape_cast %51 : vector<1x2x39xf32> to vector<2x39xf32>
    %cst_25 = arith.constant dense<0.000000e+00> : vector<2x512xf32>
    %53 = tpu.matmul %52, %0, %cst_25 {dimension_numbers = #tpu.dot_dimension_numbers<[1], [0], [0], [1], [0, 0, 1, 1], [], []>} : vector<2x39xf32>, vector<39x512xf32>, vector<2x512xf32> -> vector<2x512xf32>
    %54 = vector.broadcast %1 : vector<1x512xf32> to vector<2x512xf32>
    %55 = arith.addf %53, %54 : vector<2x512xf32>
    %56 = vector.extract_strided_slice %55 {offsets = [0, 0], sizes = [2, 256], strides = [1, 1]} : vector<2x512xf32> to vector<2x256xf32>
    %57 = arith.index_cast %c3_i32 : i32 to index
    %c0_26 = arith.constant 0 : index
    %c0_27 = arith.constant 0 : index
    %58 = vector.load %arg11[%57, %c0_26, %c0_27] : memref<8x2x256xf32, #tpu.memory_space<vmem>>, vector<1x2x256xf32>
    %59 = vector.shape_cast %58 : vector<1x2x256xf32> to vector<2x256xf32>
    %60 = vector.shape_cast %56 : vector<2x256xf32> to vector<1x2x256xf32>
    tpu.vector_store %arg11[%57, %c0_26, %c0_27], %60 {strides = array<i32>} : memref<8x2x256xf32, #tpu.memory_space<vmem>>, vector<1x2x256xf32>,
    %61 = vector.extract_strided_slice %55 {offsets = [0, 256], sizes = [2, 256], strides = [1, 1]} : vector<2x512xf32> to vector<2x256xf32>
    %62 = arith.index_cast %c3_i32 : i32 to index
    %c0_28 = arith.constant 0 : index
    %c0_29 = arith.constant 0 : index
    %63 = vector.load %arg12[%62, %c0_28, %c0_29] : memref<8x2x256xf32, #tpu.memory_space<vmem>>, vector<1x2x256xf32>
    %64 = vector.shape_cast %63 : vector<1x2x256xf32> to vector<2x256xf32>
    %65 = vector.shape_cast %61 : vector<2x256xf32> to vector<1x2x256xf32>
    tpu.vector_store %arg12[%62, %c0_28, %c0_29], %65 {strides = array<i32>} : memref<8x2x256xf32, #tpu.memory_space<vmem>>, vector<1x2x256xf32>,
    %c4_i32 = arith.constant 4 : i32
    %66 = arith.index_cast %c4_i32 : i32 to index
    %c0_30 = arith.constant 0 : index
    %c0_31 = arith.constant 0 : index
    %67 = vector.load %arg0[%66, %c0_30, %c0_31] : memref<8x2x39xf32, #tpu.memory_space<vmem>>, vector<1x2x39xf32>
    %68 = vector.shape_cast %67 : vector<1x2x39xf32> to vector<2x39xf32>
    %cst_32 = arith.constant dense<0.000000e+00> : vector<2x512xf32>
    %69 = tpu.matmul %68, %0, %cst_32 {dimension_numbers = #tpu.dot_dimension_numbers<[1], [0], [0], [1], [0, 0, 1, 1], [], []>} : vector<2x39xf32>, vector<39x512xf32>, vector<2x512xf32> -> vector<2x512xf32>
    %70 = vector.broadcast %1 : vector<1x512xf32> to vector<2x512xf32>
    %71 = arith.addf %69, %70 : vector<2x512xf32>
    %72 = vector.extract_strided_slice %71 {offsets = [0, 0], sizes = [2, 256], strides = [1, 1]} : vector<2x512xf32> to vector<2x256xf32>
    %73 = arith.index_cast %c4_i32 : i32 to index
    %c0_33 = arith.constant 0 : index
    %c0_34 = arith.constant 0 : index
    %74 = vector.load %arg11[%73, %c0_33, %c0_34] : memref<8x2x256xf32, #tpu.memory_space<vmem>>, vector<1x2x256xf32>
    %75 = vector.shape_cast %74 : vector<1x2x256xf32> to vector<2x256xf32>
    %76 = vector.shape_cast %72 : vector<2x256xf32> to vector<1x2x256xf32>
    tpu.vector_store %arg11[%73, %c0_33, %c0_34], %76 {strides = array<i32>} : memref<8x2x256xf32, #tpu.memory_space<vmem>>, vector<1x2x256xf32>,
    %77 = vector.extract_strided_slice %71 {offsets = [0, 256], sizes = [2, 256], strides = [1, 1]} : vector<2x512xf32> to vector<2x256xf32>
    %78 = arith.index_cast %c4_i32 : i32 to index
    %c0_35 = arith.constant 0 : index
    %c0_36 = arith.constant 0 : index
    %79 = vector.load %arg12[%78, %c0_35, %c0_36] : memref<8x2x256xf32, #tpu.memory_space<vmem>>, vector<1x2x256xf32>
    %80 = vector.shape_cast %79 : vector<1x2x256xf32> to vector<2x256xf32>
    %81 = vector.shape_cast %77 : vector<2x256xf32> to vector<1x2x256xf32>
    tpu.vector_store %arg12[%78, %c0_35, %c0_36], %81 {strides = array<i32>} : memref<8x2x256xf32, #tpu.memory_space<vmem>>, vector<1x2x256xf32>,
    %c5_i32 = arith.constant 5 : i32
    %82 = arith.index_cast %c5_i32 : i32 to index
    %c0_37 = arith.constant 0 : index
    %c0_38 = arith.constant 0 : index
    %83 = vector.load %arg0[%82, %c0_37, %c0_38] : memref<8x2x39xf32, #tpu.memory_space<vmem>>, vector<1x2x39xf32>
    %84 = vector.shape_cast %83 : vector<1x2x39xf32> to vector<2x39xf32>
    %cst_39 = arith.constant dense<0.000000e+00> : vector<2x512xf32>
    %85 = tpu.matmul %84, %0, %cst_39 {dimension_numbers = #tpu.dot_dimension_numbers<[1], [0], [0], [1], [0, 0, 1, 1], [], []>} : vector<2x39xf32>, vector<39x512xf32>, vector<2x512xf32> -> vector<2x512xf32>
    %86 = vector.broadcast %1 : vector<1x512xf32> to vector<2x512xf32>
    %87 = arith.addf %85, %86 : vector<2x512xf32>
    %88 = vector.extract_strided_slice %87 {offsets = [0, 0], sizes = [2, 256], strides = [1, 1]} : vector<2x512xf32> to vector<2x256xf32>
    %89 = arith.index_cast %c5_i32 : i32 to index
    %c0_40 = arith.constant 0 : index
    %c0_41 = arith.constant 0 : index
    %90 = vector.load %arg11[%89, %c0_40, %c0_41] : memref<8x2x256xf32, #tpu.memory_space<vmem>>, vector<1x2x256xf32>
    %91 = vector.shape_cast %90 : vector<1x2x256xf32> to vector<2x256xf32>
    %92 = vector.shape_cast %88 : vector<2x256xf32> to vector<1x2x256xf32>
    tpu.vector_store %arg11[%89, %c0_40, %c0_41], %92 {strides = array<i32>} : memref<8x2x256xf32, #tpu.memory_space<vmem>>, vector<1x2x256xf32>,
    %93 = vector.extract_strided_slice %87 {offsets = [0, 256], sizes = [2, 256], strides = [1, 1]} : vector<2x512xf32> to vector<2x256xf32>
    %94 = arith.index_cast %c5_i32 : i32 to index
    %c0_42 = arith.constant 0 : index
    %c0_43 = arith.constant 0 : index
    %95 = vector.load %arg12[%94, %c0_42, %c0_43] : memref<8x2x256xf32, #tpu.memory_space<vmem>>, vector<1x2x256xf32>
    %96 = vector.shape_cast %95 : vector<1x2x256xf32> to vector<2x256xf32>
    %97 = vector.shape_cast %93 : vector<2x256xf32> to vector<1x2x256xf32>
    tpu.vector_store %arg12[%94, %c0_42, %c0_43], %97 {strides = array<i32>} : memref<8x2x256xf32, #tpu.memory_space<vmem>>, vector<1x2x256xf32>,
    %c6_i32 = arith.constant 6 : i32
    %98 = arith.index_cast %c6_i32 : i32 to index
    %c0_44 = arith.constant 0 : index
    %c0_45 = arith.constant 0 : index
    %99 = vector.load %arg0[%98, %c0_44, %c0_45] : memref<8x2x39xf32, #tpu.memory_space<vmem>>, vector<1x2x39xf32>
    %100 = vector.shape_cast %99 : vector<1x2x39xf32> to vector<2x39xf32>
    %cst_46 = arith.constant dense<0.000000e+00> : vector<2x512xf32>
    %101 = tpu.matmul %100, %0, %cst_46 {dimension_numbers = #tpu.dot_dimension_numbers<[1], [0], [0], [1], [0, 0, 1, 1], [], []>} : vector<2x39xf32>, vector<39x512xf32>, vector<2x512xf32> -> vector<2x512xf32>
    %102 = vector.broadcast %1 : vector<1x512xf32> to vector<2x512xf32>
    %103 = arith.addf %101, %102 : vector<2x512xf32>
    %104 = vector.extract_strided_slice %103 {offsets = [0, 0], sizes = [2, 256], strides = [1, 1]} : vector<2x512xf32> to vector<2x256xf32>
    %105 = arith.index_cast %c6_i32 : i32 to index
    %c0_47 = arith.constant 0 : index
    %c0_48 = arith.constant 0 : index
    %106 = vector.load %arg11[%105, %c0_47, %c0_48] : memref<8x2x256xf32, #tpu.memory_space<vmem>>, vector<1x2x256xf32>
    %107 = vector.shape_cast %106 : vector<1x2x256xf32> to vector<2x256xf32>
    %108 = vector.shape_cast %104 : vector<2x256xf32> to vector<1x2x256xf32>
    tpu.vector_store %arg11[%105, %c0_47, %c0_48], %108 {strides = array<i32>} : memref<8x2x256xf32, #tpu.memory_space<vmem>>, vector<1x2x256xf32>,
    %109 = vector.extract_strided_slice %103 {offsets = [0, 256], sizes = [2, 256], strides = [1, 1]} : vector<2x512xf32> to vector<2x256xf32>
    %110 = arith.index_cast %c6_i32 : i32 to index
    %c0_49 = arith.constant 0 : index
    %c0_50 = arith.constant 0 : index
    %111 = vector.load %arg12[%110, %c0_49, %c0_50] : memref<8x2x256xf32, #tpu.memory_space<vmem>>, vector<1x2x256xf32>
    %112 = vector.shape_cast %111 : vector<1x2x256xf32> to vector<2x256xf32>
    %113 = vector.shape_cast %109 : vector<2x256xf32> to vector<1x2x256xf32>
    tpu.vector_store %arg12[%110, %c0_49, %c0_50], %113 {strides = array<i32>} : memref<8x2x256xf32, #tpu.memory_space<vmem>>, vector<1x2x256xf32>,
    %c7_i32 = arith.constant 7 : i32
    %114 = arith.index_cast %c7_i32 : i32 to index
    %c0_51 = arith.constant 0 : index
    %c0_52 = arith.constant 0 : index
    %115 = vector.load %arg0[%114, %c0_51, %c0_52] : memref<8x2x39xf32, #tpu.memory_space<vmem>>, vector<1x2x39xf32>
    %116 = vector.shape_cast %115 : vector<1x2x39xf32> to vector<2x39xf32>
    %cst_53 = arith.constant dense<0.000000e+00> : vector<2x512xf32>
    %117 = tpu.matmul %116, %0, %cst_53 {dimension_numbers = #tpu.dot_dimension_numbers<[1], [0], [0], [1], [0, 0, 1, 1], [], []>} : vector<2x39xf32>, vector<39x512xf32>, vector<2x512xf32> -> vector<2x512xf32>
    %118 = vector.broadcast %1 : vector<1x512xf32> to vector<2x512xf32>
    %119 = arith.addf %117, %118 : vector<2x512xf32>
    %120 = vector.extract_strided_slice %119 {offsets = [0, 0], sizes = [2, 256], strides = [1, 1]} : vector<2x512xf32> to vector<2x256xf32>
    %121 = arith.index_cast %c7_i32 : i32 to index
    %c0_54 = arith.constant 0 : index
    %c0_55 = arith.constant 0 : index
    %122 = vector.load %arg11[%121, %c0_54, %c0_55] : memref<8x2x256xf32, #tpu.memory_space<vmem>>, vector<1x2x256xf32>
    %123 = vector.shape_cast %122 : vector<1x2x256xf32> to vector<2x256xf32>
    %124 = vector.shape_cast %120 : vector<2x256xf32> to vector<1x2x256xf32>
    tpu.vector_store %arg11[%121, %c0_54, %c0_55], %124 {strides = array<i32>} : memref<8x2x256xf32, #tpu.memory_space<vmem>>, vector<1x2x256xf32>,
    %125 = vector.extract_strided_slice %119 {offsets = [0, 256], sizes = [2, 256], strides = [1, 1]} : vector<2x512xf32> to vector<2x256xf32>
    %126 = arith.index_cast %c7_i32 : i32 to index
    %c0_56 = arith.constant 0 : index
    %c0_57 = arith.constant 0 : index
    %127 = vector.load %arg12[%126, %c0_56, %c0_57] : memref<8x2x256xf32, #tpu.memory_space<vmem>>, vector<1x2x256xf32>
    %128 = vector.shape_cast %127 : vector<1x2x256xf32> to vector<2x256xf32>
    %129 = vector.shape_cast %125 : vector<2x256xf32> to vector<1x2x256xf32>
    tpu.vector_store %arg12[%126, %c0_56, %c0_57], %129 {strides = array<i32>} : memref<8x2x256xf32, #tpu.memory_space<vmem>>, vector<1x2x256xf32>,
    %c8_i32 = arith.constant 8 : i32
    %c0_58 = arith.constant 0 : index
    %c0_59 = arith.constant 0 : index
    %130 = vector.load %arg3[%c0_58, %c0_59] : memref<64x256xf32, #tpu.memory_space<vmem>>, vector<64x256xf32>
    %c0_60 = arith.constant 0 : index
    %c0_61 = arith.constant 0 : index
    %131 = vector.load %arg4[%c0_60, %c0_61] : memref<64x256xf32, #tpu.memory_space<vmem>>, vector<64x256xf32>
    %c0_62 = arith.constant 0 : index
    %c0_63 = arith.constant 0 : index
    %132 = vector.load %arg5[%c0_62, %c0_63] : memref<64x32xf32, #tpu.memory_space<vmem>>, vector<64x32xf32>
    %c0_64 = arith.constant 0 : index
    %c0_65 = arith.constant 0 : index
    %133 = vector.load %arg6[%c0_64, %c0_65] : memref<64x32xf32, #tpu.memory_space<vmem>>, vector<64x32xf32>
    %cst_66 = arith.constant 0.000000e+00 : f32
    %134 = vector.broadcast %cst_66 : f32 to vector<2x64xf32>
    %c0_i32_67 = arith.constant 0 : i32
    %c7_i32_68 = arith.constant 7 : i32
    %135 = arith.subi %c7_i32_68, %c0_i32_67 : i32
    %136 = arith.index_cast %c0_i32_67 : i32 to index
    %c0_69 = arith.constant 0 : index
    %c0_70 = arith.constant 0 : index
    %137 = vector.load %arg11[%136, %c0_69, %c0_70] : memref<8x2x256xf32, #tpu.memory_space<vmem>>, vector<1x2x256xf32>
    %138 = vector.shape_cast %137 : vector<1x2x256xf32> to vector<2x256xf32>
    %cst_71 = arith.constant dense<0.000000e+00> : vector<2x256xf32>
    %139 = tpu.matmul %134, %130, %cst_71 {dimension_numbers = #tpu.dot_dimension_numbers<[1], [0], [0], [1], [0, 0, 1, 1], [], []>} : vector<2x64xf32>, vector<64x256xf32>, vector<2x256xf32> -> vector<2x256xf32>
    %140 = arith.addf %138, %139 : vector<2x256xf32>
    %141 = vector.extract_strided_slice %140 {offsets = [0, 0], sizes = [2, 192], strides = [1, 1]} : vector<2x256xf32> to vector<2x192xf32>
    %142 = arith.negf %141 : vector<2x192xf32>
    %143 = math.exp %142 : vector<2x192xf32>
    %cst_72 = arith.constant 1.000000e+00 : f32
    %144 = vector.broadcast %cst_72 : f32 to vector<2x192xf32>
    %145 = arith.addf %144, %143 : vector<2x192xf32>
    %146 = arith.divf %144, %145 : vector<2x192xf32>
    %147 = vector.extract_strided_slice %140 {offsets = [0, 192], sizes = [2, 64], strides = [1, 1]} : vector<2x256xf32> to vector<2x64xf32>
    %148 = math.tanh %147 : vector<2x64xf32>
    %149 = vector.extract_strided_slice %146 {offsets = [0, 0], sizes = [2, 64], strides = [1, 1]} : vector<2x192xf32> to vector<2x64xf32>
    %150 = vector.extract_strided_slice %146 {offsets = [0, 64], sizes = [2, 64], strides = [1, 1]} : vector<2x192xf32> to vector<2x64xf32>
    %151 = vector.extract_strided_slice %146 {offsets = [0, 128], sizes = [2, 64], strides = [1, 1]} : vector<2x192xf32> to vector<2x64xf32>
    %152 = arith.mulf %150, %134 : vector<2x64xf32>
    %153 = arith.mulf %149, %148 : vector<2x64xf32>
    %154 = arith.addf %152, %153 : vector<2x64xf32>
    %155 = math.tanh %154 : vector<2x64xf32>
    %156 = arith.mulf %151, %155 : vector<2x64xf32>
    %157 = arith.index_cast %135 : i32 to index
    %c0_73 = arith.constant 0 : index
    %c0_74 = arith.constant 0 : index
    %158 = vector.load %arg12[%157, %c0_73, %c0_74] : memref<8x2x256xf32, #tpu.memory_space<vmem>>, vector<1x2x256xf32>
    %159 = vector.shape_cast %158 : vector<1x2x256xf32> to vector<2x256xf32>
    %cst_75 = arith.constant dense<0.000000e+00> : vector<2x256xf32>
    %160 = tpu.matmul %134, %131, %cst_75 {dimension_numbers = #tpu.dot_dimension_numbers<[1], [0], [0], [1], [0, 0, 1, 1], [], []>} : vector<2x64xf32>, vector<64x256xf32>, vector<2x256xf32> -> vector<2x256xf32>
    %161 = arith.addf %159, %160 : vector<2x256xf32>
    %162 = vector.extract_strided_slice %161 {offsets = [0, 0], sizes = [2, 192], strides = [1, 1]} : vector<2x256xf32> to vector<2x192xf32>
    %163 = arith.negf %162 : vector<2x192xf32>
    %164 = math.exp %163 : vector<2x192xf32>
    %cst_76 = arith.constant 1.000000e+00 : f32
    %165 = vector.broadcast %cst_76 : f32 to vector<2x192xf32>
    %166 = arith.addf %165, %164 : vector<2x192xf32>
    %167 = arith.divf %165, %166 : vector<2x192xf32>
    %168 = vector.extract_strided_slice %161 {offsets = [0, 192], sizes = [2, 64], strides = [1, 1]} : vector<2x256xf32> to vector<2x64xf32>
    %169 = math.tanh %168 : vector<2x64xf32>
    %170 = vector.extract_strided_slice %167 {offsets = [0, 0], sizes = [2, 64], strides = [1, 1]} : vector<2x192xf32> to vector<2x64xf32>
    %171 = vector.extract_strided_slice %167 {offsets = [0, 64], sizes = [2, 64], strides = [1, 1]} : vector<2x192xf32> to vector<2x64xf32>
    %172 = vector.extract_strided_slice %167 {offsets = [0, 128], sizes = [2, 64], strides = [1, 1]} : vector<2x192xf32> to vector<2x64xf32>
    %173 = arith.mulf %171, %134 : vector<2x64xf32>
    %174 = arith.mulf %170, %169 : vector<2x64xf32>
    %175 = arith.addf %173, %174 : vector<2x64xf32>
    %176 = math.tanh %175 : vector<2x64xf32>
    %177 = arith.mulf %172, %176 : vector<2x64xf32>
    %cst_77 = arith.constant dense<0.000000e+00> : vector<2x32xf32>
    %178 = tpu.matmul %156, %132, %cst_77 {dimension_numbers = #tpu.dot_dimension_numbers<[1], [0], [0], [1], [0, 0, 1, 1], [], []>} : vector<2x64xf32>, vector<64x32xf32>, vector<2x32xf32> -> vector<2x32xf32>
    %179 = arith.index_cast %c0_i32_67 : i32 to index
    %c0_78 = arith.constant 0 : index
    %c0_79 = arith.constant 0 : index
    %180 = vector.load %arg13[%179, %c0_78, %c0_79] : memref<8x2x32xf32, #tpu.memory_space<vmem>>, vector<1x2x32xf32>
    %181 = vector.shape_cast %180 : vector<1x2x32xf32> to vector<2x32xf32>
    %182 = vector.shape_cast %178 : vector<2x32xf32> to vector<1x2x32xf32>
    tpu.vector_store %arg13[%179, %c0_78, %c0_79], %182 {strides = array<i32>} : memref<8x2x32xf32, #tpu.memory_space<vmem>>, vector<1x2x32xf32>,
    %cst_80 = arith.constant dense<0.000000e+00> : vector<2x32xf32>
    %183 = tpu.matmul %177, %133, %cst_80 {dimension_numbers = #tpu.dot_dimension_numbers<[1], [0], [0], [1], [0, 0, 1, 1], [], []>} : vector<2x64xf32>, vector<64x32xf32>, vector<2x32xf32> -> vector<2x32xf32>
    %184 = arith.index_cast %135 : i32 to index
    %c0_81 = arith.constant 0 : index
    %c0_82 = arith.constant 0 : index
    %185 = vector.load %arg14[%184, %c0_81, %c0_82] : memref<8x2x32xf32, #tpu.memory_space<vmem>>, vector<1x2x32xf32>
    %186 = vector.shape_cast %185 : vector<1x2x32xf32> to vector<2x32xf32>
    %187 = vector.shape_cast %183 : vector<2x32xf32> to vector<1x2x32xf32>
    tpu.vector_store %arg14[%184, %c0_81, %c0_82], %187 {strides = array<i32>} : memref<8x2x32xf32, #tpu.memory_space<vmem>>, vector<1x2x32xf32>,
    %c1_i32_83 = arith.constant 1 : i32
    %c7_i32_84 = arith.constant 7 : i32
    %188 = arith.subi %c7_i32_84, %c1_i32_83 : i32
    %189 = arith.index_cast %c1_i32_83 : i32 to index
    %c0_85 = arith.constant 0 : index
    %c0_86 = arith.constant 0 : index
    %190 = vector.load %arg11[%189, %c0_85, %c0_86] : memref<8x2x256xf32, #tpu.memory_space<vmem>>, vector<1x2x256xf32>
    %191 = vector.shape_cast %190 : vector<1x2x256xf32> to vector<2x256xf32>
    %cst_87 = arith.constant dense<0.000000e+00> : vector<2x256xf32>
    %192 = tpu.matmul %156, %130, %cst_87 {dimension_numbers = #tpu.dot_dimension_numbers<[1], [0], [0], [1], [0, 0, 1, 1], [], []>} : vector<2x64xf32>, vector<64x256xf32>, vector<2x256xf32> -> vector<2x256xf32>
    %193 = arith.addf %191, %192 : vector<2x256xf32>
    %194 = vector.extract_strided_slice %193 {offsets = [0, 0], sizes = [2, 192], strides = [1, 1]} : vector<2x256xf32> to vector<2x192xf32>
    %195 = arith.negf %194 : vector<2x192xf32>
    %196 = math.exp %195 : vector<2x192xf32>
    %cst_88 = arith.constant 1.000000e+00 : f32
    %197 = vector.broadcast %cst_88 : f32 to vector<2x192xf32>
    %198 = arith.addf %197, %196 : vector<2x192xf32>
    %199 = arith.divf %197, %198 : vector<2x192xf32>
    %200 = vector.extract_strided_slice %193 {offsets = [0, 192], sizes = [2, 64], strides = [1, 1]} : vector<2x256xf32> to vector<2x64xf32>
    %201 = math.tanh %200 : vector<2x64xf32>
    %202 = vector.extract_strided_slice %199 {offsets = [0, 0], sizes = [2, 64], strides = [1, 1]} : vector<2x192xf32> to vector<2x64xf32>
    %203 = vector.extract_strided_slice %199 {offsets = [0, 64], sizes = [2, 64], strides = [1, 1]} : vector<2x192xf32> to vector<2x64xf32>
    %204 = vector.extract_strided_slice %199 {offsets = [0, 128], sizes = [2, 64], strides = [1, 1]} : vector<2x192xf32> to vector<2x64xf32>
    %205 = arith.mulf %203, %154 : vector<2x64xf32>
    %206 = arith.mulf %202, %201 : vector<2x64xf32>
    %207 = arith.addf %205, %206 : vector<2x64xf32>
    %208 = math.tanh %207 : vector<2x64xf32>
    %209 = arith.mulf %204, %208 : vector<2x64xf32>
    %210 = arith.index_cast %188 : i32 to index
    %c0_89 = arith.constant 0 : index
    %c0_90 = arith.constant 0 : index
    %211 = vector.load %arg12[%210, %c0_89, %c0_90] : memref<8x2x256xf32, #tpu.memory_space<vmem>>, vector<1x2x256xf32>
    %212 = vector.shape_cast %211 : vector<1x2x256xf32> to vector<2x256xf32>
    %cst_91 = arith.constant dense<0.000000e+00> : vector<2x256xf32>
    %213 = tpu.matmul %177, %131, %cst_91 {dimension_numbers = #tpu.dot_dimension_numbers<[1], [0], [0], [1], [0, 0, 1, 1], [], []>} : vector<2x64xf32>, vector<64x256xf32>, vector<2x256xf32> -> vector<2x256xf32>
    %214 = arith.addf %212, %213 : vector<2x256xf32>
    %215 = vector.extract_strided_slice %214 {offsets = [0, 0], sizes = [2, 192], strides = [1, 1]} : vector<2x256xf32> to vector<2x192xf32>
    %216 = arith.negf %215 : vector<2x192xf32>
    %217 = math.exp %216 : vector<2x192xf32>
    %cst_92 = arith.constant 1.000000e+00 : f32
    %218 = vector.broadcast %cst_92 : f32 to vector<2x192xf32>
    %219 = arith.addf %218, %217 : vector<2x192xf32>
    %220 = arith.divf %218, %219 : vector<2x192xf32>
    %221 = vector.extract_strided_slice %214 {offsets = [0, 192], sizes = [2, 64], strides = [1, 1]} : vector<2x256xf32> to vector<2x64xf32>
    %222 = math.tanh %221 : vector<2x64xf32>
    %223 = vector.extract_strided_slice %220 {offsets = [0, 0], sizes = [2, 64], strides = [1, 1]} : vector<2x192xf32> to vector<2x64xf32>
    %224 = vector.extract_strided_slice %220 {offsets = [0, 64], sizes = [2, 64], strides = [1, 1]} : vector<2x192xf32> to vector<2x64xf32>
    %225 = vector.extract_strided_slice %220 {offsets = [0, 128], sizes = [2, 64], strides = [1, 1]} : vector<2x192xf32> to vector<2x64xf32>
    %226 = arith.mulf %224, %175 : vector<2x64xf32>
    %227 = arith.mulf %223, %222 : vector<2x64xf32>
    %228 = arith.addf %226, %227 : vector<2x64xf32>
    %229 = math.tanh %228 : vector<2x64xf32>
    %230 = arith.mulf %225, %229 : vector<2x64xf32>
    %cst_93 = arith.constant dense<0.000000e+00> : vector<2x32xf32>
    %231 = tpu.matmul %209, %132, %cst_93 {dimension_numbers = #tpu.dot_dimension_numbers<[1], [0], [0], [1], [0, 0, 1, 1], [], []>} : vector<2x64xf32>, vector<64x32xf32>, vector<2x32xf32> -> vector<2x32xf32>
    %232 = arith.index_cast %c1_i32_83 : i32 to index
    %c0_94 = arith.constant 0 : index
    %c0_95 = arith.constant 0 : index
    %233 = vector.load %arg13[%232, %c0_94, %c0_95] : memref<8x2x32xf32, #tpu.memory_space<vmem>>, vector<1x2x32xf32>
    %234 = vector.shape_cast %233 : vector<1x2x32xf32> to vector<2x32xf32>
    %235 = vector.shape_cast %231 : vector<2x32xf32> to vector<1x2x32xf32>
    tpu.vector_store %arg13[%232, %c0_94, %c0_95], %235 {strides = array<i32>} : memref<8x2x32xf32, #tpu.memory_space<vmem>>, vector<1x2x32xf32>,
    %cst_96 = arith.constant dense<0.000000e+00> : vector<2x32xf32>
    %236 = tpu.matmul %230, %133, %cst_96 {dimension_numbers = #tpu.dot_dimension_numbers<[1], [0], [0], [1], [0, 0, 1, 1], [], []>} : vector<2x64xf32>, vector<64x32xf32>, vector<2x32xf32> -> vector<2x32xf32>
    %237 = arith.index_cast %188 : i32 to index
    %c0_97 = arith.constant 0 : index
    %c0_98 = arith.constant 0 : index
    %238 = vector.load %arg14[%237, %c0_97, %c0_98] : memref<8x2x32xf32, #tpu.memory_space<vmem>>, vector<1x2x32xf32>
    %239 = vector.shape_cast %238 : vector<1x2x32xf32> to vector<2x32xf32>
    %240 = vector.shape_cast %236 : vector<2x32xf32> to vector<1x2x32xf32>
    tpu.vector_store %arg14[%237, %c0_97, %c0_98], %240 {strides = array<i32>} : memref<8x2x32xf32, #tpu.memory_space<vmem>>, vector<1x2x32xf32>,
    %c2_i32_99 = arith.constant 2 : i32
    %c7_i32_100 = arith.constant 7 : i32
    %241 = arith.subi %c7_i32_100, %c2_i32_99 : i32
    %242 = arith.index_cast %c2_i32_99 : i32 to index
    %c0_101 = arith.constant 0 : index
    %c0_102 = arith.constant 0 : index
    %243 = vector.load %arg11[%242, %c0_101, %c0_102] : memref<8x2x256xf32, #tpu.memory_space<vmem>>, vector<1x2x256xf32>
    %244 = vector.shape_cast %243 : vector<1x2x256xf32> to vector<2x256xf32>
    %cst_103 = arith.constant dense<0.000000e+00> : vector<2x256xf32>
    %245 = tpu.matmul %209, %130, %cst_103 {dimension_numbers = #tpu.dot_dimension_numbers<[1], [0], [0], [1], [0, 0, 1, 1], [], []>} : vector<2x64xf32>, vector<64x256xf32>, vector<2x256xf32> -> vector<2x256xf32>
    %246 = arith.addf %244, %245 : vector<2x256xf32>
    %247 = vector.extract_strided_slice %246 {offsets = [0, 0], sizes = [2, 192], strides = [1, 1]} : vector<2x256xf32> to vector<2x192xf32>
    %248 = arith.negf %247 : vector<2x192xf32>
    %249 = math.exp %248 : vector<2x192xf32>
    %cst_104 = arith.constant 1.000000e+00 : f32
    %250 = vector.broadcast %cst_104 : f32 to vector<2x192xf32>
    %251 = arith.addf %250, %249 : vector<2x192xf32>
    %252 = arith.divf %250, %251 : vector<2x192xf32>
    %253 = vector.extract_strided_slice %246 {offsets = [0, 192], sizes = [2, 64], strides = [1, 1]} : vector<2x256xf32> to vector<2x64xf32>
    %254 = math.tanh %253 : vector<2x64xf32>
    %255 = vector.extract_strided_slice %252 {offsets = [0, 0], sizes = [2, 64], strides = [1, 1]} : vector<2x192xf32> to vector<2x64xf32>
    %256 = vector.extract_strided_slice %252 {offsets = [0, 64], sizes = [2, 64], strides = [1, 1]} : vector<2x192xf32> to vector<2x64xf32>
    %257 = vector.extract_strided_slice %252 {offsets = [0, 128], sizes = [2, 64], strides = [1, 1]} : vector<2x192xf32> to vector<2x64xf32>
    %258 = arith.mulf %256, %207 : vector<2x64xf32>
    %259 = arith.mulf %255, %254 : vector<2x64xf32>
    %260 = arith.addf %258, %259 : vector<2x64xf32>
    %261 = math.tanh %260 : vector<2x64xf32>
    %262 = arith.mulf %257, %261 : vector<2x64xf32>
    %263 = arith.index_cast %241 : i32 to index
    %c0_105 = arith.constant 0 : index
    %c0_106 = arith.constant 0 : index
    %264 = vector.load %arg12[%263, %c0_105, %c0_106] : memref<8x2x256xf32, #tpu.memory_space<vmem>>, vector<1x2x256xf32>
    %265 = vector.shape_cast %264 : vector<1x2x256xf32> to vector<2x256xf32>
    %cst_107 = arith.constant dense<0.000000e+00> : vector<2x256xf32>
    %266 = tpu.matmul %230, %131, %cst_107 {dimension_numbers = #tpu.dot_dimension_numbers<[1], [0], [0], [1], [0, 0, 1, 1], [], []>} : vector<2x64xf32>, vector<64x256xf32>, vector<2x256xf32> -> vector<2x256xf32>
    %267 = arith.addf %265, %266 : vector<2x256xf32>
    %268 = vector.extract_strided_slice %267 {offsets = [0, 0], sizes = [2, 192], strides = [1, 1]} : vector<2x256xf32> to vector<2x192xf32>
    %269 = arith.negf %268 : vector<2x192xf32>
    %270 = math.exp %269 : vector<2x192xf32>
    %cst_108 = arith.constant 1.000000e+00 : f32
    %271 = vector.broadcast %cst_108 : f32 to vector<2x192xf32>
    %272 = arith.addf %271, %270 : vector<2x192xf32>
    %273 = arith.divf %271, %272 : vector<2x192xf32>
    %274 = vector.extract_strided_slice %267 {offsets = [0, 192], sizes = [2, 64], strides = [1, 1]} : vector<2x256xf32> to vector<2x64xf32>
    %275 = math.tanh %274 : vector<2x64xf32>
    %276 = vector.extract_strided_slice %273 {offsets = [0, 0], sizes = [2, 64], strides = [1, 1]} : vector<2x192xf32> to vector<2x64xf32>
    %277 = vector.extract_strided_slice %273 {offsets = [0, 64], sizes = [2, 64], strides = [1, 1]} : vector<2x192xf32> to vector<2x64xf32>
    %278 = vector.extract_strided_slice %273 {offsets = [0, 128], sizes = [2, 64], strides = [1, 1]} : vector<2x192xf32> to vector<2x64xf32>
    %279 = arith.mulf %277, %228 : vector<2x64xf32>
    %280 = arith.mulf %276, %275 : vector<2x64xf32>
    %281 = arith.addf %279, %280 : vector<2x64xf32>
    %282 = math.tanh %281 : vector<2x64xf32>
    %283 = arith.mulf %278, %282 : vector<2x64xf32>
    %cst_109 = arith.constant dense<0.000000e+00> : vector<2x32xf32>
    %284 = tpu.matmul %262, %132, %cst_109 {dimension_numbers = #tpu.dot_dimension_numbers<[1], [0], [0], [1], [0, 0, 1, 1], [], []>} : vector<2x64xf32>, vector<64x32xf32>, vector<2x32xf32> -> vector<2x32xf32>
    %285 = arith.index_cast %c2_i32_99 : i32 to index
    %c0_110 = arith.constant 0 : index
    %c0_111 = arith.constant 0 : index
    %286 = vector.load %arg13[%285, %c0_110, %c0_111] : memref<8x2x32xf32, #tpu.memory_space<vmem>>, vector<1x2x32xf32>
    %287 = vector.shape_cast %286 : vector<1x2x32xf32> to vector<2x32xf32>
    %288 = vector.shape_cast %284 : vector<2x32xf32> to vector<1x2x32xf32>
    tpu.vector_store %arg13[%285, %c0_110, %c0_111], %288 {strides = array<i32>} : memref<8x2x32xf32, #tpu.memory_space<vmem>>, vector<1x2x32xf32>,
    %cst_112 = arith.constant dense<0.000000e+00> : vector<2x32xf32>
    %289 = tpu.matmul %283, %133, %cst_112 {dimension_numbers = #tpu.dot_dimension_numbers<[1], [0], [0], [1], [0, 0, 1, 1], [], []>} : vector<2x64xf32>, vector<64x32xf32>, vector<2x32xf32> -> vector<2x32xf32>
    %290 = arith.index_cast %241 : i32 to index
    %c0_113 = arith.constant 0 : index
    %c0_114 = arith.constant 0 : index
    %291 = vector.load %arg14[%290, %c0_113, %c0_114] : memref<8x2x32xf32, #tpu.memory_space<vmem>>, vector<1x2x32xf32>
    %292 = vector.shape_cast %291 : vector<1x2x32xf32> to vector<2x32xf32>
    %293 = vector.shape_cast %289 : vector<2x32xf32> to vector<1x2x32xf32>
    tpu.vector_store %arg14[%290, %c0_113, %c0_114], %293 {strides = array<i32>} : memref<8x2x32xf32, #tpu.memory_space<vmem>>, vector<1x2x32xf32>,
    %c3_i32_115 = arith.constant 3 : i32
    %c7_i32_116 = arith.constant 7 : i32
    %294 = arith.subi %c7_i32_116, %c3_i32_115 : i32
    %295 = arith.index_cast %c3_i32_115 : i32 to index
    %c0_117 = arith.constant 0 : index
    %c0_118 = arith.constant 0 : index
    %296 = vector.load %arg11[%295, %c0_117, %c0_118] : memref<8x2x256xf32, #tpu.memory_space<vmem>>, vector<1x2x256xf32>
    %297 = vector.shape_cast %296 : vector<1x2x256xf32> to vector<2x256xf32>
    %cst_119 = arith.constant dense<0.000000e+00> : vector<2x256xf32>
    %298 = tpu.matmul %262, %130, %cst_119 {dimension_numbers = #tpu.dot_dimension_numbers<[1], [0], [0], [1], [0, 0, 1, 1], [], []>} : vector<2x64xf32>, vector<64x256xf32>, vector<2x256xf32> -> vector<2x256xf32>
    %299 = arith.addf %297, %298 : vector<2x256xf32>
    %300 = vector.extract_strided_slice %299 {offsets = [0, 0], sizes = [2, 192], strides = [1, 1]} : vector<2x256xf32> to vector<2x192xf32>
    %301 = arith.negf %300 : vector<2x192xf32>
    %302 = math.exp %301 : vector<2x192xf32>
    %cst_120 = arith.constant 1.000000e+00 : f32
    %303 = vector.broadcast %cst_120 : f32 to vector<2x192xf32>
    %304 = arith.addf %303, %302 : vector<2x192xf32>
    %305 = arith.divf %303, %304 : vector<2x192xf32>
    %306 = vector.extract_strided_slice %299 {offsets = [0, 192], sizes = [2, 64], strides = [1, 1]} : vector<2x256xf32> to vector<2x64xf32>
    %307 = math.tanh %306 : vector<2x64xf32>
    %308 = vector.extract_strided_slice %305 {offsets = [0, 0], sizes = [2, 64], strides = [1, 1]} : vector<2x192xf32> to vector<2x64xf32>
    %309 = vector.extract_strided_slice %305 {offsets = [0, 64], sizes = [2, 64], strides = [1, 1]} : vector<2x192xf32> to vector<2x64xf32>
    %310 = vector.extract_strided_slice %305 {offsets = [0, 128], sizes = [2, 64], strides = [1, 1]} : vector<2x192xf32> to vector<2x64xf32>
    %311 = arith.mulf %309, %260 : vector<2x64xf32>
    %312 = arith.mulf %308, %307 : vector<2x64xf32>
    %313 = arith.addf %311, %312 : vector<2x64xf32>
    %314 = math.tanh %313 : vector<2x64xf32>
    %315 = arith.mulf %310, %314 : vector<2x64xf32>
    %316 = arith.index_cast %294 : i32 to index
    %c0_121 = arith.constant 0 : index
    %c0_122 = arith.constant 0 : index
    %317 = vector.load %arg12[%316, %c0_121, %c0_122] : memref<8x2x256xf32, #tpu.memory_space<vmem>>, vector<1x2x256xf32>
    %318 = vector.shape_cast %317 : vector<1x2x256xf32> to vector<2x256xf32>
    %cst_123 = arith.constant dense<0.000000e+00> : vector<2x256xf32>
    %319 = tpu.matmul %283, %131, %cst_123 {dimension_numbers = #tpu.dot_dimension_numbers<[1], [0], [0], [1], [0, 0, 1, 1], [], []>} : vector<2x64xf32>, vector<64x256xf32>, vector<2x256xf32> -> vector<2x256xf32>
    %320 = arith.addf %318, %319 : vector<2x256xf32>
    %321 = vector.extract_strided_slice %320 {offsets = [0, 0], sizes = [2, 192], strides = [1, 1]} : vector<2x256xf32> to vector<2x192xf32>
    %322 = arith.negf %321 : vector<2x192xf32>
    %323 = math.exp %322 : vector<2x192xf32>
    %cst_124 = arith.constant 1.000000e+00 : f32
    %324 = vector.broadcast %cst_124 : f32 to vector<2x192xf32>
    %325 = arith.addf %324, %323 : vector<2x192xf32>
    %326 = arith.divf %324, %325 : vector<2x192xf32>
    %327 = vector.extract_strided_slice %320 {offsets = [0, 192], sizes = [2, 64], strides = [1, 1]} : vector<2x256xf32> to vector<2x64xf32>
    %328 = math.tanh %327 : vector<2x64xf32>
    %329 = vector.extract_strided_slice %326 {offsets = [0, 0], sizes = [2, 64], strides = [1, 1]} : vector<2x192xf32> to vector<2x64xf32>
    %330 = vector.extract_strided_slice %326 {offsets = [0, 64], sizes = [2, 64], strides = [1, 1]} : vector<2x192xf32> to vector<2x64xf32>
    %331 = vector.extract_strided_slice %326 {offsets = [0, 128], sizes = [2, 64], strides = [1, 1]} : vector<2x192xf32> to vector<2x64xf32>
    %332 = arith.mulf %330, %281 : vector<2x64xf32>
    %333 = arith.mulf %329, %328 : vector<2x64xf32>
    %334 = arith.addf %332, %333 : vector<2x64xf32>
    %335 = math.tanh %334 : vector<2x64xf32>
    %336 = arith.mulf %331, %335 : vector<2x64xf32>
    %cst_125 = arith.constant dense<0.000000e+00> : vector<2x32xf32>
    %337 = tpu.matmul %315, %132, %cst_125 {dimension_numbers = #tpu.dot_dimension_numbers<[1], [0], [0], [1], [0, 0, 1, 1], [], []>} : vector<2x64xf32>, vector<64x32xf32>, vector<2x32xf32> -> vector<2x32xf32>
    %338 = arith.index_cast %c3_i32_115 : i32 to index
    %c0_126 = arith.constant 0 : index
    %c0_127 = arith.constant 0 : index
    %339 = vector.load %arg13[%338, %c0_126, %c0_127] : memref<8x2x32xf32, #tpu.memory_space<vmem>>, vector<1x2x32xf32>
    %340 = vector.shape_cast %339 : vector<1x2x32xf32> to vector<2x32xf32>
    %341 = vector.shape_cast %337 : vector<2x32xf32> to vector<1x2x32xf32>
    tpu.vector_store %arg13[%338, %c0_126, %c0_127], %341 {strides = array<i32>} : memref<8x2x32xf32, #tpu.memory_space<vmem>>, vector<1x2x32xf32>,
    %cst_128 = arith.constant dense<0.000000e+00> : vector<2x32xf32>
    %342 = tpu.matmul %336, %133, %cst_128 {dimension_numbers = #tpu.dot_dimension_numbers<[1], [0], [0], [1], [0, 0, 1, 1], [], []>} : vector<2x64xf32>, vector<64x32xf32>, vector<2x32xf32> -> vector<2x32xf32>
    %343 = arith.index_cast %294 : i32 to index
    %c0_129 = arith.constant 0 : index
    %c0_130 = arith.constant 0 : index
    %344 = vector.load %arg14[%343, %c0_129, %c0_130] : memref<8x2x32xf32, #tpu.memory_space<vmem>>, vector<1x2x32xf32>
    %345 = vector.shape_cast %344 : vector<1x2x32xf32> to vector<2x32xf32>
    %346 = vector.shape_cast %342 : vector<2x32xf32> to vector<1x2x32xf32>
    tpu.vector_store %arg14[%343, %c0_129, %c0_130], %346 {strides = array<i32>} : memref<8x2x32xf32, #tpu.memory_space<vmem>>, vector<1x2x32xf32>,
    %c4_i32_131 = arith.constant 4 : i32
    %c7_i32_132 = arith.constant 7 : i32
    %347 = arith.subi %c7_i32_132, %c4_i32_131 : i32
    %348 = arith.index_cast %c4_i32_131 : i32 to index
    %c0_133 = arith.constant 0 : index
    %c0_134 = arith.constant 0 : index
    %349 = vector.load %arg11[%348, %c0_133, %c0_134] : memref<8x2x256xf32, #tpu.memory_space<vmem>>, vector<1x2x256xf32>
    %350 = vector.shape_cast %349 : vector<1x2x256xf32> to vector<2x256xf32>
    %cst_135 = arith.constant dense<0.000000e+00> : vector<2x256xf32>
    %351 = tpu.matmul %315, %130, %cst_135 {dimension_numbers = #tpu.dot_dimension_numbers<[1], [0], [0], [1], [0, 0, 1, 1], [], []>} : vector<2x64xf32>, vector<64x256xf32>, vector<2x256xf32> -> vector<2x256xf32>
    %352 = arith.addf %350, %351 : vector<2x256xf32>
    %353 = vector.extract_strided_slice %352 {offsets = [0, 0], sizes = [2, 192], strides = [1, 1]} : vector<2x256xf32> to vector<2x192xf32>
    %354 = arith.negf %353 : vector<2x192xf32>
    %355 = math.exp %354 : vector<2x192xf32>
    %cst_136 = arith.constant 1.000000e+00 : f32
    %356 = vector.broadcast %cst_136 : f32 to vector<2x192xf32>
    %357 = arith.addf %356, %355 : vector<2x192xf32>
    %358 = arith.divf %356, %357 : vector<2x192xf32>
    %359 = vector.extract_strided_slice %352 {offsets = [0, 192], sizes = [2, 64], strides = [1, 1]} : vector<2x256xf32> to vector<2x64xf32>
    %360 = math.tanh %359 : vector<2x64xf32>
    %361 = vector.extract_strided_slice %358 {offsets = [0, 0], sizes = [2, 64], strides = [1, 1]} : vector<2x192xf32> to vector<2x64xf32>
    %362 = vector.extract_strided_slice %358 {offsets = [0, 64], sizes = [2, 64], strides = [1, 1]} : vector<2x192xf32> to vector<2x64xf32>
    %363 = vector.extract_strided_slice %358 {offsets = [0, 128], sizes = [2, 64], strides = [1, 1]} : vector<2x192xf32> to vector<2x64xf32>
    %364 = arith.mulf %362, %313 : vector<2x64xf32>
    %365 = arith.mulf %361, %360 : vector<2x64xf32>
    %366 = arith.addf %364, %365 : vector<2x64xf32>
    %367 = math.tanh %366 : vector<2x64xf32>
    %368 = arith.mulf %363, %367 : vector<2x64xf32>
    %369 = arith.index_cast %347 : i32 to index
    %c0_137 = arith.constant 0 : index
    %c0_138 = arith.constant 0 : index
    %370 = vector.load %arg12[%369, %c0_137, %c0_138] : memref<8x2x256xf32, #tpu.memory_space<vmem>>, vector<1x2x256xf32>
    %371 = vector.shape_cast %370 : vector<1x2x256xf32> to vector<2x256xf32>
    %cst_139 = arith.constant dense<0.000000e+00> : vector<2x256xf32>
    %372 = tpu.matmul %336, %131, %cst_139 {dimension_numbers = #tpu.dot_dimension_numbers<[1], [0], [0], [1], [0, 0, 1, 1], [], []>} : vector<2x64xf32>, vector<64x256xf32>, vector<2x256xf32> -> vector<2x256xf32>
    %373 = arith.addf %371, %372 : vector<2x256xf32>
    %374 = vector.extract_strided_slice %373 {offsets = [0, 0], sizes = [2, 192], strides = [1, 1]} : vector<2x256xf32> to vector<2x192xf32>
    %375 = arith.negf %374 : vector<2x192xf32>
    %376 = math.exp %375 : vector<2x192xf32>
    %cst_140 = arith.constant 1.000000e+00 : f32
    %377 = vector.broadcast %cst_140 : f32 to vector<2x192xf32>
    %378 = arith.addf %377, %376 : vector<2x192xf32>
    %379 = arith.divf %377, %378 : vector<2x192xf32>
    %380 = vector.extract_strided_slice %373 {offsets = [0, 192], sizes = [2, 64], strides = [1, 1]} : vector<2x256xf32> to vector<2x64xf32>
    %381 = math.tanh %380 : vector<2x64xf32>
    %382 = vector.extract_strided_slice %379 {offsets = [0, 0], sizes = [2, 64], strides = [1, 1]} : vector<2x192xf32> to vector<2x64xf32>
    %383 = vector.extract_strided_slice %379 {offsets = [0, 64], sizes = [2, 64], strides = [1, 1]} : vector<2x192xf32> to vector<2x64xf32>
    %384 = vector.extract_strided_slice %379 {offsets = [0, 128], sizes = [2, 64], strides = [1, 1]} : vector<2x192xf32> to vector<2x64xf32>
    %385 = arith.mulf %383, %334 : vector<2x64xf32>
    %386 = arith.mulf %382, %381 : vector<2x64xf32>
    %387 = arith.addf %385, %386 : vector<2x64xf32>
    %388 = math.tanh %387 : vector<2x64xf32>
    %389 = arith.mulf %384, %388 : vector<2x64xf32>
    %cst_141 = arith.constant dense<0.000000e+00> : vector<2x32xf32>
    %390 = tpu.matmul %368, %132, %cst_141 {dimension_numbers = #tpu.dot_dimension_numbers<[1], [0], [0], [1], [0, 0, 1, 1], [], []>} : vector<2x64xf32>, vector<64x32xf32>, vector<2x32xf32> -> vector<2x32xf32>
    %391 = arith.index_cast %c4_i32_131 : i32 to index
    %c0_142 = arith.constant 0 : index
    %c0_143 = arith.constant 0 : index
    %392 = vector.load %arg13[%391, %c0_142, %c0_143] : memref<8x2x32xf32, #tpu.memory_space<vmem>>, vector<1x2x32xf32>
    %393 = vector.shape_cast %392 : vector<1x2x32xf32> to vector<2x32xf32>
    %394 = vector.shape_cast %390 : vector<2x32xf32> to vector<1x2x32xf32>
    tpu.vector_store %arg13[%391, %c0_142, %c0_143], %394 {strides = array<i32>} : memref<8x2x32xf32, #tpu.memory_space<vmem>>, vector<1x2x32xf32>,
    %cst_144 = arith.constant dense<0.000000e+00> : vector<2x32xf32>
    %395 = tpu.matmul %389, %133, %cst_144 {dimension_numbers = #tpu.dot_dimension_numbers<[1], [0], [0], [1], [0, 0, 1, 1], [], []>} : vector<2x64xf32>, vector<64x32xf32>, vector<2x32xf32> -> vector<2x32xf32>
    %396 = arith.index_cast %347 : i32 to index
    %c0_145 = arith.constant 0 : index
    %c0_146 = arith.constant 0 : index
    %397 = vector.load %arg14[%396, %c0_145, %c0_146] : memref<8x2x32xf32, #tpu.memory_space<vmem>>, vector<1x2x32xf32>
    %398 = vector.shape_cast %397 : vector<1x2x32xf32> to vector<2x32xf32>
    %399 = vector.shape_cast %395 : vector<2x32xf32> to vector<1x2x32xf32>
    tpu.vector_store %arg14[%396, %c0_145, %c0_146], %399 {strides = array<i32>} : memref<8x2x32xf32, #tpu.memory_space<vmem>>, vector<1x2x32xf32>,
    %c5_i32_147 = arith.constant 5 : i32
    %c7_i32_148 = arith.constant 7 : i32
    %400 = arith.subi %c7_i32_148, %c5_i32_147 : i32
    %401 = arith.index_cast %c5_i32_147 : i32 to index
    %c0_149 = arith.constant 0 : index
    %c0_150 = arith.constant 0 : index
    %402 = vector.load %arg11[%401, %c0_149, %c0_150] : memref<8x2x256xf32, #tpu.memory_space<vmem>>, vector<1x2x256xf32>
    %403 = vector.shape_cast %402 : vector<1x2x256xf32> to vector<2x256xf32>
    %cst_151 = arith.constant dense<0.000000e+00> : vector<2x256xf32>
    %404 = tpu.matmul %368, %130, %cst_151 {dimension_numbers = #tpu.dot_dimension_numbers<[1], [0], [0], [1], [0, 0, 1, 1], [], []>} : vector<2x64xf32>, vector<64x256xf32>, vector<2x256xf32> -> vector<2x256xf32>
    %405 = arith.addf %403, %404 : vector<2x256xf32>
    %406 = vector.extract_strided_slice %405 {offsets = [0, 0], sizes = [2, 192], strides = [1, 1]} : vector<2x256xf32> to vector<2x192xf32>
    %407 = arith.negf %406 : vector<2x192xf32>
    %408 = math.exp %407 : vector<2x192xf32>
    %cst_152 = arith.constant 1.000000e+00 : f32
    %409 = vector.broadcast %cst_152 : f32 to vector<2x192xf32>
    %410 = arith.addf %409, %408 : vector<2x192xf32>
    %411 = arith.divf %409, %410 : vector<2x192xf32>
    %412 = vector.extract_strided_slice %405 {offsets = [0, 192], sizes = [2, 64], strides = [1, 1]} : vector<2x256xf32> to vector<2x64xf32>
    %413 = math.tanh %412 : vector<2x64xf32>
    %414 = vector.extract_strided_slice %411 {offsets = [0, 0], sizes = [2, 64], strides = [1, 1]} : vector<2x192xf32> to vector<2x64xf32>
    %415 = vector.extract_strided_slice %411 {offsets = [0, 64], sizes = [2, 64], strides = [1, 1]} : vector<2x192xf32> to vector<2x64xf32>
    %416 = vector.extract_strided_slice %411 {offsets = [0, 128], sizes = [2, 64], strides = [1, 1]} : vector<2x192xf32> to vector<2x64xf32>
    %417 = arith.mulf %415, %366 : vector<2x64xf32>
    %418 = arith.mulf %414, %413 : vector<2x64xf32>
    %419 = arith.addf %417, %418 : vector<2x64xf32>
    %420 = math.tanh %419 : vector<2x64xf32>
    %421 = arith.mulf %416, %420 : vector<2x64xf32>
    %422 = arith.index_cast %400 : i32 to index
    %c0_153 = arith.constant 0 : index
    %c0_154 = arith.constant 0 : index
    %423 = vector.load %arg12[%422, %c0_153, %c0_154] : memref<8x2x256xf32, #tpu.memory_space<vmem>>, vector<1x2x256xf32>
    %424 = vector.shape_cast %423 : vector<1x2x256xf32> to vector<2x256xf32>
    %cst_155 = arith.constant dense<0.000000e+00> : vector<2x256xf32>
    %425 = tpu.matmul %389, %131, %cst_155 {dimension_numbers = #tpu.dot_dimension_numbers<[1], [0], [0], [1], [0, 0, 1, 1], [], []>} : vector<2x64xf32>, vector<64x256xf32>, vector<2x256xf32> -> vector<2x256xf32>
    %426 = arith.addf %424, %425 : vector<2x256xf32>
    %427 = vector.extract_strided_slice %426 {offsets = [0, 0], sizes = [2, 192], strides = [1, 1]} : vector<2x256xf32> to vector<2x192xf32>
    %428 = arith.negf %427 : vector<2x192xf32>
    %429 = math.exp %428 : vector<2x192xf32>
    %cst_156 = arith.constant 1.000000e+00 : f32
    %430 = vector.broadcast %cst_156 : f32 to vector<2x192xf32>
    %431 = arith.addf %430, %429 : vector<2x192xf32>
    %432 = arith.divf %430, %431 : vector<2x192xf32>
    %433 = vector.extract_strided_slice %426 {offsets = [0, 192], sizes = [2, 64], strides = [1, 1]} : vector<2x256xf32> to vector<2x64xf32>
    %434 = math.tanh %433 : vector<2x64xf32>
    %435 = vector.extract_strided_slice %432 {offsets = [0, 0], sizes = [2, 64], strides = [1, 1]} : vector<2x192xf32> to vector<2x64xf32>
    %436 = vector.extract_strided_slice %432 {offsets = [0, 64], sizes = [2, 64], strides = [1, 1]} : vector<2x192xf32> to vector<2x64xf32>
    %437 = vector.extract_strided_slice %432 {offsets = [0, 128], sizes = [2, 64], strides = [1, 1]} : vector<2x192xf32> to vector<2x64xf32>
    %438 = arith.mulf %436, %387 : vector<2x64xf32>
    %439 = arith.mulf %435, %434 : vector<2x64xf32>
    %440 = arith.addf %438, %439 : vector<2x64xf32>
    %441 = math.tanh %440 : vector<2x64xf32>
    %442 = arith.mulf %437, %441 : vector<2x64xf32>
    %cst_157 = arith.constant dense<0.000000e+00> : vector<2x32xf32>
    %443 = tpu.matmul %421, %132, %cst_157 {dimension_numbers = #tpu.dot_dimension_numbers<[1], [0], [0], [1], [0, 0, 1, 1], [], []>} : vector<2x64xf32>, vector<64x32xf32>, vector<2x32xf32> -> vector<2x32xf32>
    %444 = arith.index_cast %c5_i32_147 : i32 to index
    %c0_158 = arith.constant 0 : index
    %c0_159 = arith.constant 0 : index
    %445 = vector.load %arg13[%444, %c0_158, %c0_159] : memref<8x2x32xf32, #tpu.memory_space<vmem>>, vector<1x2x32xf32>
    %446 = vector.shape_cast %445 : vector<1x2x32xf32> to vector<2x32xf32>
    %447 = vector.shape_cast %443 : vector<2x32xf32> to vector<1x2x32xf32>
    tpu.vector_store %arg13[%444, %c0_158, %c0_159], %447 {strides = array<i32>} : memref<8x2x32xf32, #tpu.memory_space<vmem>>, vector<1x2x32xf32>,
    %cst_160 = arith.constant dense<0.000000e+00> : vector<2x32xf32>
    %448 = tpu.matmul %442, %133, %cst_160 {dimension_numbers = #tpu.dot_dimension_numbers<[1], [0], [0], [1], [0, 0, 1, 1], [], []>} : vector<2x64xf32>, vector<64x32xf32>, vector<2x32xf32> -> vector<2x32xf32>
    %449 = arith.index_cast %400 : i32 to index
    %c0_161 = arith.constant 0 : index
    %c0_162 = arith.constant 0 : index
    %450 = vector.load %arg14[%449, %c0_161, %c0_162] : memref<8x2x32xf32, #tpu.memory_space<vmem>>, vector<1x2x32xf32>
    %451 = vector.shape_cast %450 : vector<1x2x32xf32> to vector<2x32xf32>
    %452 = vector.shape_cast %448 : vector<2x32xf32> to vector<1x2x32xf32>
    tpu.vector_store %arg14[%449, %c0_161, %c0_162], %452 {strides = array<i32>} : memref<8x2x32xf32, #tpu.memory_space<vmem>>, vector<1x2x32xf32>,
    %c6_i32_163 = arith.constant 6 : i32
    %c7_i32_164 = arith.constant 7 : i32
    %453 = arith.subi %c7_i32_164, %c6_i32_163 : i32
    %454 = arith.index_cast %c6_i32_163 : i32 to index
    %c0_165 = arith.constant 0 : index
    %c0_166 = arith.constant 0 : index
    %455 = vector.load %arg11[%454, %c0_165, %c0_166] : memref<8x2x256xf32, #tpu.memory_space<vmem>>, vector<1x2x256xf32>
    %456 = vector.shape_cast %455 : vector<1x2x256xf32> to vector<2x256xf32>
    %cst_167 = arith.constant dense<0.000000e+00> : vector<2x256xf32>
    %457 = tpu.matmul %421, %130, %cst_167 {dimension_numbers = #tpu.dot_dimension_numbers<[1], [0], [0], [1], [0, 0, 1, 1], [], []>} : vector<2x64xf32>, vector<64x256xf32>, vector<2x256xf32> -> vector<2x256xf32>
    %458 = arith.addf %456, %457 : vector<2x256xf32>
    %459 = vector.extract_strided_slice %458 {offsets = [0, 0], sizes = [2, 192], strides = [1, 1]} : vector<2x256xf32> to vector<2x192xf32>
    %460 = arith.negf %459 : vector<2x192xf32>
    %461 = math.exp %460 : vector<2x192xf32>
    %cst_168 = arith.constant 1.000000e+00 : f32
    %462 = vector.broadcast %cst_168 : f32 to vector<2x192xf32>
    %463 = arith.addf %462, %461 : vector<2x192xf32>
    %464 = arith.divf %462, %463 : vector<2x192xf32>
    %465 = vector.extract_strided_slice %458 {offsets = [0, 192], sizes = [2, 64], strides = [1, 1]} : vector<2x256xf32> to vector<2x64xf32>
    %466 = math.tanh %465 : vector<2x64xf32>
    %467 = vector.extract_strided_slice %464 {offsets = [0, 0], sizes = [2, 64], strides = [1, 1]} : vector<2x192xf32> to vector<2x64xf32>
    %468 = vector.extract_strided_slice %464 {offsets = [0, 64], sizes = [2, 64], strides = [1, 1]} : vector<2x192xf32> to vector<2x64xf32>
    %469 = vector.extract_strided_slice %464 {offsets = [0, 128], sizes = [2, 64], strides = [1, 1]} : vector<2x192xf32> to vector<2x64xf32>
    %470 = arith.mulf %468, %419 : vector<2x64xf32>
    %471 = arith.mulf %467, %466 : vector<2x64xf32>
    %472 = arith.addf %470, %471 : vector<2x64xf32>
    %473 = math.tanh %472 : vector<2x64xf32>
    %474 = arith.mulf %469, %473 : vector<2x64xf32>
    %475 = arith.index_cast %453 : i32 to index
    %c0_169 = arith.constant 0 : index
    %c0_170 = arith.constant 0 : index
    %476 = vector.load %arg12[%475, %c0_169, %c0_170] : memref<8x2x256xf32, #tpu.memory_space<vmem>>, vector<1x2x256xf32>
    %477 = vector.shape_cast %476 : vector<1x2x256xf32> to vector<2x256xf32>
    %cst_171 = arith.constant dense<0.000000e+00> : vector<2x256xf32>
    %478 = tpu.matmul %442, %131, %cst_171 {dimension_numbers = #tpu.dot_dimension_numbers<[1], [0], [0], [1], [0, 0, 1, 1], [], []>} : vector<2x64xf32>, vector<64x256xf32>, vector<2x256xf32> -> vector<2x256xf32>
    %479 = arith.addf %477, %478 : vector<2x256xf32>
    %480 = vector.extract_strided_slice %479 {offsets = [0, 0], sizes = [2, 192], strides = [1, 1]} : vector<2x256xf32> to vector<2x192xf32>
    %481 = arith.negf %480 : vector<2x192xf32>
    %482 = math.exp %481 : vector<2x192xf32>
    %cst_172 = arith.constant 1.000000e+00 : f32
    %483 = vector.broadcast %cst_172 : f32 to vector<2x192xf32>
    %484 = arith.addf %483, %482 : vector<2x192xf32>
    %485 = arith.divf %483, %484 : vector<2x192xf32>
    %486 = vector.extract_strided_slice %479 {offsets = [0, 192], sizes = [2, 64], strides = [1, 1]} : vector<2x256xf32> to vector<2x64xf32>
    %487 = math.tanh %486 : vector<2x64xf32>
    %488 = vector.extract_strided_slice %485 {offsets = [0, 0], sizes = [2, 64], strides = [1, 1]} : vector<2x192xf32> to vector<2x64xf32>
    %489 = vector.extract_strided_slice %485 {offsets = [0, 64], sizes = [2, 64], strides = [1, 1]} : vector<2x192xf32> to vector<2x64xf32>
    %490 = vector.extract_strided_slice %485 {offsets = [0, 128], sizes = [2, 64], strides = [1, 1]} : vector<2x192xf32> to vector<2x64xf32>
    %491 = arith.mulf %489, %440 : vector<2x64xf32>
    %492 = arith.mulf %488, %487 : vector<2x64xf32>
    %493 = arith.addf %491, %492 : vector<2x64xf32>
    %494 = math.tanh %493 : vector<2x64xf32>
    %495 = arith.mulf %490, %494 : vector<2x64xf32>
    %cst_173 = arith.constant dense<0.000000e+00> : vector<2x32xf32>
    %496 = tpu.matmul %474, %132, %cst_173 {dimension_numbers = #tpu.dot_dimension_numbers<[1], [0], [0], [1], [0, 0, 1, 1], [], []>} : vector<2x64xf32>, vector<64x32xf32>, vector<2x32xf32> -> vector<2x32xf32>
    %497 = arith.index_cast %c6_i32_163 : i32 to index
    %c0_174 = arith.constant 0 : index
    %c0_175 = arith.constant 0 : index
    %498 = vector.load %arg13[%497, %c0_174, %c0_175] : memref<8x2x32xf32, #tpu.memory_space<vmem>>, vector<1x2x32xf32>
    %499 = vector.shape_cast %498 : vector<1x2x32xf32> to vector<2x32xf32>
    %500 = vector.shape_cast %496 : vector<2x32xf32> to vector<1x2x32xf32>
    tpu.vector_store %arg13[%497, %c0_174, %c0_175], %500 {strides = array<i32>} : memref<8x2x32xf32, #tpu.memory_space<vmem>>, vector<1x2x32xf32>,
    %cst_176 = arith.constant dense<0.000000e+00> : vector<2x32xf32>
    %501 = tpu.matmul %495, %133, %cst_176 {dimension_numbers = #tpu.dot_dimension_numbers<[1], [0], [0], [1], [0, 0, 1, 1], [], []>} : vector<2x64xf32>, vector<64x32xf32>, vector<2x32xf32> -> vector<2x32xf32>
    %502 = arith.index_cast %453 : i32 to index
    %c0_177 = arith.constant 0 : index
    %c0_178 = arith.constant 0 : index
    %503 = vector.load %arg14[%502, %c0_177, %c0_178] : memref<8x2x32xf32, #tpu.memory_space<vmem>>, vector<1x2x32xf32>
    %504 = vector.shape_cast %503 : vector<1x2x32xf32> to vector<2x32xf32>
    %505 = vector.shape_cast %501 : vector<2x32xf32> to vector<1x2x32xf32>
    tpu.vector_store %arg14[%502, %c0_177, %c0_178], %505 {strides = array<i32>} : memref<8x2x32xf32, #tpu.memory_space<vmem>>, vector<1x2x32xf32>,
    %c7_i32_179 = arith.constant 7 : i32
    %c7_i32_180 = arith.constant 7 : i32
    %506 = arith.subi %c7_i32_180, %c7_i32_179 : i32
    %507 = arith.index_cast %c7_i32_179 : i32 to index
    %c0_181 = arith.constant 0 : index
    %c0_182 = arith.constant 0 : index
    %508 = vector.load %arg11[%507, %c0_181, %c0_182] : memref<8x2x256xf32, #tpu.memory_space<vmem>>, vector<1x2x256xf32>
    %509 = vector.shape_cast %508 : vector<1x2x256xf32> to vector<2x256xf32>
    %cst_183 = arith.constant dense<0.000000e+00> : vector<2x256xf32>
    %510 = tpu.matmul %474, %130, %cst_183 {dimension_numbers = #tpu.dot_dimension_numbers<[1], [0], [0], [1], [0, 0, 1, 1], [], []>} : vector<2x64xf32>, vector<64x256xf32>, vector<2x256xf32> -> vector<2x256xf32>
    %511 = arith.addf %509, %510 : vector<2x256xf32>
    %512 = vector.extract_strided_slice %511 {offsets = [0, 0], sizes = [2, 192], strides = [1, 1]} : vector<2x256xf32> to vector<2x192xf32>
    %513 = arith.negf %512 : vector<2x192xf32>
    %514 = math.exp %513 : vector<2x192xf32>
    %cst_184 = arith.constant 1.000000e+00 : f32
    %515 = vector.broadcast %cst_184 : f32 to vector<2x192xf32>
    %516 = arith.addf %515, %514 : vector<2x192xf32>
    %517 = arith.divf %515, %516 : vector<2x192xf32>
    %518 = vector.extract_strided_slice %511 {offsets = [0, 192], sizes = [2, 64], strides = [1, 1]} : vector<2x256xf32> to vector<2x64xf32>
    %519 = math.tanh %518 : vector<2x64xf32>
    %520 = vector.extract_strided_slice %517 {offsets = [0, 0], sizes = [2, 64], strides = [1, 1]} : vector<2x192xf32> to vector<2x64xf32>
    %521 = vector.extract_strided_slice %517 {offsets = [0, 64], sizes = [2, 64], strides = [1, 1]} : vector<2x192xf32> to vector<2x64xf32>
    %522 = vector.extract_strided_slice %517 {offsets = [0, 128], sizes = [2, 64], strides = [1, 1]} : vector<2x192xf32> to vector<2x64xf32>
    %523 = arith.mulf %521, %472 : vector<2x64xf32>
    %524 = arith.mulf %520, %519 : vector<2x64xf32>
    %525 = arith.addf %523, %524 : vector<2x64xf32>
    %526 = math.tanh %525 : vector<2x64xf32>
    %527 = arith.mulf %522, %526 : vector<2x64xf32>
    %528 = arith.index_cast %506 : i32 to index
    %c0_185 = arith.constant 0 : index
    %c0_186 = arith.constant 0 : index
    %529 = vector.load %arg12[%528, %c0_185, %c0_186] : memref<8x2x256xf32, #tpu.memory_space<vmem>>, vector<1x2x256xf32>
    %530 = vector.shape_cast %529 : vector<1x2x256xf32> to vector<2x256xf32>
    %cst_187 = arith.constant dense<0.000000e+00> : vector<2x256xf32>
    %531 = tpu.matmul %495, %131, %cst_187 {dimension_numbers = #tpu.dot_dimension_numbers<[1], [0], [0], [1], [0, 0, 1, 1], [], []>} : vector<2x64xf32>, vector<64x256xf32>, vector<2x256xf32> -> vector<2x256xf32>
    %532 = arith.addf %530, %531 : vector<2x256xf32>
    %533 = vector.extract_strided_slice %532 {offsets = [0, 0], sizes = [2, 192], strides = [1, 1]} : vector<2x256xf32> to vector<2x192xf32>
    %534 = arith.negf %533 : vector<2x192xf32>
    %535 = math.exp %534 : vector<2x192xf32>
    %cst_188 = arith.constant 1.000000e+00 : f32
    %536 = vector.broadcast %cst_188 : f32 to vector<2x192xf32>
    %537 = arith.addf %536, %535 : vector<2x192xf32>
    %538 = arith.divf %536, %537 : vector<2x192xf32>
    %539 = vector.extract_strided_slice %532 {offsets = [0, 192], sizes = [2, 64], strides = [1, 1]} : vector<2x256xf32> to vector<2x64xf32>
    %540 = math.tanh %539 : vector<2x64xf32>
    %541 = vector.extract_strided_slice %538 {offsets = [0, 0], sizes = [2, 64], strides = [1, 1]} : vector<2x192xf32> to vector<2x64xf32>
    %542 = vector.extract_strided_slice %538 {offsets = [0, 64], sizes = [2, 64], strides = [1, 1]} : vector<2x192xf32> to vector<2x64xf32>
    %543 = vector.extract_strided_slice %538 {offsets = [0, 128], sizes = [2, 64], strides = [1, 1]} : vector<2x192xf32> to vector<2x64xf32>
    %544 = arith.mulf %542, %493 : vector<2x64xf32>
    %545 = arith.mulf %541, %540 : vector<2x64xf32>
    %546 = arith.addf %544, %545 : vector<2x64xf32>
    %547 = math.tanh %546 : vector<2x64xf32>
    %548 = arith.mulf %543, %547 : vector<2x64xf32>
    %cst_189 = arith.constant dense<0.000000e+00> : vector<2x32xf32>
    %549 = tpu.matmul %527, %132, %cst_189 {dimension_numbers = #tpu.dot_dimension_numbers<[1], [0], [0], [1], [0, 0, 1, 1], [], []>} : vector<2x64xf32>, vector<64x32xf32>, vector<2x32xf32> -> vector<2x32xf32>
    %550 = arith.index_cast %c7_i32_179 : i32 to index
    %c0_190 = arith.constant 0 : index
    %c0_191 = arith.constant 0 : index
    %551 = vector.load %arg13[%550, %c0_190, %c0_191] : memref<8x2x32xf32, #tpu.memory_space<vmem>>, vector<1x2x32xf32>
    %552 = vector.shape_cast %551 : vector<1x2x32xf32> to vector<2x32xf32>
    %553 = vector.shape_cast %549 : vector<2x32xf32> to vector<1x2x32xf32>
    tpu.vector_store %arg13[%550, %c0_190, %c0_191], %553 {strides = array<i32>} : memref<8x2x32xf32, #tpu.memory_space<vmem>>, vector<1x2x32xf32>,
    %cst_192 = arith.constant dense<0.000000e+00> : vector<2x32xf32>
    %554 = tpu.matmul %548, %133, %cst_192 {dimension_numbers = #tpu.dot_dimension_numbers<[1], [0], [0], [1], [0, 0, 1, 1], [], []>} : vector<2x64xf32>, vector<64x32xf32>, vector<2x32xf32> -> vector<2x32xf32>
    %555 = arith.index_cast %506 : i32 to index
    %c0_193 = arith.constant 0 : index
    %c0_194 = arith.constant 0 : index
    %556 = vector.load %arg14[%555, %c0_193, %c0_194] : memref<8x2x32xf32, #tpu.memory_space<vmem>>, vector<1x2x32xf32>
    %557 = vector.shape_cast %556 : vector<1x2x32xf32> to vector<2x32xf32>
    %558 = vector.shape_cast %554 : vector<2x32xf32> to vector<1x2x32xf32>
    tpu.vector_store %arg14[%555, %c0_193, %c0_194], %558 {strides = array<i32>} : memref<8x2x32xf32, #tpu.memory_space<vmem>>, vector<1x2x32xf32>,
    %c8_i32_195 = arith.constant 8 : i32
    %c0_196 = arith.constant 0 : index
    %c0_197 = arith.constant 0 : index
    %559 = vector.load %arg7[%c0_196, %c0_197] : memref<1x32xf32, #tpu.memory_space<vmem>>, vector<1x32xf32>
    %cst_198 = arith.constant 0.000000e+00 : f32
    %560 = vector.broadcast %cst_198 : f32 to vector<2x32xf32>
    %c0_i32_199 = arith.constant 0 : i32
    %561 = arith.index_cast %c0_i32_199 : i32 to index
    %c0_200 = arith.constant 0 : index
    %c0_201 = arith.constant 0 : index
    %562 = vector.load %arg13[%561, %c0_200, %c0_201] : memref<8x2x32xf32, #tpu.memory_space<vmem>>, vector<1x2x32xf32>
    %563 = vector.shape_cast %562 : vector<1x2x32xf32> to vector<2x32xf32>
    %564 = arith.index_cast %c0_i32_199 : i32 to index
    %c0_202 = arith.constant 0 : index
    %c0_203 = arith.constant 0 : index
    %565 = vector.load %arg14[%564, %c0_202, %c0_203] : memref<8x2x32xf32, #tpu.memory_space<vmem>>, vector<1x2x32xf32>
    %566 = vector.shape_cast %565 : vector<1x2x32xf32> to vector<2x32xf32>
    %567 = arith.addf %563, %566 : vector<2x32xf32>
    %568 = vector.broadcast %559 : vector<1x32xf32> to vector<2x32xf32>
    %569 = arith.addf %567, %568 : vector<2x32xf32>
    %570 = math.tanh %569 : vector<2x32xf32>
    %571 = math.exp %570 : vector<2x32xf32>
    %cst_204 = arith.constant dense<0.000000e+00> : vector<2xf32>
    %572 = vector.multi_reduction <add>, %571, %cst_204 [1] : vector<2x32xf32> to vector<2xf32>
    %573 = vector.shape_cast %572 : vector<2xf32> to vector<2x1xf32>
    %574 = tpu.reciprocal %573 {approx = true} : vector<2x1xf32> -> vector<2x1xf32>
    %575 = vector.broadcast %574 : vector<2x1xf32> to vector<2x32xf32>
    %576 = arith.mulf %571, %575 : vector<2x32xf32>
    %577 = arith.addf %560, %576 : vector<2x32xf32>
    %c1_i32_205 = arith.constant 1 : i32
    %578 = arith.index_cast %c1_i32_205 : i32 to index
    %c0_206 = arith.constant 0 : index
    %c0_207 = arith.constant 0 : index
    %579 = vector.load %arg13[%578, %c0_206, %c0_207] : memref<8x2x32xf32, #tpu.memory_space<vmem>>, vector<1x2x32xf32>
    %580 = vector.shape_cast %579 : vector<1x2x32xf32> to vector<2x32xf32>
    %581 = arith.index_cast %c1_i32_205 : i32 to index
    %c0_208 = arith.constant 0 : index
    %c0_209 = arith.constant 0 : index
    %582 = vector.load %arg14[%581, %c0_208, %c0_209] : memref<8x2x32xf32, #tpu.memory_space<vmem>>, vector<1x2x32xf32>
    %583 = vector.shape_cast %582 : vector<1x2x32xf32> to vector<2x32xf32>
    %584 = arith.addf %580, %583 : vector<2x32xf32>
    %585 = vector.broadcast %559 : vector<1x32xf32> to vector<2x32xf32>
    %586 = arith.addf %584, %585 : vector<2x32xf32>
    %587 = math.tanh %586 : vector<2x32xf32>
    %588 = math.exp %587 : vector<2x32xf32>
    %cst_210 = arith.constant dense<0.000000e+00> : vector<2xf32>
    %589 = vector.multi_reduction <add>, %588, %cst_210 [1] : vector<2x32xf32> to vector<2xf32>
    %590 = vector.shape_cast %589 : vector<2xf32> to vector<2x1xf32>
    %591 = tpu.reciprocal %590 {approx = true} : vector<2x1xf32> -> vector<2x1xf32>
    %592 = vector.broadcast %591 : vector<2x1xf32> to vector<2x32xf32>
    %593 = arith.mulf %588, %592 : vector<2x32xf32>
    %594 = arith.addf %577, %593 : vector<2x32xf32>
    %c2_i32_211 = arith.constant 2 : i32
    %595 = arith.index_cast %c2_i32_211 : i32 to index
    %c0_212 = arith.constant 0 : index
    %c0_213 = arith.constant 0 : index
    %596 = vector.load %arg13[%595, %c0_212, %c0_213] : memref<8x2x32xf32, #tpu.memory_space<vmem>>, vector<1x2x32xf32>
    %597 = vector.shape_cast %596 : vector<1x2x32xf32> to vector<2x32xf32>
    %598 = arith.index_cast %c2_i32_211 : i32 to index
    %c0_214 = arith.constant 0 : index
    %c0_215 = arith.constant 0 : index
    %599 = vector.load %arg14[%598, %c0_214, %c0_215] : memref<8x2x32xf32, #tpu.memory_space<vmem>>, vector<1x2x32xf32>
    %600 = vector.shape_cast %599 : vector<1x2x32xf32> to vector<2x32xf32>
    %601 = arith.addf %597, %600 : vector<2x32xf32>
    %602 = vector.broadcast %559 : vector<1x32xf32> to vector<2x32xf32>
    %603 = arith.addf %601, %602 : vector<2x32xf32>
    %604 = math.tanh %603 : vector<2x32xf32>
    %605 = math.exp %604 : vector<2x32xf32>
    %cst_216 = arith.constant dense<0.000000e+00> : vector<2xf32>
    %606 = vector.multi_reduction <add>, %605, %cst_216 [1] : vector<2x32xf32> to vector<2xf32>
    %607 = vector.shape_cast %606 : vector<2xf32> to vector<2x1xf32>
    %608 = tpu.reciprocal %607 {approx = true} : vector<2x1xf32> -> vector<2x1xf32>
    %609 = vector.broadcast %608 : vector<2x1xf32> to vector<2x32xf32>
    %610 = arith.mulf %605, %609 : vector<2x32xf32>
    %611 = arith.addf %594, %610 : vector<2x32xf32>
    %c3_i32_217 = arith.constant 3 : i32
    %612 = arith.index_cast %c3_i32_217 : i32 to index
    %c0_218 = arith.constant 0 : index
    %c0_219 = arith.constant 0 : index
    %613 = vector.load %arg13[%612, %c0_218, %c0_219] : memref<8x2x32xf32, #tpu.memory_space<vmem>>, vector<1x2x32xf32>
    %614 = vector.shape_cast %613 : vector<1x2x32xf32> to vector<2x32xf32>
    %615 = arith.index_cast %c3_i32_217 : i32 to index
    %c0_220 = arith.constant 0 : index
    %c0_221 = arith.constant 0 : index
    %616 = vector.load %arg14[%615, %c0_220, %c0_221] : memref<8x2x32xf32, #tpu.memory_space<vmem>>, vector<1x2x32xf32>
    %617 = vector.shape_cast %616 : vector<1x2x32xf32> to vector<2x32xf32>
    %618 = arith.addf %614, %617 : vector<2x32xf32>
    %619 = vector.broadcast %559 : vector<1x32xf32> to vector<2x32xf32>
    %620 = arith.addf %618, %619 : vector<2x32xf32>
    %621 = math.tanh %620 : vector<2x32xf32>
    %622 = math.exp %621 : vector<2x32xf32>
    %cst_222 = arith.constant dense<0.000000e+00> : vector<2xf32>
    %623 = vector.multi_reduction <add>, %622, %cst_222 [1] : vector<2x32xf32> to vector<2xf32>
    %624 = vector.shape_cast %623 : vector<2xf32> to vector<2x1xf32>
    %625 = tpu.reciprocal %624 {approx = true} : vector<2x1xf32> -> vector<2x1xf32>
    %626 = vector.broadcast %625 : vector<2x1xf32> to vector<2x32xf32>
    %627 = arith.mulf %622, %626 : vector<2x32xf32>
    %628 = arith.addf %611, %627 : vector<2x32xf32>
    %c4_i32_223 = arith.constant 4 : i32
    %629 = arith.index_cast %c4_i32_223 : i32 to index
    %c0_224 = arith.constant 0 : index
    %c0_225 = arith.constant 0 : index
    %630 = vector.load %arg13[%629, %c0_224, %c0_225] : memref<8x2x32xf32, #tpu.memory_space<vmem>>, vector<1x2x32xf32>
    %631 = vector.shape_cast %630 : vector<1x2x32xf32> to vector<2x32xf32>
    %632 = arith.index_cast %c4_i32_223 : i32 to index
    %c0_226 = arith.constant 0 : index
    %c0_227 = arith.constant 0 : index
    %633 = vector.load %arg14[%632, %c0_226, %c0_227] : memref<8x2x32xf32, #tpu.memory_space<vmem>>, vector<1x2x32xf32>
    %634 = vector.shape_cast %633 : vector<1x2x32xf32> to vector<2x32xf32>
    %635 = arith.addf %631, %634 : vector<2x32xf32>
    %636 = vector.broadcast %559 : vector<1x32xf32> to vector<2x32xf32>
    %637 = arith.addf %635, %636 : vector<2x32xf32>
    %638 = math.tanh %637 : vector<2x32xf32>
    %639 = math.exp %638 : vector<2x32xf32>
    %cst_228 = arith.constant dense<0.000000e+00> : vector<2xf32>
    %640 = vector.multi_reduction <add>, %639, %cst_228 [1] : vector<2x32xf32> to vector<2xf32>
    %641 = vector.shape_cast %640 : vector<2xf32> to vector<2x1xf32>
    %642 = tpu.reciprocal %641 {approx = true} : vector<2x1xf32> -> vector<2x1xf32>
    %643 = vector.broadcast %642 : vector<2x1xf32> to vector<2x32xf32>
    %644 = arith.mulf %639, %643 : vector<2x32xf32>
    %645 = arith.addf %628, %644 : vector<2x32xf32>
    %c5_i32_229 = arith.constant 5 : i32
    %646 = arith.index_cast %c5_i32_229 : i32 to index
    %c0_230 = arith.constant 0 : index
    %c0_231 = arith.constant 0 : index
    %647 = vector.load %arg13[%646, %c0_230, %c0_231] : memref<8x2x32xf32, #tpu.memory_space<vmem>>, vector<1x2x32xf32>
    %648 = vector.shape_cast %647 : vector<1x2x32xf32> to vector<2x32xf32>
    %649 = arith.index_cast %c5_i32_229 : i32 to index
    %c0_232 = arith.constant 0 : index
    %c0_233 = arith.constant 0 : index
    %650 = vector.load %arg14[%649, %c0_232, %c0_233] : memref<8x2x32xf32, #tpu.memory_space<vmem>>, vector<1x2x32xf32>
    %651 = vector.shape_cast %650 : vector<1x2x32xf32> to vector<2x32xf32>
    %652 = arith.addf %648, %651 : vector<2x32xf32>
    %653 = vector.broadcast %559 : vector<1x32xf32> to vector<2x32xf32>
    %654 = arith.addf %652, %653 : vector<2x32xf32>
    %655 = math.tanh %654 : vector<2x32xf32>
    %656 = math.exp %655 : vector<2x32xf32>
    %cst_234 = arith.constant dense<0.000000e+00> : vector<2xf32>
    %657 = vector.multi_reduction <add>, %656, %cst_234 [1] : vector<2x32xf32> to vector<2xf32>
    %658 = vector.shape_cast %657 : vector<2xf32> to vector<2x1xf32>
    %659 = tpu.reciprocal %658 {approx = true} : vector<2x1xf32> -> vector<2x1xf32>
    %660 = vector.broadcast %659 : vector<2x1xf32> to vector<2x32xf32>
    %661 = arith.mulf %656, %660 : vector<2x32xf32>
    %662 = arith.addf %645, %661 : vector<2x32xf32>
    %c6_i32_235 = arith.constant 6 : i32
    %663 = arith.index_cast %c6_i32_235 : i32 to index
    %c0_236 = arith.constant 0 : index
    %c0_237 = arith.constant 0 : index
    %664 = vector.load %arg13[%663, %c0_236, %c0_237] : memref<8x2x32xf32, #tpu.memory_space<vmem>>, vector<1x2x32xf32>
    %665 = vector.shape_cast %664 : vector<1x2x32xf32> to vector<2x32xf32>
    %666 = arith.index_cast %c6_i32_235 : i32 to index
    %c0_238 = arith.constant 0 : index
    %c0_239 = arith.constant 0 : index
    %667 = vector.load %arg14[%666, %c0_238, %c0_239] : memref<8x2x32xf32, #tpu.memory_space<vmem>>, vector<1x2x32xf32>
    %668 = vector.shape_cast %667 : vector<1x2x32xf32> to vector<2x32xf32>
    %669 = arith.addf %665, %668 : vector<2x32xf32>
    %670 = vector.broadcast %559 : vector<1x32xf32> to vector<2x32xf32>
    %671 = arith.addf %669, %670 : vector<2x32xf32>
    %672 = math.tanh %671 : vector<2x32xf32>
    %673 = math.exp %672 : vector<2x32xf32>
    %cst_240 = arith.constant dense<0.000000e+00> : vector<2xf32>
    %674 = vector.multi_reduction <add>, %673, %cst_240 [1] : vector<2x32xf32> to vector<2xf32>
    %675 = vector.shape_cast %674 : vector<2xf32> to vector<2x1xf32>
    %676 = tpu.reciprocal %675 {approx = true} : vector<2x1xf32> -> vector<2x1xf32>
    %677 = vector.broadcast %676 : vector<2x1xf32> to vector<2x32xf32>
    %678 = arith.mulf %673, %677 : vector<2x32xf32>
    %679 = arith.addf %662, %678 : vector<2x32xf32>
    %c7_i32_241 = arith.constant 7 : i32
    %680 = arith.index_cast %c7_i32_241 : i32 to index
    %c0_242 = arith.constant 0 : index
    %c0_243 = arith.constant 0 : index
    %681 = vector.load %arg13[%680, %c0_242, %c0_243] : memref<8x2x32xf32, #tpu.memory_space<vmem>>, vector<1x2x32xf32>
    %682 = vector.shape_cast %681 : vector<1x2x32xf32> to vector<2x32xf32>
    %683 = arith.index_cast %c7_i32_241 : i32 to index
    %c0_244 = arith.constant 0 : index
    %c0_245 = arith.constant 0 : index
    %684 = vector.load %arg14[%683, %c0_244, %c0_245] : memref<8x2x32xf32, #tpu.memory_space<vmem>>, vector<1x2x32xf32>
    %685 = vector.shape_cast %684 : vector<1x2x32xf32> to vector<2x32xf32>
    %686 = arith.addf %682, %685 : vector<2x32xf32>
    %687 = vector.broadcast %559 : vector<1x32xf32> to vector<2x32xf32>
    %688 = arith.addf %686, %687 : vector<2x32xf32>
    %689 = math.tanh %688 : vector<2x32xf32>
    %690 = math.exp %689 : vector<2x32xf32>
    %cst_246 = arith.constant dense<0.000000e+00> : vector<2xf32>
    %691 = vector.multi_reduction <add>, %690, %cst_246 [1] : vector<2x32xf32> to vector<2xf32>
    %692 = vector.shape_cast %691 : vector<2xf32> to vector<2x1xf32>
    %693 = tpu.reciprocal %692 {approx = true} : vector<2x1xf32> -> vector<2x1xf32>
    %694 = vector.broadcast %693 : vector<2x1xf32> to vector<2x32xf32>
    %695 = arith.mulf %690, %694 : vector<2x32xf32>
    %696 = arith.addf %679, %695 : vector<2x32xf32>
    %c8_i32_247 = arith.constant 8 : i32
    %c0_248 = arith.constant 0 : index
    %c0_249 = arith.constant 0 : index
    %697 = vector.load %arg8[%c0_248, %c0_249] : memref<32x2xf32, #tpu.memory_space<vmem>>, vector<32x2xf32>
    %cst_250 = arith.constant dense<0.000000e+00> : vector<2x2xf32>
    %698 = tpu.matmul %696, %697, %cst_250 {dimension_numbers = #tpu.dot_dimension_numbers<[1], [0], [0], [1], [0, 0, 1, 1], [], []>} : vector<2x32xf32>, vector<32x2xf32>, vector<2x2xf32> -> vector<2x2xf32>
    %c0_251 = arith.constant 0 : index
    %c0_252 = arith.constant 0 : index
    %699 = vector.load %arg9[%c0_251, %c0_252] : memref<1x2xf32, #tpu.memory_space<vmem>>, vector<1x2xf32>
    %700 = vector.broadcast %699 : vector<1x2xf32> to vector<2x2xf32>
    %701 = arith.addf %698, %700 : vector<2x2xf32>
    %c0_253 = arith.constant 0 : index
    %c0_254 = arith.constant 0 : index
    %702 = vector.load %arg10[%c0_253, %c0_254] : memref<2x2xf32, #tpu.memory_space<vmem>>, vector<2x2xf32>
    tpu.vector_store %arg10[%c0_253, %c0_254], %701 {strides = array<i32>} : memref<2x2xf32, #tpu.memory_space<vmem>>, vector<2x2xf32>,
    return
  }
}

</mosaic_0001>

<bundles_post_ra>
// kernel: tpu_custom_call.1
= control target key start
LH: loop header
LB: loop body
LE: loop exit
PB: predicated region body
PF: predicated region fallthrough
CT: control target
= control target key end

     0   :  { %15 = vsyncpa [#allocation7], 0  ;;  %s7219_s0 = inlined_call_operand.hbm [shape: f32[8,2,39], index: 0, kind: input, shape index: {}]   ;;  %s7220_s1 = inlined_call_operand.vmem [shape: f32[39,512], index: 1, kind: input, shape index: {}]   ;;  %s7221_s2 = inlined_call_operand.vmem [shape: f32[1,512], index: 2, kind: input, shape index: {}]   ;;  %s7222_s3 = inlined_call_operand.hbm [shape: f32[64,256], index: 3, kind: input, shape index: {}]   ;;  %s7223_s4 = inlined_call_operand.hbm [shape: f32[64,256], index: 4, kind: input, shape index: {}]   ;;  %s7224_s5 = inlined_call_operand.vmem [shape: f32[64,32], index: 5, kind: input, shape index: {}]   ;;  %s7225_s6 = inlined_call_operand.vmem [shape: f32[64,32], index: 6, kind: input, shape index: {}]   ;;  %s7226_s7 = inlined_call_operand.vmem [shape: f32[1,32], index: 7, kind: input, shape index: {}]   ;;  %s7227_s8 = inlined_call_operand.vmem [shape: f32[32,2], index: 8, kind: input, shape index: {}]   ;;  %s7228_s9 = inlined_call_operand.vmem [shape: f32[1,2], index: 9, kind: input, shape index: {}]   ;;  %s7229_s10 = inlined_call_operand.hbm [shape: f32[2,2], index: 10, kind: output, shape index: {}]  }
   0x1   :  { %16 = vsyncpa [#allocation10], 0 }
   0x2   :  { %17 = vsyncpa [#allocation8], 0  ;;  %s5700_s13 = smov [#allocation9]  }
   0x3   :  { %s39_s14 = sshll.u32 %s5700_s13, 4  ;;  %s40_s14 = int_to_ptr.vmem [resolvable:$true] %s39_s14 }
   0x4   :  { %s5622_s15 = scalar_lea.vmem %s40_s14, 2048  ;;  %p5627_p1 = scmp.lt.s32.totalorder %s40_s14, %s40_s14 }
   0x5   :  { %p5623_p0 = scmp.ne.s32.totalorder %s40_s14, %s5622_s15  ;;  %p5628_p2 = scmp.lt.s32.totalorder %s5622_s15, %s5622_s15 }
   0x7   :  { %p5629_p3 = por %p5628_p2, %p5627_p1 }
   0x9   :  { %p5630_p4 = pnand %p5629_p3, %p5623_p0 }
   0xb   :  { %5633 = shalt.err (!%p5630_p4)
}
   0xc   :  { %s5701_s16 = smov 256   ;;  %s5702_s17 = smov 16  }
   0xd   :  { %45 = dma.hbm_to_vmem [thread:$0]  %s7222_s3, 2048, %s40_s14, [#allocation10], %s5701_s16, %s5701_s16, %s5702_s17  }
   0xe   :  { %s5703_s20 = smov [#allocation6]  }
   0xf   :  { %s23_s21 = sshll.u32 %s5703_s20, 4  ;;  %s24_s21 = int_to_ptr.vmem [resolvable:$true] %s23_s21 }
  0x10   :  { %s5642_s22 = scalar_lea.vmem %s24_s21, 256  ;;  %p5647_p6 = scmp.lt.s32.totalorder %s24_s21, %s24_s21 }
  0x11   :  { %p5643_p5 = scmp.ne.s32.totalorder %s24_s21, %s5642_s22  ;;  %p5648_p7 = scmp.lt.s32.totalorder %s5642_s22, %s5642_s22 }
  0x13   :  { %p5649_p8 = por %p5648_p7, %p5647_p6 }
  0x15   :  { %p5650_p9 = pnand %p5649_p8, %p5643_p5 }
  0x17   :  { %5653 = shalt.err (!%p5650_p9)
}
  0x18   :  { %s5704_s23 = smov 32   ;;  %s5705_s24 = smov 2  }
  0x19   :  { %29 = dma.hbm_to_vmem [thread:$0]  %s7219_s0, 256, %s24_s21, [#allocation7], %s5704_s23, %s5704_s23, %s5705_s24  }
  0x1a   :  { %s5706_s27 = smov [#allocation11]  }
  0x1b   :  { %s51_s28 = sshll.u32 %s5706_s27, 4  ;;  %s52_s28 = int_to_ptr.vmem [resolvable:$true] %s51_s28 }
  0x1c   :  { %s5662_s3 = scalar_lea.vmem %s52_s28, 2048  ;;  %p5667_p11 = scmp.lt.s32.totalorder %s52_s28, %s52_s28 }
  0x1d   :  { %p5663_p10 = scmp.ne.s32.totalorder %s52_s28, %s5662_s3  ;;  %p5668_p12 = scmp.lt.s32.totalorder %s5662_s3, %s5662_s3 }
  0x1f   :  { %p5669_p13 = por %p5668_p12, %p5667_p11 }
  0x21   :  { %p5670_p0 = pnand %p5669_p13, %p5663_p10 }
  0x23   :  { %5673 = shalt.err (!%p5670_p0)
}
  0x24   :  { %57 = dma.hbm_to_vmem [thread:$0]  %s7223_s4, 2048, %s52_s28, [#allocation10], %s5701_s16, %s5701_s16, %s5702_s17  }
  0x25   :  { %5694 = dma.done.wait [#allocation7], 256  }
  0x26   :  { %5695 = vsyncadd [#allocation7], 4294967040 }
  0x27   :  { %5696 = dma.done.wait [#allocation10], 4096  }
  0x28   :  { %5697 = vsyncadd [#allocation10], 4294963200  ;;  %v7230_v0 = vmov 0.0   ;;  %vm124_vm0 = vcmask 1046528   ;;  %v5781_v1 = vld [vmem:[%s7220_s1 + $0x88] sm:$0x7f]  ;;  %v100_v61 = vlaneseq }
  0x29   :  { %272 = vmatprep.mubr.f32.mxu1 %v7230_v0  ;;  %201 = vmatprep.mubr.f32.mxu0 %v7230_v0  ;;  %v5786_v2 = vld [vmem:[%s7220_s1 + $0x98] sm:$0x7f]  ;;  %v5791_v3 = vld [vmem:[%s7220_s1 + $0x80] sm:$0x7f]  ;;  %v5800_v4 = vld [vmem:[%s7220_s1 + $0x90] sm:$0x7f] }
  0x2a   :  { %4771 = vmatprep.subr.msk.mxu0 %vm124_vm0, %v5781_v1  ;;  %4774 = vmatprep.subr.msk.mxu1 %vm124_vm0, %v5786_v2  ;;  %v5805_v5 = vld [vmem:[%s7220_s1 + $0x68] sm:$0xff]  ;;  %v5810_v6 = vld [vmem:[%s7220_s1 + $0x78] sm:$0xff]  ;;  %v5819_v7 = vld [vmem:[%s7220_s1 + $0x60] sm:$0xff]  ;;  %vm120_vm1 = vcmask 318464   ;;  %v6202_v62 = vshrl.u32 %v100_v61, 7  ;;  %vm5710_vm2 = vmmov 0  }
  0x2b   :  { %4772 = vmatpush1.msk.msra.mxu0 %vm124_vm0, %v5791_v3  ;;  %4775 = vmatpush1.msk.msra.mxu1 %vm124_vm0, %v5800_v4  ;;  %v5824_v8 = vld [vmem:[%s7220_s1 + $0x70] sm:$0xff]  ;;  %v5829_v9 = vld [vmem:[%s7220_s1 + $0x48] sm:$0xff]  ;;  %v5836_v10 = vld [vmem:[%s7220_s1 + $0x58] sm:$0xff]  ;;  %vm1563_vm3 = vcmask 523264   ;;  %vm1863_vm4 = vcmask 254976   ;;  %vm4679_vm5 = vcmask 261120  }
  0x2c   :  { %161 = vmatprep.subr.mxu0 %v5805_v5  ;;  %232 = vmatprep.subr.mxu1 %v5810_v6  ;;  %v5841_v11 = vld [vmem:[%s7220_s1 + $0x40] sm:$0xff]  ;;  %v5846_v12 = vld [vmem:[%s7220_s1 + $0x50] sm:$0xff]  ;;  %v5853_v13 = vld [vmem:[%s7220_s1 + $0x28] sm:$0xff]  ;;  %v110_v63 = vsub.s32 2, %v6202_v62  ;;  %s5711_s26 = smov [#allocation12]   ;;  %vm4753_vm6 = vcmask 9216  }
  0x2d   :  { %162 = vmatpush1.msra.mxu0 %v5819_v7  ;;  %233 = vmatpush1.msra.mxu1 %v5824_v8  ;;  %v5858_v14 = vld [vmem:[%s7220_s1 + $0x38] sm:$0xff]  ;;  %v5865_v15 = vld [vmem:[%s7220_s1 + $0x20] sm:$0xff]  ;;  %v5870_v16 = vld [vmem:[%s7220_s1 + $0x30] sm:$0xff]  ;;  %s4761_s27 = sshll.u32 %s5711_s26, 4  ;;  %s4762_s27 = int_to_ptr.vmem [resolvable:$true] %s4761_s27 }
  0x2e   :  { %163 = vmatprep.subr.mxu0 %v5829_v9  ;;  %234 = vmatprep.subr.mxu1 %v5836_v10  ;;  %v5877_v17 = vld [vmem:[%s7220_s1 + $0x8] sm:$0xff]  ;;  %v5882_v18 = vld [vmem:[%s7220_s1 + $0x18] sm:$0xff]  ;;  %v5889_v19 = vld [vmem:[%s7220_s1] sm:$0xff]  ;;  %s5674_s28 = scalar_lea.vmem %s4762_s27, 32  ;;  %p5679_p2 = scmp.lt.s32.totalorder %s4762_s27, %s4762_s27 }
  0x2f   :  { %164 = vmatpush1.msra.mxu0 %v5841_v11  ;;  %235 = vmatpush1.msra.mxu1 %v5846_v12  ;;  %v5894_v20 = vld [vmem:[%s7220_s1 + $0x10] sm:$0xff]  ;;  %v98_v21 = vld [vmem:[#allocation6] sm:$0x3]  ;;  %v304_v22 = vld [vmem:[#allocation6 + $0x2] sm:$0x3]  ;;  %p5675_p1 = scmp.ne.s32.totalorder %s4762_s27, %s5674_s28  ;;  %p5680_p3 = scmp.lt.s32.totalorder %s5674_s28, %s5674_s28 }
  0x30   :  { %165 = vmatprep.subr.mxu0 %v5853_v13  ;;  %236 = vmatprep.subr.mxu1 %v5858_v14  ;;  %v477_v23 = vld [vmem:[#allocation6 + $0x4] sm:$0x3]  ;;  %v650_v24 = vld [vmem:[#allocation6 + $0x6] sm:$0x3]  ;;  %v823_v25 = vld [vmem:[#allocation6 + $0x8] sm:$0x3] }
  0x31   :  { %166 = vmatpush1.msra.mxu0 %v5865_v15  ;;  %237 = vmatpush1.msra.mxu1 %v5870_v16  ;;  %v996_v26 = vld [vmem:[#allocation6 + $0xa] sm:$0x3]  ;;  %v1169_v27 = vld [vmem:[#allocation6 + $0xc] sm:$0x3]  ;;  %v1342_v28 = vld [vmem:[#allocation6 + $0xe] sm:$0x3]  ;;  %p5681_p4 = por %p5680_p3, %p5679_p2 }
  0x32   :  { %167 = vmatprep.subr.mxu0 %v5877_v17  ;;  %238 = vmatprep.subr.mxu1 %v5882_v18  ;;  %v6094_v29 = vld [vmem:[#allocation9 + $0x78] sm:$0xff]  ;;  %v6102_v31 = vld [vmem:[#allocation9 + $0x70] sm:$0xff]  ;;  %v6108_v33 = vld [vmem:[#allocation9 + $0x68] sm:$0xff] }
  0x33   :  { %168 = vmatpush1.msra.mxu0 %v5889_v19  ;;  %239 = vmatpush1.msra.mxu1 %v5894_v20  ;;  %7243 = vst [vmem:[#allocation16_spill] sm:$0xff] %v6094_v29  ;;  %v6098_v30 = vld [vmem:[#allocation11 + $0x78] sm:$0xff]  ;;  %v6104_v32 = vld [vmem:[#allocation11 + $0x70] sm:$0xff]  ;;  %v6110_v34 = vld [vmem:[#allocation11 + $0x68] sm:$0xff]  ;;  %p5682_p5 = pnand %p5681_p4, %p5675_p1 }
  0x34   :  { %4776 = vmatmul.mubr.msk.f32.vlgmr.msra.gmra.mxu1 %vm120_vm1, %v98_v21  ;;  %4779 = vmatprep.subr.msk.mxu0 %vm124_vm0, %v5781_v1  ;;  %v6114_v35 = vld [vmem:[#allocation9 + $0x60] sm:$0xff]  ;;  %v6120_v37 = vld [vmem:[#allocation9 + $0x58] sm:$0xff]  ;;  %v6126_v39 = vld [vmem:[#allocation9 + $0x50] sm:$0xff] }
  0x35   :  { %4782 = vmatprep.subr.msk.mxu1 %vm124_vm0, %v5786_v2  ;;  %4773 = vmatmul.mubr.msk.f32.vlgmr.msra.gmra.mxu0 %vm120_vm1, %v98_v21  ;;  %v6116_v36 = vld [vmem:[#allocation11 + $0x60] sm:$0xff]  ;;  %v6122_v38 = vld [vmem:[#allocation11 + $0x58] sm:$0xff]  ;;  %v6128_v40 = vld [vmem:[#allocation11 + $0x50] sm:$0xff] }
  0x36   :  { %4780 = vmatpush1.msk.msra.mxu0 %vm124_vm0, %v5791_v3  ;;  %4783 = vmatpush1.msk.msra.mxu1 %vm124_vm0, %v5800_v4  ;;  %v6132_v41 = vld [vmem:[#allocation9 + $0x48] sm:$0xff]  ;;  %v6138_v43 = vld [vmem:[#allocation9 + $0x40] sm:$0xff]  ;;  %v6144_v45 = vld [vmem:[#allocation9 + $0x38] sm:$0xff] }
  0x37   :  { %332 = vmatprep.subr.mxu0 %v5805_v5  ;;  %403 = vmatprep.subr.mxu1 %v5810_v6  ;;  %v6134_v42 = vld [vmem:[#allocation11 + $0x48] sm:$0xff]  ;;  %v6140_v44 = vld [vmem:[#allocation11 + $0x40] sm:$0xff]  ;;  %v6146_v46 = vld [vmem:[#allocation11 + $0x38] sm:$0xff] }
  0x38   :  { %333 = vmatpush1.msra.mxu0 %v5819_v7  ;;  %404 = vmatpush1.msra.mxu1 %v5824_v8  ;;  %v6150_v47 = vld [vmem:[#allocation9 + $0x30] sm:$0xff]  ;;  %v6156_v49 = vld [vmem:[#allocation9 + $0x28] sm:$0xff]  ;;  %v6162_v51 = vld [vmem:[#allocation9 + $0x20] sm:$0xff] }
  0x39   :  { %334 = vmatprep.subr.mxu0 %v5829_v9  ;;  %405 = vmatprep.subr.mxu1 %v5836_v10  ;;  %v6152_v48 = vld [vmem:[#allocation11 + $0x30] sm:$0xff]  ;;  %v6158_v50 = vld [vmem:[#allocation11 + $0x28] sm:$0xff]  ;;  %v6164_v52 = vld [vmem:[#allocation11 + $0x20] sm:$0xff] }
  0x3a   :  { %335 = vmatpush1.msra.mxu0 %v5841_v11  ;;  %406 = vmatpush1.msra.mxu1 %v5846_v12  ;;  %v6168_v53 = vld [vmem:[#allocation9 + $0x18] sm:$0xff]  ;;  %v6174_v55 = vld [vmem:[#allocation9 + $0x10] sm:$0xff]  ;;  %v6180_v57 = vld [vmem:[#allocation9 + $0x8] sm:$0xff] }
  0x3b   :  { %336 = vmatprep.subr.mxu0 %v5853_v13  ;;  %407 = vmatprep.subr.mxu1 %v5858_v14  ;;  %v6170_v54 = vld [vmem:[#allocation11 + $0x18] sm:$0xff]  ;;  %v6176_v56 = vld [vmem:[#allocation11 + $0x10] sm:$0xff]  ;;  %v6182_v58 = vld [vmem:[#allocation11 + $0x8] sm:$0xff] }
  0x3c   :  { %337 = vmatpush1.msra.mxu0 %v5865_v15  ;;  %408 = vmatpush1.msra.mxu1 %v5870_v16  ;;  %v6186_v59 = vld [vmem:[#allocation9] sm:$0xff] }
  0x3d   :  { %338 = vmatprep.subr.mxu0 %v5877_v17  ;;  %409 = vmatprep.subr.mxu1 %v5882_v18  ;;  %v6190_v60 = vld [vmem:[#allocation11] sm:$0xff] }
  0x3e   :  { %339 = vmatpush1.msra.mxu0 %v5889_v19  ;;  %410 = vmatpush1.msra.mxu1 %v5894_v20 }
  0x3f   :  { %443 = vmatprep.mubr.f32.mxu1 %v7230_v0  ;;  %372 = vmatprep.mubr.f32.mxu0 %v7230_v0 }
  0x40   :  { %4784 = vmatmul.mubr.msk.f32.vlgmr.msra.gmra.mxu1 %vm120_vm1, %v304_v22  ;;  %4787 = vmatprep.subr.msk.mxu0 %vm124_vm0, %v5781_v1 }
  0x41   :  { %4790 = vmatprep.subr.msk.mxu1 %vm124_vm0, %v5786_v2  ;;  %4781 = vmatmul.mubr.msk.f32.vlgmr.msra.gmra.mxu0 %vm120_vm1, %v304_v22 }
  0x42   :  { %4788 = vmatpush1.msk.msra.mxu0 %vm124_vm0, %v5791_v3  ;;  %4791 = vmatpush1.msk.msra.mxu1 %vm124_vm0, %v5800_v4 }
  0x43   :  { %505 = vmatprep.subr.mxu0 %v5805_v5  ;;  %576 = vmatprep.subr.mxu1 %v5810_v6 }
  0x44   :  { %506 = vmatpush1.msra.mxu0 %v5819_v7  ;;  %577 = vmatpush1.msra.mxu1 %v5824_v8 }
  0x45   :  { %507 = vmatprep.subr.mxu0 %v5829_v9  ;;  %578 = vmatprep.subr.mxu1 %v5836_v10 }
  0x46   :  { %508 = vmatpush1.msra.mxu0 %v5841_v11  ;;  %579 = vmatpush1.msra.mxu1 %v5846_v12 }
  0x47   :  { %509 = vmatprep.subr.mxu0 %v5853_v13  ;;  %580 = vmatprep.subr.mxu1 %v5858_v14 }
  0x48   :  { %510 = vmatpush1.msra.mxu0 %v5865_v15  ;;  %581 = vmatpush1.msra.mxu1 %v5870_v16 }
  0x49   :  { %511 = vmatprep.subr.mxu0 %v5877_v17  ;;  %582 = vmatprep.subr.mxu1 %v5882_v18 }
  0x4a   :  { %512 = vmatpush1.msra.mxu0 %v5889_v19  ;;  %583 = vmatpush1.msra.mxu1 %v5894_v20 }
  0x4b   :  { %616 = vmatprep.mubr.f32.mxu1 %v7230_v0  ;;  %545 = vmatprep.mubr.f32.mxu0 %v7230_v0 }
  0x4c   :  { %4792 = vmatmul.mubr.msk.f32.vlgmr.msra.gmra.mxu1 %vm120_vm1, %v477_v23  ;;  %4795 = vmatprep.subr.msk.mxu0 %vm124_vm0, %v5781_v1 }
  0x4d   :  { %4798 = vmatprep.subr.msk.mxu1 %vm124_vm0, %v5786_v2  ;;  %4789 = vmatmul.mubr.msk.f32.vlgmr.msra.gmra.mxu0 %vm120_vm1, %v477_v23 }
  0x4e   :  { %4796 = vmatpush1.msk.msra.mxu0 %vm124_vm0, %v5791_v3  ;;  %4799 = vmatpush1.msk.msra.mxu1 %vm124_vm0, %v5800_v4 }
  0x4f   :  { %678 = vmatprep.subr.mxu0 %v5805_v5  ;;  %749 = vmatprep.subr.mxu1 %v5810_v6 }
  0x50   :  { %679 = vmatpush1.msra.mxu0 %v5819_v7  ;;  %750 = vmatpush1.msra.mxu1 %v5824_v8 }
  0x51   :  { %680 = vmatprep.subr.mxu0 %v5829_v9  ;;  %751 = vmatprep.subr.mxu1 %v5836_v10 }
  0x52   :  { %681 = vmatpush1.msra.mxu0 %v5841_v11  ;;  %752 = vmatpush1.msra.mxu1 %v5846_v12 }
  0x53   :  { %682 = vmatprep.subr.mxu0 %v5853_v13  ;;  %753 = vmatprep.subr.mxu1 %v5858_v14 }
  0x54   :  { %683 = vmatpush1.msra.mxu0 %v5865_v15  ;;  %754 = vmatpush1.msra.mxu1 %v5870_v16 }
  0x55   :  { %684 = vmatprep.subr.mxu0 %v5877_v17  ;;  %755 = vmatprep.subr.mxu1 %v5882_v18 }
  0x56   :  { %685 = vmatpush1.msra.mxu0 %v5889_v19  ;;  %756 = vmatpush1.msra.mxu1 %v5894_v20 }
  0x57   :  { %789 = vmatprep.mubr.f32.mxu1 %v7230_v0  ;;  %718 = vmatprep.mubr.f32.mxu0 %v7230_v0 }
  0x58   :  { %4800 = vmatmul.mubr.msk.f32.vlgmr.msra.gmra.mxu1 %vm120_vm1, %v650_v24  ;;  %4803 = vmatprep.subr.msk.mxu0 %vm124_vm0, %v5781_v1 }
  0x59   :  { %4806 = vmatprep.subr.msk.mxu1 %vm124_vm0, %v5786_v2  ;;  %4797 = vmatmul.mubr.msk.f32.vlgmr.msra.gmra.mxu0 %vm120_vm1, %v650_v24 }
  0x5a   :  { %4804 = vmatpush1.msk.msra.mxu0 %vm124_vm0, %v5791_v3  ;;  %4807 = vmatpush1.msk.msra.mxu1 %vm124_vm0, %v5800_v4 }
  0x5b   :  { %851 = vmatprep.subr.mxu0 %v5805_v5  ;;  %922 = vmatprep.subr.mxu1 %v5810_v6 }
  0x5c   :  { %852 = vmatpush1.msra.mxu0 %v5819_v7  ;;  %923 = vmatpush1.msra.mxu1 %v5824_v8 }
  0x5d   :  { %853 = vmatprep.subr.mxu0 %v5829_v9  ;;  %924 = vmatprep.subr.mxu1 %v5836_v10 }
  0x5e   :  { %854 = vmatpush1.msra.mxu0 %v5841_v11  ;;  %925 = vmatpush1.msra.mxu1 %v5846_v12 }
  0x5f   :  { %855 = vmatprep.subr.mxu0 %v5853_v13  ;;  %926 = vmatprep.subr.mxu1 %v5858_v14 }
  0x60   :  { %856 = vmatpush1.msra.mxu0 %v5865_v15  ;;  %927 = vmatpush1.msra.mxu1 %v5870_v16 }
  0x61   :  { %857 = vmatprep.subr.mxu0 %v5877_v17  ;;  %928 = vmatprep.subr.mxu1 %v5882_v18 }
  0x62   :  { %858 = vmatpush1.msra.mxu0 %v5889_v19  ;;  %929 = vmatpush1.msra.mxu1 %v5894_v20 }
  0x63   :  { %962 = vmatprep.mubr.f32.mxu1 %v7230_v0  ;;  %891 = vmatprep.mubr.f32.mxu0 %v7230_v0 }
  0x64   :  { %4808 = vmatmul.mubr.msk.f32.vlgmr.msra.gmra.mxu1 %vm120_vm1, %v823_v25  ;;  %4811 = vmatprep.subr.msk.mxu0 %vm124_vm0, %v5781_v1 }
  0x65   :  { %4814 = vmatprep.subr.msk.mxu1 %vm124_vm0, %v5786_v2  ;;  %4805 = vmatmul.mubr.msk.f32.vlgmr.msra.gmra.mxu0 %vm120_vm1, %v823_v25 }
  0x66   :  { %4812 = vmatpush1.msk.msra.mxu0 %vm124_vm0, %v5791_v3  ;;  %4815 = vmatpush1.msk.msra.mxu1 %vm124_vm0, %v5800_v4 }
  0x67   :  { %1024 = vmatprep.subr.mxu0 %v5805_v5  ;;  %1095 = vmatprep.subr.mxu1 %v5810_v6 }
  0x68   :  { %1025 = vmatpush1.msra.mxu0 %v5819_v7  ;;  %1096 = vmatpush1.msra.mxu1 %v5824_v8 }
  0x69   :  { %1026 = vmatprep.subr.mxu0 %v5829_v9  ;;  %1097 = vmatprep.subr.mxu1 %v5836_v10 }
  0x6a   :  { %1027 = vmatpush1.msra.mxu0 %v5841_v11  ;;  %1098 = vmatpush1.msra.mxu1 %v5846_v12 }
  0x6b   :  { %1028 = vmatprep.subr.mxu0 %v5853_v13  ;;  %1099 = vmatprep.subr.mxu1 %v5858_v14 }
  0x6c   :  { %1029 = vmatpush1.msra.mxu0 %v5865_v15  ;;  %1100 = vmatpush1.msra.mxu1 %v5870_v16 }
  0x6d   :  { %1030 = vmatprep.subr.mxu0 %v5877_v17  ;;  %1101 = vmatprep.subr.mxu1 %v5882_v18 }
  0x6e   :  { %1031 = vmatpush1.msra.mxu0 %v5889_v19  ;;  %1102 = vmatpush1.msra.mxu1 %v5894_v20 }
  0x6f   :  { %1135 = vmatprep.mubr.f32.mxu1 %v7230_v0  ;;  %1064 = vmatprep.mubr.f32.mxu0 %v7230_v0 }
  0x70   :  { %4816 = vmatmul.mubr.msk.f32.vlgmr.msra.gmra.mxu1 %vm120_vm1, %v996_v26  ;;  %4819 = vmatprep.subr.msk.mxu0 %vm124_vm0, %v5781_v1 }
  0x71   :  { %4822 = vmatprep.subr.msk.mxu1 %vm124_vm0, %v5786_v2  ;;  %4813 = vmatmul.mubr.msk.f32.vlgmr.msra.gmra.mxu0 %vm120_vm1, %v996_v26 }
  0x72   :  { %4820 = vmatpush1.msk.msra.mxu0 %vm124_vm0, %v5791_v3  ;;  %4823 = vmatpush1.msk.msra.mxu1 %vm124_vm0, %v5800_v4 }
  0x73   :  { %1197 = vmatprep.subr.mxu0 %v5805_v5  ;;  %1268 = vmatprep.subr.mxu1 %v5810_v6 }
  0x74   :  { %1198 = vmatpush1.msra.mxu0 %v5819_v7  ;;  %1269 = vmatpush1.msra.mxu1 %v5824_v8 }
  0x75   :  { %1199 = vmatprep.subr.mxu0 %v5829_v9  ;;  %1270 = vmatprep.subr.mxu1 %v5836_v10 }
  0x76   :  { %1200 = vmatpush1.msra.mxu0 %v5841_v11  ;;  %1271 = vmatpush1.msra.mxu1 %v5846_v12 }
  0x77   :  { %1201 = vmatprep.subr.mxu0 %v5853_v13  ;;  %1272 = vmatprep.subr.mxu1 %v5858_v14 }
  0x78   :  { %1202 = vmatpush1.msra.mxu0 %v5865_v15  ;;  %1273 = vmatpush1.msra.mxu1 %v5870_v16 }
  0x79   :  { %1203 = vmatprep.subr.mxu0 %v5877_v17  ;;  %1274 = vmatprep.subr.mxu1 %v5882_v18 }
  0x7a   :  { %1204 = vmatpush1.msra.mxu0 %v5889_v19  ;;  %1275 = vmatpush1.msra.mxu1 %v5894_v20 }
  0x7b   :  { %1308 = vmatprep.mubr.f32.mxu1 %v7230_v0  ;;  %1237 = vmatprep.mubr.f32.mxu0 %v7230_v0 }
  0x7c   :  { %4824 = vmatmul.mubr.msk.f32.vlgmr.msra.gmra.mxu1 %vm120_vm1, %v1169_v27  ;;  %4827 = vmatprep.subr.msk.mxu0 %vm124_vm0, %v5781_v1  ;;  %v97_v1 = vld [vmem:[%s7221_s2] sm:$0xf]  ;;  %s5709_s2 = smov 64  }
  0x7d   :  { %4830 = vmatprep.subr.msk.mxu1 %vm124_vm0, %v5786_v2  ;;  %4821 = vmatmul.mubr.msk.f32.vlgmr.msra.gmra.mxu0 %vm120_vm1, %v1169_v27  ;;  %v102_v2 = vsub.s32 0, %v6202_v62 }
  0x7e   :  { %4828 = vmatpush1.msk.msra.mxu0 %vm124_vm0, %v5791_v3  ;;  %4831 = vmatpush1.msk.msra.mxu1 %vm124_vm0, %v5800_v4  ;;  %v114_v3 = vsub.s32 3, %v6202_v62  ;;  %v106_v4 = vsub.s32 1, %v6202_v62 }
  0x7f   :  { %1370 = vmatprep.subr.mxu0 %v5805_v5  ;;  %1441 = vmatprep.subr.mxu1 %v5810_v6  ;;  %v6211_v5 = vrot.slane %v97_v1, %v110_v63  ;;  %v6213_v6 = vrot.slane %v97_v1, %v102_v2 }
  0x80   :  { %1371 = vmatpush1.msra.mxu0 %v5819_v7  ;;  %1442 = vmatpush1.msra.mxu1 %v5824_v8  ;;  %v6215_v7 = vrot.slane %v97_v1, %v114_v3 }
  0x81   :  { %1372 = vmatprep.subr.mxu0 %v5829_v9  ;;  %1443 = vmatprep.subr.mxu1 %v5836_v10  ;;  %v6217_v9 = vrot.slane %v97_v1, %v106_v4 }
  0x82   :  { %1373 = vmatpush1.msra.mxu0 %v5841_v11  ;;  %1444 = vmatpush1.msra.mxu1 %v5846_v12 }
  0x83   :  { %1374 = vmatprep.subr.mxu0 %v5853_v13  ;;  %1445 = vmatprep.subr.mxu1 %v5858_v14 }
  0x84   :  { %1375 = vmatpush1.msra.mxu0 %v5865_v15  ;;  %1446 = vmatpush1.msra.mxu1 %v5870_v16 }
  0x85   :  { %1376 = vmatprep.subr.mxu0 %v5877_v17  ;;  %1447 = vmatprep.subr.mxu1 %v5882_v18 }
  0x86   :  { %1377 = vmatpush1.msra.mxu0 %v5889_v19  ;;  %1448 = vmatpush1.msra.mxu1 %v5894_v20 }
  0x87   :  { %1481 = vmatprep.mubr.f32.mxu1 %v7230_v0  ;;  %1410 = vmatprep.mubr.f32.mxu0 %v7230_v0 }
  0x88   :  { %4832 = vmatmul.mubr.msk.f32.vlgmr.msra.gmra.mxu1 %vm120_vm1, %v1342_v28  ;;  %1583 = vmatprep.subr.mxu0 %v6094_v29 }
  0x89   :  { %1695 = vmatprep.subr.mxu1 %v6098_v30  ;;  %4829 = vmatmul.mubr.msk.f32.vlgmr.msra.gmra.mxu0 %vm120_vm1, %v1342_v28 }
  0x8a   :  { %1584 = vmatpush1.msra.mxu0 %v6102_v31  ;;  %1696 = vmatpush1.msra.mxu1 %v6104_v32 }
  0x8b   :  { %1585 = vmatprep.subr.mxu0 %v6108_v33  ;;  %1697 = vmatprep.subr.mxu1 %v6110_v34 }
  0x8c   :  { %1586 = vmatpush1.msra.mxu0 %v6114_v35  ;;  %1698 = vmatpush1.msra.mxu1 %v6116_v36 }
  0x8d   :  { %1587 = vmatprep.subr.mxu0 %v6120_v37  ;;  %1699 = vmatprep.subr.mxu1 %v6122_v38 }
  0x8e   :  { %1588 = vmatpush1.msra.mxu0 %v6126_v39  ;;  %1700 = vmatpush1.msra.mxu1 %v6128_v40 }
  0x8f   :  { %1589 = vmatprep.subr.mxu0 %v6132_v41  ;;  %1701 = vmatprep.subr.mxu1 %v6134_v42 }
  0x90   :  { %1590 = vmatpush1.msra.mxu0 %v6138_v43  ;;  %1702 = vmatpush1.msra.mxu1 %v6140_v44 }
  0x91   :  { %1591 = vmatprep.subr.mxu0 %v6144_v45  ;;  %1703 = vmatprep.subr.mxu1 %v6146_v46 }
  0x92   :  { %1592 = vmatpush1.msra.mxu0 %v6150_v47  ;;  %1704 = vmatpush1.msra.mxu1 %v6152_v48 }
  0x93   :  { %1593 = vmatprep.subr.mxu0 %v6156_v49  ;;  %1705 = vmatprep.subr.mxu1 %v6158_v50 }
  0x94   :  { %1594 = vmatpush1.msra.mxu0 %v6162_v51  ;;  %1706 = vmatpush1.msra.mxu1 %v6164_v52 }
  0x95   :  { %1595 = vmatprep.subr.mxu0 %v6168_v53  ;;  %1707 = vmatprep.subr.mxu1 %v6170_v54 }
  0x96   :  { %1596 = vmatpush1.msra.mxu0 %v6174_v55  ;;  %1708 = vmatpush1.msra.mxu1 %v6176_v56 }
  0x97   :  { %1597 = vmatprep.subr.mxu0 %v6180_v57  ;;  %1709 = vmatprep.subr.mxu1 %v6182_v58 }
  0x98   :  { %1598 = vmatpush1.msra.mxu0 %v6186_v59  ;;  %1631 = vmatprep.mubr.f32.mxu0 %v7230_v0 }
  0x99   :  { %1710 = vmatpush1.msra.mxu1 %v6190_v60  ;;  %1743 = vmatprep.mubr.f32.mxu1 %v7230_v0 }
  0x9a   :  { %1632 = vmatmul.mubr.f32.vlgmr.msra.gmra.mxu0 %v7230_v0  ;;  %1744 = vmatmul.mubr.f32.vlgmr.msra.gmra.mxu1 %v7230_v0 }
  0x9b   :  { %5052 = vmatprep.subr.mxu1 %v7230_v0  ;;  %5033 = vmatprep.subr.mxu0 %v7230_v0 }
  0x9c   :  { %5068 = vmatprep.mubr.msk.f32.mxu1 %vm5710_vm2, %v7230_v0  ;;  %5049 = vmatprep.mubr.msk.f32.mxu0 %vm5710_vm2, %v7230_v0 }
  0xf4   :  { %v274_v8 = vpop.f32.mrf.mxu1 }
  0xf5   :  { %v275_v10 = vadd.f32 %v274_v8, %v6211_v5  ;;  %v203_v11 = vpop.f32.mrf.mxu0 }
  0xf6   :  { %v276_v12 = vpop.f32.mrf.mxu1  ;;  %v204_v13 = vadd.f32 %v203_v11, %v6213_v6 }
  0xf7   :  { %v277_v14 = vadd.f32 %v276_v12, %v6215_v7  ;;  %v205_v15 = vpop.f32.mrf.mxu0 }
  0xf8   :  { %v206_v16 = vadd.f32 %v205_v15, %v6217_v9 }
  0xf9   :  { %v293_v17 = vcombine.low %v275_v10, %v277_v14 }
  0xfa   :  { %v281_v18 = vcombine.low %v204_v13, %v206_v16 }
  0xfb   :  { %4778 = vst.sshfl [vmem:[#allocation3] sm:$0x33 pattern:$0x76325410] %v293_v17 }
  0xfc   :  { %4777 = vst.sshfl [vmem:[#allocation2] sm:$0x33 pattern:$0x76325410] %v281_v18 }
 0x100   :  { %v445_v19 = vpop.f32.mrf.mxu1 }
 0x101   :  { %v446_v20 = vadd.f32 %v445_v19, %v6211_v5  ;;  %v374_v21 = vpop.f32.mrf.mxu0 }
 0x102   :  { %v447_v22 = vpop.f32.mrf.mxu1  ;;  %v375_v23 = vadd.f32 %v374_v21, %v6213_v6 }
 0x103   :  { %v448_v24 = vadd.f32 %v447_v22, %v6215_v7  ;;  %v376_v25 = vpop.f32.mrf.mxu0 }
 0x104   :  { %v377_v26 = vadd.f32 %v376_v25, %v6217_v9 }
 0x105   :  { %v465_v27 = vcombine.low %v446_v20, %v448_v24 }
 0x106   :  { %v452_v28 = vcombine.low %v375_v23, %v377_v26 }
 0x107   :  { %4786 = vst.sshfl [vmem:[#allocation3 + $0x4] sm:$0x33 pattern:$0x76325410] %v465_v27 }
 0x108   :  { %4785 = vst.sshfl [vmem:[#allocation2 + $0x4] sm:$0x33 pattern:$0x76325410] %v452_v28 }
 0x10c   :  { %v618_v61 = vpop.f32.mrf.mxu1 }
 0x10d   :  { %v619_v63 = vadd.f32 %v618_v61, %v6211_v5  ;;  %v547_v1 = vpop.f32.mrf.mxu0 }
 0x10e   :  { %v620_v2 = vpop.f32.mrf.mxu1  ;;  %v548_v3 = vadd.f32 %v547_v1, %v6213_v6 }
 0x10f   :  { %v621_v4 = vadd.f32 %v620_v2, %v6215_v7  ;;  %v549_v8 = vpop.f32.mrf.mxu0 }
 0x110   :  { %v550_v10 = vadd.f32 %v549_v8, %v6217_v9 }
 0x111   :  { %v638_v11 = vcombine.low %v619_v63, %v621_v4 }
 0x112   :  { %v625_v12 = vcombine.low %v548_v3, %v550_v10 }
 0x113   :  { %4794 = vst.sshfl [vmem:[#allocation3 + $0x8] sm:$0x33 pattern:$0x76325410] %v638_v11 }
 0x114   :  { %4793 = vst.sshfl [vmem:[#allocation2 + $0x8] sm:$0x33 pattern:$0x76325410] %v625_v12 }
 0x118   :  { %v791_v13 = vpop.f32.mrf.mxu1 }
 0x119   :  { %v792_v14 = vadd.f32 %v791_v13, %v6211_v5  ;;  %v720_v15 = vpop.f32.mrf.mxu0 }
 0x11a   :  { %v793_v16 = vpop.f32.mrf.mxu1  ;;  %v721_v17 = vadd.f32 %v720_v15, %v6213_v6 }
 0x11b   :  { %v794_v18 = vadd.f32 %v793_v16, %v6215_v7  ;;  %v722_v19 = vpop.f32.mrf.mxu0 }
 0x11c   :  { %v723_v20 = vadd.f32 %v722_v19, %v6217_v9 }
 0x11d   :  { %v811_v21 = vcombine.low %v792_v14, %v794_v18 }
 0x11e   :  { %v798_v22 = vcombine.low %v721_v17, %v723_v20 }
 0x11f   :  { %4802 = vst.sshfl [vmem:[#allocation3 + $0xc] sm:$0x33 pattern:$0x76325410] %v811_v21 }
 0x120   :  { %4801 = vst.sshfl [vmem:[#allocation2 + $0xc] sm:$0x33 pattern:$0x76325410] %v798_v22 }
 0x124   :  { %v964_v23 = vpop.f32.mrf.mxu1 }
 0x125   :  { %v965_v24 = vadd.f32 %v964_v23, %v6211_v5  ;;  %v893_v25 = vpop.f32.mrf.mxu0 }
 0x126   :  { %v966_v26 = vpop.f32.mrf.mxu1  ;;  %v894_v27 = vadd.f32 %v893_v25, %v6213_v6 }
 0x127   :  { %v967_v28 = vadd.f32 %v966_v26, %v6215_v7  ;;  %v895_v61 = vpop.f32.mrf.mxu0 }
 0x128   :  { %v896_v63 = vadd.f32 %v895_v61, %v6217_v9 }
 0x129   :  { %v984_v1 = vcombine.low %v965_v24, %v967_v28 }
 0x12a   :  { %v971_v2 = vcombine.low %v894_v27, %v896_v63 }
 0x12b   :  { %4810 = vst.sshfl [vmem:[#allocation3 + $0x10] sm:$0x33 pattern:$0x76325410] %v984_v1 }
 0x12c   :  { %4809 = vst.sshfl [vmem:[#allocation2 + $0x10] sm:$0x33 pattern:$0x76325410] %v971_v2 }
 0x130   :  { %v1137_v3 = vpop.f32.mrf.mxu1 }
 0x131   :  { %v1138_v4 = vadd.f32 %v1137_v3, %v6211_v5  ;;  %v1066_v8 = vpop.f32.mrf.mxu0 }
 0x132   :  { %v1139_v10 = vpop.f32.mrf.mxu1  ;;  %v1067_v11 = vadd.f32 %v1066_v8, %v6213_v6 }
 0x133   :  { %v1140_v12 = vadd.f32 %v1139_v10, %v6215_v7  ;;  %v1068_v13 = vpop.f32.mrf.mxu0 }
 0x134   :  { %v1069_v14 = vadd.f32 %v1068_v13, %v6217_v9 }
 0x135   :  { %v1157_v15 = vcombine.low %v1138_v4, %v1140_v12 }
 0x136   :  { %v1144_v16 = vcombine.low %v1067_v11, %v1069_v14  ;;  %v5708_v11 = vmov 1983009808  }
 0x137   :  { %4818 = vst.sshfl [vmem:[#allocation3 + $0x14] sm:$0x33 pattern:$0x76325410] %v1157_v15  ;;  %v1642_v12 = vunpack.c.l.s4 %v5708_v11 }
 0x138   :  { %4817 = vst.sshfl [vmem:[#allocation2 + $0x14] sm:$0x33 pattern:$0x76325410] %v1144_v16 }
 0x139   :  { %v1643_v13 = vunpack.c.0.s8 %v1642_v12  ;;  %v6269_v12 = vld [vmem:[%s7225_s6 + $0x38] sm:$0xff] }
 0x13a   :  { %5053 = vmatpush3.msra.mxu1 %v6269_v12 }
 0x13b   :  { %5054 = vmatprep.subr.mxu1 %v7230_v0 }
 0x13c   :  { %v1310_v17 = vpop.f32.mrf.mxu1 }
 0x13d   :  { %v1311_v18 = vadd.f32 %v1310_v17, %v6211_v5  ;;  %v1239_v19 = vpop.f32.mrf.mxu0 }
 0x13e   :  { %v1312_v20 = vpop.f32.mrf.mxu1  ;;  %v1240_v21 = vadd.f32 %v1239_v19, %v6213_v6 }
 0x13f   :  { %v1313_v22 = vadd.f32 %v1312_v20, %v6215_v7  ;;  %v1241_v23 = vpop.f32.mrf.mxu0 }
 0x140   :  { %v1242_v24 = vadd.f32 %v1241_v23, %v6217_v9 }
 0x141   :  { %v1330_v25 = vcombine.low %v1311_v18, %v1313_v22 }
 0x142   :  { %v1317_v26 = vcombine.low %v1240_v21, %v1242_v24  ;;  %v1562_v21 = vld [vmem:[#allocation2] sm:$0xf] }
 0x143   :  { %4826 = vst.sshfl [vmem:[#allocation3 + $0x18] sm:$0x33 pattern:$0x76325410] %v1330_v25 }
 0x144   :  { %4825 = vst.sshfl [vmem:[#allocation2 + $0x18] sm:$0x33 pattern:$0x76325410] %v1317_v26 }
 0x148   :  { %v1483_v27 = vpop.f32.mrf.mxu1 }
 0x149   :  { %v1484_v28 = vadd.f32 %v1483_v27, %v6211_v5  ;;  %v1412_v61 = vpop.f32.mrf.mxu0  ;;  %v6252_v5 = vsub.s32 %v1643_v13, %v6202_v62  ;;  %v6274_v13 = vld [vmem:[%s7225_s6 + $0x30] sm:$0xff] }
 0x14a   :  { %v1485_v63 = vpop.f32.mrf.mxu1  ;;  %v1413_v1 = vadd.f32 %v1412_v61, %v6213_v6  ;;  %5055 = vmatpush3.msra.mxu1 %v6274_v13 }
 0x14b   :  { %v1486_v2 = vadd.f32 %v1485_v63, %v6215_v7  ;;  %v1414_v3 = vpop.f32.mrf.mxu0  ;;  %5056 = vmatprep.subr.mxu1 %v7230_v0 }
 0x14c   :  { %v1415_v4 = vadd.f32 %v1414_v3, %v6217_v9 }
 0x14d   :  { %v1503_v8 = vcombine.low %v1484_v28, %v1486_v2 }
 0x14e   :  { %v1490_v10 = vcombine.low %v1413_v1, %v1415_v4 }
 0x14f   :  { %4834 = vst.sshfl [vmem:[#allocation3 + $0x1c] sm:$0x33 pattern:$0x76325410] %v1503_v8 }
 0x150   :  { %4833 = vst.sshfl [vmem:[#allocation2 + $0x1c] sm:$0x33 pattern:$0x76325410] %v1490_v10 }
 0x156   :  { %v1678_v19 = vld [vmem:[#allocation3 + $0x1c] sm:$0xf] }
 0x15a   :  { %v1633_v14 = vpop.f32.mrf.mxu0  ;;  %v1745_v15 = vpop.f32.mrf.mxu1 }
 0x15c   :  { %v1635_v16 = vpop.f32.mrf.mxu0  ;;  %v1747_v17 = vpop.f32.mrf.mxu1 }
 0x15d   :  { %v1640_v6 = vcombine.low %v1633_v14, %v1635_v16  ;;  %v1752_v18 = vcombine.low %v1745_v15, %v1747_v17  ;;  %v6279_v14 = vld [vmem:[%s7224_s5 + $0x38] sm:$0xff]  ;;  %v6286_v15 = vld [vmem:[%s7224_s5 + $0x30] sm:$0xff]  ;;  %v6292_v16 = vld [vmem:[%s7225_s6 + $0x28] sm:$0xff] }
 0x15e   :  { %5034 = vmatpush3.msra.mxu0 %v6279_v14  ;;  %v6298_v17 = vld [vmem:[%s7224_s5 + $0x28] sm:$0xff]  ;;  %5057 = vmatpush3.msra.mxu1 %v6292_v16 }
 0x15f   :  { %v1759_v7 = vrot.slane %v1752_v18, %v6252_v5  ;;  %v1647_v9 = vrot.slane %v1640_v6, %v6252_v5  ;;  %5035 = vmatprep.subr.mxu0 %v7230_v0  ;;  %v6306_v6 = vld [vmem:[%s7225_s6 + $0x20] sm:$0xff]  ;;  %5058 = vmatprep.subr.mxu1 %v7230_v0 }
 0x160   :  { %5036 = vmatpush3.msra.mxu0 %v6286_v15  ;;  %v6312_v18 = vld [vmem:[%s7224_s5 + $0x20] sm:$0xff]  ;;  %5059 = vmatpush3.msra.mxu1 %v6306_v6 }
 0x161   :  { %v1761_v20 = vadd.f32 %v1759_v7, %v1678_v19  ;;  %v1649_v22 = vadd.f32 %v1647_v9, %v1562_v21  ;;  %5037 = vmatprep.subr.mxu0 %v7230_v0  ;;  %v6320_v7 = vld [vmem:[%s7225_s6 + $0x18] sm:$0xff]  ;;  %5060 = vmatprep.subr.mxu1 %v7230_v0  ;;  %v6334_v9 = vld [vmem:[%s7225_s6 + $0x10] sm:$0xff] }
 0x162   :  { %5038 = vmatpush3.msra.mxu0 %v6298_v17  ;;  %v6326_v19 = vld [vmem:[%s7224_s5 + $0x18] sm:$0xff]  ;;  %5061 = vmatpush3.msra.mxu1 %v6320_v7 }
 0x163   :  { %1769 = vrot.lane.b32.xlu0 %v1761_v20, %s5709_s2  ;;  %v4836_v23 = vmul.f32 -1.442695, %v1761_v20  ;;  %v4835_v62 = vmul.f32 -1.442695, %v1649_v22  ;;  %5039 = vmatprep.subr.mxu0 %v7230_v0  ;;  %v6343_v20 = vld [vmem:[%s7225_s6 + $0x8] sm:$0xff] }
 0x164   :  { %5040 = vmatpush3.msra.mxu0 %v6312_v18  ;;  %5062 = vmatprep.subr.mxu1 %v7230_v0 }
 0x165   :  { %5360 = vpow2.f32 %v4836_v23  ;;  %5041 = vmatprep.subr.mxu0 %v7230_v0  ;;  %5063 = vmatpush3.msra.mxu1 %v6334_v9 }
 0x166   :  { %5362 = vpow2.f32 %v4835_v62  ;;  %5042 = vmatpush3.msra.mxu0 %v6326_v19  ;;  %5064 = vmatprep.subr.mxu1 %v7230_v0 }
 0x167   :  { %1657 = vrot.lane.b32.xlu0 %v1649_v22, %s5709_s2  ;;  %5043 = vmatprep.subr.mxu0 %v7230_v0 }
 0x168   :  { %5065 = vmatpush3.msra.mxu1 %v6343_v20 }
 0x169   :  { %5066 = vmatprep.subr.mxu1 %v7230_v0 }
 0x172   :  { %v5361_v24 = vpop.eup %5360 }
 0x173   :  { %v1765_v25 = vadd.f32 1.0, %v5361_v24  ;;  %v5363_v26 = vpop.eup %5362 }
 0x174   :  { %v1653_v61 = vadd.f32 1.0, %v5363_v26  ;;  %v6363_v26 = vld [vmem:[%s7225_s6] sm:$0xff] }
 0x175   :  { %5364 = vrcp.f32 %v1765_v25  ;;  %v6358_v25 = vld [vmem:[%s7224_s5 + $0x10] sm:$0xff]  ;;  %5067 = vmatpush3.msra.mxu1 %v6363_v26 }
 0x176   :  { %5044 = vmatpush3.msra.mxu0 %v6358_v25  ;;  %2069 = vmatprep.subr.mxu1 %v6098_v30 }
 0x177   :  { %5045 = vmatprep.subr.mxu0 %v7230_v0 }
 0x182   :  { %v6258_v2 = vpop.eup %5364 }
 0x183   :  { %v1774_v21 = vmul.f32 0.0, %v6258_v2 }
 0x1d5   :  { %v1770_v27 = vpop.permute.xlu0 %1769 }
 0x1d6   :  { %v1771_v28 = vrot.slane %v1770_v27, 2  ;;  %v6368_v27 = vld [vmem:[%s7224_s5 + $0x8] sm:$0xff] }
 0x1d7   :  { %7244 = vst [vmem:[#allocation17_spill] sm:$0xff] %v6368_v27  ;;  %5046 = vmatpush3.msra.mxu0 %v6368_v27 }
 0x1d8   :  { %5366 = vtanh.f32 %v1771_v28  ;;  %5047 = vmatprep.subr.mxu0 %v7230_v0 }
 0x1d9   :  { %v1658_v63 = vpop.permute.xlu0 %1657  ;;  %5368 = vrcp.f32 %v1653_v61  ;;  %v6384_v61 = vld [vmem:[%s7224_s5] sm:$0xff] }
 0x1da   :  { %v1659_v1 = vrot.slane %v1658_v63, 2  ;;  %7245 = vst [vmem:[#allocation18_spill] sm:$0xff] %v6384_v61  ;;  %5048 = vmatpush3.msra.mxu0 %v6384_v61 }
 0x1db   :  { %1957 = vmatprep.subr.mxu0 %v6094_v29 }
 0x1dc   :  { %5370 = vtanh.f32 %v1659_v1 }
 0x1e5   :  { %v5367_v3 = vpop.eup %5366 }
 0x1e6   :  { %v1775_v4 = vmul.f32 %v5367_v3, %v6258_v2  ;;  %v6261_v8 = vpop.eup %5368  ;;  %v1783_v3 = vrot.slane %v6258_v2, 2 }
 0x1e7   :  { %v1662_v62 = vmul.f32 0.0, %v6261_v8 }
 0x1e8   :  { %1777 = vrot.lane.b32.xlu1 %v1775_v4, %s5709_s2 }
 0x1e9   :  { %v5371_v10 = vpop.eup %5370 }
 0x1ea   :  { %v1663_v11 = vmul.f32 %v5371_v10, %v6261_v8 }
 0x1ec   :  { %1665 = vrot.lane.b32.xlu1 %v1663_v11, %s5709_s2  ;;  %v1671_v11 = vrot.slane %v6261_v8, 2 }
 0x25a   :  { %v1778_v22 = vpop.permute.xlu1 %1777 }
 0x25b   :  { %v6351_v23 = vadd.f32 %v1778_v22, %v1774_v21 }
 0x25d   :  { %5372 = vtanh.f32 %v6351_v23 }
 0x25e   :  { %v1666_v24 = vpop.permute.xlu1 %1665 }
 0x25f   :  { %v6370_v28 = vadd.f32 %v1666_v24, %v1662_v62 }
 0x261   :  { %5374 = vtanh.f32 %v6370_v28 }
 0x26a   :  { %v5373_v63 = vpop.eup %5372 }
 0x26b   :  { %1786 = vrot.lane.b32.xlu0 %v5373_v63, %s5709_s2 }
 0x26e   :  { %v5375_v1 = vpop.eup %5374 }
 0x26f   :  { %1674 = vrot.lane.b32.xlu1 %v5375_v1, %s5709_s2 }
 0x2dd   :  { %v1787_v4 = vpop.permute.xlu0 %1786 }
 0x2de   :  { %v1789_v10 = vmul.f32 %v1787_v4, %v1783_v3 }
 0x2e0   :  { %5069 = vmatmul.mubr.msk.f32.vlgmr.msra.gmra.mxu1 %vm1563_vm3, %v1789_v10 }
 0x2e1   :  { %2070 = vmatpush1.msra.mxu1 %v6104_v32  ;;  %v1675_v21 = vpop.permute.xlu1 %1674  ;;  %2117 = vmatprep.mubr.f32.mxu1 %v7230_v0 }
 0x2e2   :  { %2071 = vmatprep.subr.mxu1 %v6110_v34  ;;  %v1677_v22 = vmul.f32 %v1675_v21, %v1671_v11  ;;  %v2052_v21 = vld [vmem:[#allocation3 + $0x18] sm:$0xf] }
 0x2e3   :  { %2072 = vmatpush1.msra.mxu1 %v6116_v36 }
 0x2e4   :  { %2073 = vmatprep.subr.mxu1 %v6122_v38  ;;  %5050 = vmatmul.mubr.msk.f32.vlgmr.msra.gmra.mxu0 %vm1563_vm3, %v1677_v22 }
 0x2e5   :  { %1958 = vmatpush1.msra.mxu0 %v6102_v31  ;;  %2074 = vmatpush1.msra.mxu1 %v6128_v40 }
 0x2e6   :  { %1959 = vmatprep.subr.mxu0 %v6108_v33  ;;  %2075 = vmatprep.subr.mxu1 %v6134_v42 }
 0x2e7   :  { %1960 = vmatpush1.msra.mxu0 %v6114_v35  ;;  %2076 = vmatpush1.msra.mxu1 %v6140_v44 }
 0x2e8   :  { %1961 = vmatprep.subr.mxu0 %v6120_v37  ;;  %2077 = vmatprep.subr.mxu1 %v6146_v46 }
 0x2e9   :  { %1962 = vmatpush1.msra.mxu0 %v6126_v39  ;;  %2078 = vmatpush1.msra.mxu1 %v6152_v48 }
 0x2ea   :  { %1963 = vmatprep.subr.mxu0 %v6132_v41  ;;  %2079 = vmatprep.subr.mxu1 %v6158_v50 }
 0x2eb   :  { %1964 = vmatpush1.msra.mxu0 %v6138_v43  ;;  %2080 = vmatpush1.msra.mxu1 %v6164_v52 }
 0x2ec   :  { %1965 = vmatprep.subr.mxu0 %v6144_v45  ;;  %2081 = vmatprep.subr.mxu1 %v6170_v54 }
 0x2ed   :  { %1966 = vmatpush1.msra.mxu0 %v6150_v47  ;;  %2082 = vmatpush1.msra.mxu1 %v6176_v56 }
 0x2ee   :  { %1967 = vmatprep.subr.mxu0 %v6156_v49  ;;  %2083 = vmatprep.subr.mxu1 %v6182_v58 }
 0x2ef   :  { %1968 = vmatpush1.msra.mxu0 %v6162_v51  ;;  %2084 = vmatpush1.msra.mxu1 %v6190_v60 }
 0x2f0   :  { %1969 = vmatprep.subr.mxu0 %v6168_v53  ;;  %4841 = vmatmul.mubr.msk.f32.vlgmr.msra.gmra.mxu1 %vm1563_vm3, %v1789_v10 }
 0x2f1   :  { %1970 = vmatpush1.msra.mxu0 %v6174_v55  ;;  %2005 = vmatprep.mubr.f32.mxu0 %v7230_v0 }
 0x2f2   :  { %1971 = vmatprep.subr.mxu0 %v6180_v57  ;;  %5090 = vmatprep.subr.mxu1 %v7230_v0 }
 0x2f3   :  { %1972 = vmatpush1.msra.mxu0 %v6186_v59  ;;  %5091 = vmatpush3.msra.mxu1 %v6269_v12 }
 0x2f4   :  { %4839 = vmatmul.mubr.msk.f32.vlgmr.msra.gmra.mxu0 %vm1563_vm3, %v1677_v22  ;;  %5092 = vmatprep.subr.mxu1 %v7230_v0 }
 0x2f5   :  { %5093 = vmatpush3.msra.mxu1 %v6274_v13  ;;  %5071 = vmatprep.subr.mxu0 %v7230_v0 }
 0x2f6   :  { %5094 = vmatprep.subr.mxu1 %v7230_v0  ;;  %5072 = vmatpush3.msra.mxu0 %v6279_v14 }
 0x2f7   :  { %5095 = vmatpush3.msra.mxu1 %v6292_v16  ;;  %5073 = vmatprep.subr.mxu0 %v7230_v0 }
 0x2f8   :  { %5096 = vmatprep.subr.mxu1 %v7230_v0  ;;  %5074 = vmatpush3.msra.mxu0 %v6286_v15 }
 0x2f9   :  { %5097 = vmatpush3.msra.mxu1 %v6306_v6  ;;  %5075 = vmatprep.subr.mxu0 %v7230_v0 }
 0x2fa   :  { %5098 = vmatprep.subr.mxu1 %v7230_v0  ;;  %5076 = vmatpush3.msra.mxu0 %v6298_v17 }
 0x2fb   :  { %5099 = vmatpush3.msra.mxu1 %v6320_v7  ;;  %5077 = vmatprep.subr.mxu0 %v7230_v0 }
 0x2fc   :  { %5100 = vmatprep.subr.mxu1 %v7230_v0  ;;  %5078 = vmatpush3.msra.mxu0 %v6312_v18 }
 0x2fd   :  { %5101 = vmatpush3.msra.mxu1 %v6334_v9  ;;  %5079 = vmatprep.subr.mxu0 %v7230_v0 }
 0x2fe   :  { %5102 = vmatprep.subr.mxu1 %v7230_v0  ;;  %5080 = vmatpush3.msra.mxu0 %v6326_v19 }
 0x2ff   :  { %5103 = vmatpush3.msra.mxu1 %v6343_v20  ;;  %5081 = vmatprep.subr.mxu0 %v7230_v0 }
 0x300   :  { %5104 = vmatprep.subr.mxu1 %v7230_v0  ;;  %5082 = vmatpush3.msra.mxu0 %v6358_v25 }
 0x301   :  { %5105 = vmatpush3.msra.mxu1 %v6363_v26  ;;  %5083 = vmatprep.subr.mxu0 %v7230_v0 }
 0x302   :  { %5106 = vmatprep.mubr.msk.f32.mxu1 %vm5710_vm2, %v7230_v0  ;;  %2443 = vmatprep.subr.mxu1 %v6098_v30 }
 0x303   :  { %5084 = vmatpush3.msra.mxu0 %v6368_v27  ;;  %5087 = vmatprep.mubr.msk.f32.mxu0 %vm5710_vm2, %v7230_v0 }
 0x304   :  { %5085 = vmatprep.subr.mxu0 %v7230_v0 }
 0x305   :  { %5086 = vmatpush3.msra.mxu0 %v6384_v61 }
 0x306   :  { %2331 = vmatprep.subr.mxu0 %v6094_v29 }
 0x3a0   :  { %v1934_v2 = vpop.f32.mrf.mxu1 }
 0x3a1   :  { %1939 = vst.msk [vmem:[#allocation5 + $0xe] sm:$0x3] %vm1863_vm4, %v1934_v2  ;;  %v1940_v2 = vld [vmem:[#allocation2 + $0x4] sm:$0xf] }
 0x3a2   :  { %v5070_v8 = vpop.f32.mrf.mxu1 }
 0x3a4   :  { %v1859_v62 = vpop.f32.mrf.mxu0 }
 0x3a5   :  { %1864 = vst.msk [vmem:[#allocation4] sm:$0x3] %vm1863_vm4, %v1859_v62 }
 0x3a6   :  { %v5051_v24 = vpop.f32.mrf.mxu0 }
 0x3b0   :  { %v2119_v63 = vpop.f32.mrf.mxu1 }
 0x3b2   :  { %v2121_v1 = vpop.f32.mrf.mxu1 }
 0x3b3   :  { %v2126_v3 = vcombine.low %v2119_v63, %v2121_v1 }
 0x3b4   :  { %v2007_v4 = vpop.f32.mrf.mxu0 }
 0x3b5   :  { %v2133_v10 = vrot.slane %v2126_v3, %v6252_v5 }
 0x3b6   :  { %v2009_v11 = vpop.f32.mrf.mxu0 }
 0x3b7   :  { %v2014_v22 = vcombine.low %v2007_v4, %v2009_v11  ;;  %v2135_v0 = vadd.f32 %v2133_v10, %v2052_v21 }
 0x3b9   :  { %v2021_v29 = vrot.slane %v2014_v22, %v6252_v5  ;;  %2143 = vrot.lane.b32.xlu0 %v2135_v0, %s5709_s2  ;;  %v4842_v62 = vmul.f32 -1.442695, %v2135_v0 }
 0x3bb   :  { %v2023_v8 = vadd.f32 %v2021_v29, %v1940_v2  ;;  %5376 = vpow2.f32 %v4842_v62 }
 0x3bd   :  { %2031 = vrot.lane.b32.xlu1 %v2023_v8, %s5709_s2  ;;  %v4840_v24 = vmul.f32 -1.442695, %v2023_v8 }
 0x3bf   :  { %5378 = vpow2.f32 %v4840_v24 }
 0x3c8   :  { %v5377_v63 = vpop.eup %5376 }
 0x3c9   :  { %v2139_v1 = vadd.f32 1.0, %v5377_v63 }
 0x3cb   :  { %5380 = vrcp.f32 %v2139_v1 }
 0x3cc   :  { %v5379_v61 = vpop.eup %5378 }
 0x3cd   :  { %v2027_v4 = vadd.f32 1.0, %v5379_v61 }
 0x3d8   :  { %v5381_v21 = vpop.eup %5380 }
 0x3d9   :  { %v2148_v62 = vmul.f32 %v5381_v21, %v6351_v23 }
 0x42b   :  { %v2144_v3 = vpop.permute.xlu0 %2143 }
 0x42c   :  { %v2145_v27 = vrot.slane %v2144_v3, 2 }
 0x42e   :  { %5382 = vtanh.f32 %v2145_v27 }
 0x42f   :  { %v2032_v10 = vpop.permute.xlu1 %2031  ;;  %5384 = vrcp.f32 %v2027_v4 }
 0x430   :  { %v2033_v11 = vrot.slane %v2032_v10, 2  ;;  %v2157_v10 = vrot.slane %v5381_v21, 2 }
 0x432   :  { %5386 = vtanh.f32 %v2033_v11 }
 0x43b   :  { %v5383_v29 = vpop.eup %5382 }
 0x43c   :  { %v2149_v22 = vmul.f32 %v5383_v29, %v5381_v21  ;;  %v5385_v2 = vpop.eup %5384 }
 0x43d   :  { %v2036_v27 = vmul.f32 %v5385_v2, %v6370_v28  ;;  %v2045_v29 = vrot.slane %v5385_v2, 2 }
 0x43e   :  { %2151 = vrot.lane.b32.xlu0 %v2149_v22, %s5709_s2  ;;  %v7246_v22 = vmov 0.0  }
 0x43f   :  { %v5387_v0 = vpop.eup %5386 }
 0x440   :  { %v2037_v8 = vmul.f32 %v5387_v0, %v5385_v2 }
 0x442   :  { %2039 = vrot.lane.b32.xlu1 %v2037_v8, %s5709_s2 }
 0x4b0   :  { %v2152_v24 = vpop.permute.xlu0 %2151 }
 0x4b1   :  { %v6477_v63 = vadd.f32 %v2152_v24, %v2148_v62 }
 0x4b3   :  { %5388 = vtanh.f32 %v6477_v63 }
 0x4b4   :  { %v2040_v61 = vpop.permute.xlu1 %2039 }
 0x4b5   :  { %v6481_v1 = vadd.f32 %v2040_v61, %v2036_v27 }
 0x4b7   :  { %5390 = vtanh.f32 %v6481_v1 }
 0x4c0   :  { %v5389_v3 = vpop.eup %5388 }
 0x4c1   :  { %2160 = vrot.lane.b32.xlu0 %v5389_v3, %s5709_s2 }
 0x4c4   :  { %v5391_v4 = vpop.eup %5390 }
 0x4c5   :  { %2048 = vrot.lane.b32.xlu1 %v5391_v4, %s5709_s2 }
 0x533   :  { %v2161_v23 = vpop.permute.xlu0 %2160 }
 0x534   :  { %v2163_v11 = vmul.f32 %v2161_v23, %v2157_v10 }
 0x536   :  { %5107 = vmatmul.mubr.msk.f32.vlgmr.msra.gmra.mxu1 %vm1563_vm3, %v2163_v11 }
 0x537   :  { %2444 = vmatpush1.msra.mxu1 %v6104_v32  ;;  %v2049_v28 = vpop.permute.xlu1 %2048  ;;  %2491 = vmatprep.mubr.f32.mxu1 %v7246_v22  ;;  %v7248_v32 = vld [vmem:[#allocation18_spill] sm:$0xff] }
 0x538   :  { %2445 = vmatprep.subr.mxu1 %v6110_v34  ;;  %v2051_v0 = vmul.f32 %v2049_v28, %v2045_v29 }
 0x539   :  { %2446 = vmatpush1.msra.mxu1 %v6116_v36 }
 0x53a   :  { %2447 = vmatprep.subr.mxu1 %v6122_v38  ;;  %5088 = vmatmul.mubr.msk.f32.vlgmr.msra.gmra.mxu0 %vm1563_vm3, %v2051_v0 }
 0x53b   :  { %2332 = vmatpush1.msra.mxu0 %v6102_v31  ;;  %2448 = vmatpush1.msra.mxu1 %v6128_v40  ;;  %v7247_v31 = vld [vmem:[#allocation17_spill] sm:$0xff] }
 0x53c   :  { %2333 = vmatprep.subr.mxu0 %v6108_v33  ;;  %2449 = vmatprep.subr.mxu1 %v6134_v42  ;;  %v7249_v33 = vld [vmem:[#allocation16_spill] sm:$0xff] }
 0x53d   :  { %2334 = vmatpush1.msra.mxu0 %v6114_v35  ;;  %2450 = vmatpush1.msra.mxu1 %v6140_v44 }
 0x53e   :  { %2335 = vmatprep.subr.mxu0 %v6120_v37  ;;  %2451 = vmatprep.subr.mxu1 %v6146_v46 }
 0x53f   :  { %2336 = vmatpush1.msra.mxu0 %v6126_v39  ;;  %2452 = vmatpush1.msra.mxu1 %v6152_v48 }
 0x540   :  { %2337 = vmatprep.subr.mxu0 %v6132_v41  ;;  %2453 = vmatprep.subr.mxu1 %v6158_v50 }
 0x541   :  { %2338 = vmatpush1.msra.mxu0 %v6138_v43  ;;  %2454 = vmatpush1.msra.mxu1 %v6164_v52  ;;  %v2426_v43 = vld [vmem:[#allocation3 + $0x14] sm:$0xf] }
 0x542   :  { %2339 = vmatprep.subr.mxu0 %v6144_v45  ;;  %2455 = vmatprep.subr.mxu1 %v6170_v54 }
 0x543   :  { %2340 = vmatpush1.msra.mxu0 %v6150_v47  ;;  %2456 = vmatpush1.msra.mxu1 %v6176_v56  ;;  %v2314_v47 = vld [vmem:[#allocation2 + $0x8] sm:$0xf] }
 0x544   :  { %2341 = vmatprep.subr.mxu0 %v6156_v49  ;;  %2457 = vmatprep.subr.mxu1 %v6182_v58 }
 0x545   :  { %2342 = vmatpush1.msra.mxu0 %v6162_v51  ;;  %2458 = vmatpush1.msra.mxu1 %v6190_v60 }
 0x546   :  { %2343 = vmatprep.subr.mxu0 %v6168_v53  ;;  %4847 = vmatmul.mubr.msk.f32.vlgmr.msra.gmra.mxu1 %vm1563_vm3, %v2163_v11 }
 0x547   :  { %2344 = vmatpush1.msra.mxu0 %v6174_v55  ;;  %2379 = vmatprep.mubr.f32.mxu0 %v7246_v22 }
 0x548   :  { %2345 = vmatprep.subr.mxu0 %v6180_v57  ;;  %5128 = vmatprep.subr.mxu1 %v7246_v22 }
 0x549   :  { %2346 = vmatpush1.msra.mxu0 %v6186_v59  ;;  %5129 = vmatpush3.msra.mxu1 %v6269_v12 }
 0x54a   :  { %4845 = vmatmul.mubr.msk.f32.vlgmr.msra.gmra.mxu0 %vm1563_vm3, %v2051_v0  ;;  %5130 = vmatprep.subr.mxu1 %v7246_v22 }
 0x54b   :  { %5131 = vmatpush3.msra.mxu1 %v6274_v13  ;;  %5109 = vmatprep.subr.mxu0 %v7246_v22 }
 0x54c   :  { %5132 = vmatprep.subr.mxu1 %v7246_v22  ;;  %5110 = vmatpush3.msra.mxu0 %v6279_v14 }
 0x54d   :  { %5133 = vmatpush3.msra.mxu1 %v6292_v16  ;;  %5111 = vmatprep.subr.mxu0 %v7246_v22 }
 0x54e   :  { %5134 = vmatprep.subr.mxu1 %v7246_v22  ;;  %5112 = vmatpush3.msra.mxu0 %v6286_v15 }
 0x54f   :  { %5135 = vmatpush3.msra.mxu1 %v6306_v6  ;;  %5113 = vmatprep.subr.mxu0 %v7246_v22 }
 0x550   :  { %5136 = vmatprep.subr.mxu1 %v7246_v22  ;;  %5114 = vmatpush3.msra.mxu0 %v6298_v17 }
 0x551   :  { %5137 = vmatpush3.msra.mxu1 %v6320_v7  ;;  %5115 = vmatprep.subr.mxu0 %v7246_v22 }
 0x552   :  { %5138 = vmatprep.subr.mxu1 %v7246_v22  ;;  %5116 = vmatpush3.msra.mxu0 %v6312_v18 }
 0x553   :  { %5139 = vmatpush3.msra.mxu1 %v6334_v9  ;;  %5117 = vmatprep.subr.mxu0 %v7246_v22 }
 0x554   :  { %5140 = vmatprep.subr.mxu1 %v7246_v22  ;;  %5118 = vmatpush3.msra.mxu0 %v6326_v19 }
 0x555   :  { %5141 = vmatpush3.msra.mxu1 %v6343_v20  ;;  %5119 = vmatprep.subr.mxu0 %v7246_v22 }
 0x556   :  { %5142 = vmatprep.subr.mxu1 %v7246_v22  ;;  %5120 = vmatpush3.msra.mxu0 %v6358_v25 }
 0x557   :  { %5143 = vmatpush3.msra.mxu1 %v6363_v26  ;;  %5121 = vmatprep.subr.mxu0 %v7246_v22 }
 0x558   :  { %5144 = vmatprep.mubr.msk.f32.mxu1 %vm5710_vm2, %v7246_v22  ;;  %2817 = vmatprep.subr.mxu1 %v6098_v30 }
 0x559   :  { %5122 = vmatpush3.msra.mxu0 %v7247_v31  ;;  %5125 = vmatprep.mubr.msk.f32.mxu0 %vm5710_vm2, %v7246_v22 }
 0x55a   :  { %5123 = vmatprep.subr.mxu0 %v7246_v22 }
 0x55b   :  { %5124 = vmatpush3.msra.mxu0 %v7248_v32 }
 0x55c   :  { %2705 = vmatprep.subr.mxu0 %v7249_v33  ;;  %v6579_v33 = vld [vmem:[#allocation11 + $0x70] sm:$0xff] }
 0x5f6   :  { %v2308_v34 = vpop.f32.mrf.mxu1 }
 0x5f7   :  { %2313 = vst.msk [vmem:[#allocation5 + $0xc] sm:$0x3] %vm1863_vm4, %v2308_v34  ;;  %v6583_v34 = vld [vmem:[#allocation11 + $0x68] sm:$0xff] }
 0x5f8   :  { %v5108_v35 = vpop.f32.mrf.mxu1 }
 0x5fa   :  { %v2233_v36 = vpop.f32.mrf.mxu0 }
 0x5fb   :  { %2238 = vst.msk [vmem:[#allocation4 + $0x2] sm:$0x3] %vm1863_vm4, %v2233_v36  ;;  %v6586_v36 = vld [vmem:[#allocation11 + $0x60] sm:$0xff] }
 0x5fc   :  { %v5089_v37 = vpop.f32.mrf.mxu0 }
 0x5fd   :  { %v6589_v37 = vld [vmem:[#allocation11 + $0x58] sm:$0xff] }
 0x606   :  { %v2493_v30 = vpop.f32.mrf.mxu1 }
 0x608   :  { %v2495_v38 = vpop.f32.mrf.mxu1 }
 0x609   :  { %v2500_v39 = vcombine.low %v2493_v30, %v2495_v38  ;;  %v6593_v30 = vld [vmem:[#allocation9 + $0x70] sm:$0xff] }
 0x60a   :  { %v2381_v40 = vpop.f32.mrf.mxu0  ;;  %v6596_v38 = vld [vmem:[#allocation11 + $0x50] sm:$0xff] }
 0x60b   :  { %v2507_v41 = vrot.slane %v2500_v39, %v6252_v5  ;;  %v6599_v39 = vld [vmem:[#allocation9 + $0x68] sm:$0xff] }
 0x60c   :  { %v2383_v42 = vpop.f32.mrf.mxu0 }
 0x60d   :  { %v2388_v44 = vcombine.low %v2381_v40, %v2383_v42  ;;  %v2509_v45 = vadd.f32 %v2507_v41, %v2426_v43  ;;  %v6602_v40 = vld [vmem:[#allocation11 + $0x48] sm:$0xff]  ;;  %v6605_v41 = vld [vmem:[#allocation9 + $0x60] sm:$0xff]  ;;  %v6611_v43 = vld [vmem:[#allocation9 + $0x58] sm:$0xff] }
 0x60e   :  { %v6608_v42 = vld [vmem:[#allocation11 + $0x40] sm:$0xff] }
 0x60f   :  { %v2395_v46 = vrot.slane %v2388_v44, %v6252_v5  ;;  %2517 = vrot.lane.b32.xlu0 %v2509_v45, %s5709_s2  ;;  %v4848_v49 = vmul.f32 -1.442695, %v2509_v45  ;;  %v6614_v44 = vld [vmem:[#allocation11 + $0x38] sm:$0xff]  ;;  %v6617_v45 = vld [vmem:[#allocation9 + $0x50] sm:$0xff] }
 0x611   :  { %v2397_v48 = vadd.f32 %v2395_v46, %v2314_v47  ;;  %5392 = vpow2.f32 %v4848_v49  ;;  %v6620_v46 = vld [vmem:[#allocation11 + $0x30] sm:$0xff]  ;;  %v6623_v47 = vld [vmem:[#allocation9 + $0x48] sm:$0xff]  ;;  %v6629_v49 = vld [vmem:[#allocation9 + $0x40] sm:$0xff] }
 0x613   :  { %2405 = vrot.lane.b32.xlu1 %v2397_v48, %s5709_s2  ;;  %v4846_v50 = vmul.f32 -1.442695, %v2397_v48  ;;  %v6626_v48 = vld [vmem:[#allocation11 + $0x28] sm:$0xff] }
 0x615   :  { %5394 = vpow2.f32 %v4846_v50  ;;  %v6632_v50 = vld [vmem:[#allocation11 + $0x20] sm:$0xff] }
 0x61e   :  { %v5393_v51 = vpop.eup %5392 }
 0x61f   :  { %v2513_v52 = vadd.f32 1.0, %v5393_v51  ;;  %v6635_v51 = vld [vmem:[#allocation9 + $0x38] sm:$0xff] }
 0x621   :  { %5396 = vrcp.f32 %v2513_v52  ;;  %v6638_v52 = vld [vmem:[#allocation11 + $0x18] sm:$0xff] }
 0x622   :  { %v5395_v53 = vpop.eup %5394 }
 0x623   :  { %v2401_v56 = vadd.f32 1.0, %v5395_v53  ;;  %v6641_v53 = vld [vmem:[#allocation9 + $0x30] sm:$0xff] }
 0x62e   :  { %v5397_v59 = vpop.eup %5396 }
 0x62f   :  { %v2522_v24 = vmul.f32 %v5397_v59, %v6477_v63  ;;  %v2531_v29 = vrot.slane %v5397_v59, 2 }
 0x681   :  { %v2518_v54 = vpop.permute.xlu0 %2517 }
 0x682   :  { %v2519_v55 = vrot.slane %v2518_v54, 2  ;;  %v6644_v54 = vld [vmem:[#allocation11 + $0x10] sm:$0xff] }
 0x684   :  { %5398 = vtanh.f32 %v2519_v55  ;;  %v6647_v55 = vld [vmem:[#allocation9 + $0x28] sm:$0xff] }
 0x685   :  { %v2406_v57 = vpop.permute.xlu1 %2405  ;;  %5400 = vrcp.f32 %v2401_v56  ;;  %v6650_v56 = vld [vmem:[#allocation11 + $0x8] sm:$0xff] }
 0x686   :  { %v2407_v58 = vrot.slane %v2406_v57, 2  ;;  %v6653_v57 = vld [vmem:[#allocation9 + $0x20] sm:$0xff] }
 0x688   :  { %5402 = vtanh.f32 %v2407_v58  ;;  %v6656_v58 = vld [vmem:[#allocation11] sm:$0xff] }
 0x691   :  { %v5399_v60 = vpop.eup %5398 }
 0x692   :  { %v2523_v21 = vmul.f32 %v5399_v60, %v5397_v59  ;;  %v5401_v2 = vpop.eup %5400  ;;  %v6659_v59 = vld [vmem:[#allocation9 + $0x18] sm:$0xff]  ;;  %v6663_v60 = vld [vmem:[#allocation9 + $0x10] sm:$0xff] }
 0x693   :  { %v2410_v3 = vmul.f32 %v5401_v2, %v6481_v1  ;;  %v2419_v0 = vrot.slane %v5401_v2, 2 }
 0x694   :  { %2525 = vrot.lane.b32.xlu0 %v2523_v21, %s5709_s2  ;;  %v6667_v21 = vld [vmem:[#allocation9 + $0x8] sm:$0xff] }
 0x695   :  { %v5403_v8 = vpop.eup %5402 }
 0x696   :  { %v2411_v62 = vmul.f32 %v5403_v8, %v5401_v2  ;;  %v6671_v2 = vld [vmem:[#allocation9] sm:$0xff] }
 0x698   :  { %2413 = vrot.lane.b32.xlu1 %v2411_v62, %s5709_s2 }
 0x706   :  { %v2526_v27 = vpop.permute.xlu0 %2525 }
 0x707   :  { %v6569_v61 = vadd.f32 %v2526_v27, %v2522_v24 }
 0x709   :  { %5404 = vtanh.f32 %v6569_v61 }
 0x70a   :  { %v2414_v4 = vpop.permute.xlu1 %2413 }
 0x70b   :  { %v6573_v10 = vadd.f32 %v2414_v4, %v2410_v3 }
 0x70d   :  { %5406 = vtanh.f32 %v6573_v10 }
 0x716   :  { %v5405_v23 = vpop.eup %5404 }
 0x717   :  { %2534 = vrot.lane.b32.xlu0 %v5405_v23, %s5709_s2 }
 0x71a   :  { %v5407_v11 = vpop.eup %5406 }
 0x71b   :  { %2422 = vrot.lane.b32.xlu1 %v5407_v11, %s5709_s2 }
 0x789   :  { %v2535_v63 = vpop.permute.xlu0 %2534 }
 0x78a   :  { %v2537_v28 = vmul.f32 %v2535_v63, %v2531_v29  ;;  %v2800_v29 = vld [vmem:[#allocation3 + $0x10] sm:$0xf] }
 0x78c   :  { %5145 = vmatmul.mubr.msk.f32.vlgmr.msra.gmra.mxu1 %vm1563_vm3, %v2537_v28 }
 0x78d   :  { %2818 = vmatpush1.msra.mxu1 %v6579_v33  ;;  %v2423_v1 = vpop.permute.xlu1 %2422  ;;  %2865 = vmatprep.mubr.f32.mxu1 %v7246_v22 }
 0x78e   :  { %2819 = vmatprep.subr.mxu1 %v6583_v34  ;;  %v2425_v35 = vmul.f32 %v2423_v1, %v2419_v0  ;;  %v2688_v1 = vld [vmem:[#allocation2 + $0xc] sm:$0xf] }
 0x78f   :  { %2820 = vmatpush1.msra.mxu1 %v6586_v36 }
 0x790   :  { %2821 = vmatprep.subr.mxu1 %v6589_v37  ;;  %5126 = vmatmul.mubr.msk.f32.vlgmr.msra.gmra.mxu0 %vm1563_vm3, %v2425_v35 }
 0x791   :  { %2706 = vmatpush1.msra.mxu0 %v6593_v30  ;;  %2822 = vmatpush1.msra.mxu1 %v6596_v38 }
 0x792   :  { %2707 = vmatprep.subr.mxu0 %v6599_v39  ;;  %2823 = vmatprep.subr.mxu1 %v6602_v40 }
 0x793   :  { %2708 = vmatpush1.msra.mxu0 %v6605_v41  ;;  %2824 = vmatpush1.msra.mxu1 %v6608_v42 }
 0x794   :  { %2709 = vmatprep.subr.mxu0 %v6611_v43  ;;  %2825 = vmatprep.subr.mxu1 %v6614_v44 }
 0x795   :  { %2710 = vmatpush1.msra.mxu0 %v6617_v45  ;;  %2826 = vmatpush1.msra.mxu1 %v6620_v46 }
 0x796   :  { %2711 = vmatprep.subr.mxu0 %v6623_v47  ;;  %2827 = vmatprep.subr.mxu1 %v6626_v48 }
 0x797   :  { %2712 = vmatpush1.msra.mxu0 %v6629_v49  ;;  %2828 = vmatpush1.msra.mxu1 %v6632_v50 }
 0x798   :  { %2713 = vmatprep.subr.mxu0 %v6635_v51  ;;  %2829 = vmatprep.subr.mxu1 %v6638_v52 }
 0x799   :  { %2714 = vmatpush1.msra.mxu0 %v6641_v53  ;;  %2830 = vmatpush1.msra.mxu1 %v6644_v54 }
 0x79a   :  { %2715 = vmatprep.subr.mxu0 %v6647_v55  ;;  %2831 = vmatprep.subr.mxu1 %v6650_v56 }
 0x79b   :  { %2716 = vmatpush1.msra.mxu0 %v6653_v57  ;;  %2832 = vmatpush1.msra.mxu1 %v6656_v58 }
 0x79c   :  { %2717 = vmatprep.subr.mxu0 %v6659_v59  ;;  %4853 = vmatmul.mubr.msk.f32.vlgmr.msra.gmra.mxu1 %vm1563_vm3, %v2537_v28 }
 0x79d   :  { %2718 = vmatpush1.msra.mxu0 %v6663_v60  ;;  %2753 = vmatprep.mubr.f32.mxu0 %v7246_v22 }
 0x79e   :  { %2719 = vmatprep.subr.mxu0 %v6667_v21  ;;  %5166 = vmatprep.subr.mxu1 %v7246_v22 }
 0x79f   :  { %2720 = vmatpush1.msra.mxu0 %v6671_v2  ;;  %5167 = vmatpush3.msra.mxu1 %v6269_v12 }
 0x7a0   :  { %4851 = vmatmul.mubr.msk.f32.vlgmr.msra.gmra.mxu0 %vm1563_vm3, %v2425_v35  ;;  %5168 = vmatprep.subr.mxu1 %v7246_v22 }
 0x7a1   :  { %5169 = vmatpush3.msra.mxu1 %v6274_v13  ;;  %5147 = vmatprep.subr.mxu0 %v7246_v22 }
 0x7a2   :  { %5170 = vmatprep.subr.mxu1 %v7246_v22  ;;  %5148 = vmatpush3.msra.mxu0 %v6279_v14  ;;  %v6705_v14 = vld [vmem:[#allocation11 + $0x78] sm:$0xff] }
 0x7a3   :  { %5171 = vmatpush3.msra.mxu1 %v6292_v16  ;;  %5149 = vmatprep.subr.mxu0 %v7246_v22  ;;  %7250 = vst [vmem:[#allocation17_spill] sm:$0xff] %v6705_v14 }
 0x7a4   :  { %5172 = vmatprep.subr.mxu1 %v7246_v22  ;;  %5150 = vmatpush3.msra.mxu0 %v6286_v15  ;;  %v6713_v15 = vld [vmem:[#allocation9 + $0x78] sm:$0xff] }
 0x7a5   :  { %5173 = vmatpush3.msra.mxu1 %v6306_v6  ;;  %5151 = vmatprep.subr.mxu0 %v7246_v22  ;;  %7251 = vst [vmem:[#allocation18_spill] sm:$0xff] %v6713_v15 }
 0x7a6   :  { %5174 = vmatprep.subr.mxu1 %v7246_v22  ;;  %5152 = vmatpush3.msra.mxu0 %v6298_v17 }
 0x7a7   :  { %5175 = vmatpush3.msra.mxu1 %v6320_v7  ;;  %5153 = vmatprep.subr.mxu0 %v7246_v22 }
 0x7a8   :  { %5176 = vmatprep.subr.mxu1 %v7246_v22  ;;  %5154 = vmatpush3.msra.mxu0 %v6312_v18 }
 0x7a9   :  { %5177 = vmatpush3.msra.mxu1 %v6334_v9  ;;  %5155 = vmatprep.subr.mxu0 %v7246_v22 }
 0x7aa   :  { %5178 = vmatprep.subr.mxu1 %v7246_v22  ;;  %5156 = vmatpush3.msra.mxu0 %v6326_v19 }
 0x7ab   :  { %5179 = vmatpush3.msra.mxu1 %v6343_v20  ;;  %5157 = vmatprep.subr.mxu0 %v7246_v22 }
 0x7ac   :  { %5180 = vmatprep.subr.mxu1 %v7246_v22  ;;  %5158 = vmatpush3.msra.mxu0 %v6358_v25 }
 0x7ad   :  { %5181 = vmatpush3.msra.mxu1 %v6363_v26  ;;  %5159 = vmatprep.subr.mxu0 %v7246_v22 }
 0x7ae   :  { %5182 = vmatprep.mubr.msk.f32.mxu1 %vm5710_vm2, %v7246_v22  ;;  %3191 = vmatprep.subr.mxu1 %v6705_v14 }
 0x7af   :  { %5160 = vmatpush3.msra.mxu0 %v7247_v31  ;;  %5163 = vmatprep.mubr.msk.f32.mxu0 %vm5710_vm2, %v7246_v22 }
 0x7b0   :  { %5161 = vmatprep.subr.mxu0 %v7246_v22 }
 0x7b1   :  { %5162 = vmatpush3.msra.mxu0 %v7248_v32 }
 0x7b2   :  { %3079 = vmatprep.subr.mxu0 %v6713_v15 }
 0x84c   :  { %v2682_v17 = vpop.f32.mrf.mxu1 }
 0x84d   :  { %2687 = vst.msk [vmem:[#allocation5 + $0xa] sm:$0x3] %vm1863_vm4, %v2682_v17 }
 0x84e   :  { %v5146_v18 = vpop.f32.mrf.mxu1 }
 0x850   :  { %v2607_v8 = vpop.f32.mrf.mxu0 }
 0x851   :  { %2612 = vst.msk [vmem:[#allocation4 + $0x4] sm:$0x3] %vm1863_vm4, %v2607_v8 }
 0x852   :  { %v5127_v62 = vpop.f32.mrf.mxu0 }
 0x85c   :  { %v2867_v24 = vpop.f32.mrf.mxu1 }
 0x85e   :  { %v2869_v27 = vpop.f32.mrf.mxu1 }
 0x85f   :  { %v2874_v3 = vcombine.low %v2867_v24, %v2869_v27 }
 0x860   :  { %v2755_v4 = vpop.f32.mrf.mxu0 }
 0x861   :  { %v2881_v23 = vrot.slane %v2874_v3, %v6252_v5 }
 0x862   :  { %v2757_v11 = vpop.f32.mrf.mxu0 }
 0x863   :  { %v2762_v63 = vcombine.low %v2755_v4, %v2757_v11  ;;  %v2883_v28 = vadd.f32 %v2881_v23, %v2800_v29 }
 0x865   :  { %v2769_v0 = vrot.slane %v2762_v63, %v6252_v5  ;;  %2891 = vrot.lane.b32.xlu0 %v2883_v28, %s5709_s2  ;;  %v4854_v17 = vmul.f32 -1.442695, %v2883_v28 }
 0x867   :  { %v2771_v35 = vadd.f32 %v2769_v0, %v2688_v1  ;;  %5408 = vpow2.f32 %v4854_v17 }
 0x869   :  { %2779 = vrot.lane.b32.xlu1 %v2771_v35, %s5709_s2  ;;  %v4852_v18 = vmul.f32 -1.442695, %v2771_v35 }
 0x86b   :  { %5410 = vpow2.f32 %v4852_v18 }
 0x874   :  { %v5409_v8 = vpop.eup %5408 }
 0x875   :  { %v2887_v62 = vadd.f32 1.0, %v5409_v8 }
 0x877   :  { %5412 = vrcp.f32 %v2887_v62 }
 0x878   :  { %v5411_v24 = vpop.eup %5410 }
 0x879   :  { %v2775_v4 = vadd.f32 1.0, %v5411_v24 }
 0x884   :  { %v5413_v29 = vpop.eup %5412 }
 0x885   :  { %v2896_v17 = vmul.f32 %v5413_v29, %v6569_v61 }
 0x8d7   :  { %v2892_v27 = vpop.permute.xlu0 %2891 }
 0x8d8   :  { %v2893_v3 = vrot.slane %v2892_v27, 2 }
 0x8da   :  { %5414 = vtanh.f32 %v2893_v3 }
 0x8db   :  { %v2780_v23 = vpop.permute.xlu1 %2779  ;;  %5416 = vrcp.f32 %v2775_v4 }
 0x8dc   :  { %v2781_v11 = vrot.slane %v2780_v23, 2  ;;  %v2905_v23 = vrot.slane %v5413_v29, 2 }
 0x8de   :  { %5418 = vtanh.f32 %v2781_v11 }
 0x8e7   :  { %v5415_v63 = vpop.eup %5414 }
 0x8e8   :  { %v2897_v0 = vmul.f32 %v5415_v63, %v5413_v29  ;;  %v5417_v1 = vpop.eup %5416  ;;  %v6779_v29 = vld [vmem:[%s7224_s5 + $0x38] sm:$0xff] }
 0x8e9   :  { %v2784_v62 = vmul.f32 %v5417_v1, %v6573_v10  ;;  %v2793_v63 = vrot.slane %v5417_v1, 2 }
 0x8ea   :  { %2899 = vrot.lane.b32.xlu0 %v2897_v0, %s5709_s2 }
 0x8eb   :  { %v5419_v28 = vpop.eup %5418 }
 0x8ec   :  { %v2785_v35 = vmul.f32 %v5419_v28, %v5417_v1 }
 0x8ee   :  { %2787 = vrot.lane.b32.xlu1 %v2785_v35, %s5709_s2  ;;  %v3174_v35 = vld [vmem:[#allocation3 + $0xc] sm:$0xf] }
 0x95c   :  { %v2900_v18 = vpop.permute.xlu0 %2899 }
 0x95d   :  { %v6725_v8 = vadd.f32 %v2900_v18, %v2896_v17 }
 0x95f   :  { %5420 = vtanh.f32 %v6725_v8 }
 0x960   :  { %v2788_v24 = vpop.permute.xlu1 %2787 }
 0x961   :  { %v6729_v27 = vadd.f32 %v2788_v24, %v2784_v62  ;;  %v3062_v62 = vld [vmem:[#allocation2 + $0x10] sm:$0xf] }
 0x963   :  { %5422 = vtanh.f32 %v6729_v27 }
 0x96c   :  { %v5421_v3 = vpop.eup %5420 }
 0x96d   :  { %2908 = vrot.lane.b32.xlu0 %v5421_v3, %s5709_s2 }
 0x970   :  { %v5423_v4 = vpop.eup %5422 }
 0x971   :  { %2796 = vrot.lane.b32.xlu1 %v5423_v4, %s5709_s2 }
 0x9df   :  { %v2909_v61 = vpop.permute.xlu0 %2908 }
 0x9e0   :  { %v2911_v11 = vmul.f32 %v2909_v61, %v2905_v23 }
 0x9e2   :  { %5183 = vmatmul.mubr.msk.f32.vlgmr.msra.gmra.mxu1 %vm1563_vm3, %v2911_v11 }
 0x9e3   :  { %3192 = vmatpush1.msra.mxu1 %v6579_v33  ;;  %v2797_v10 = vpop.permute.xlu1 %2796  ;;  %3239 = vmatprep.mubr.f32.mxu1 %v7246_v22 }
 0x9e4   :  { %3193 = vmatprep.subr.mxu1 %v6583_v34  ;;  %v2799_v0 = vmul.f32 %v2797_v10, %v2793_v63 }
 0x9e5   :  { %3194 = vmatpush1.msra.mxu1 %v6586_v36 }
 0x9e6   :  { %3195 = vmatprep.subr.mxu1 %v6589_v37  ;;  %5164 = vmatmul.mubr.msk.f32.vlgmr.msra.gmra.mxu0 %vm1563_vm3, %v2799_v0 }
 0x9e7   :  { %3080 = vmatpush1.msra.mxu0 %v6593_v30  ;;  %3196 = vmatpush1.msra.mxu1 %v6596_v38 }
 0x9e8   :  { %3081 = vmatprep.subr.mxu0 %v6599_v39  ;;  %3197 = vmatprep.subr.mxu1 %v6602_v40 }
 0x9e9   :  { %3082 = vmatpush1.msra.mxu0 %v6605_v41  ;;  %3198 = vmatpush1.msra.mxu1 %v6608_v42 }
 0x9ea   :  { %3083 = vmatprep.subr.mxu0 %v6611_v43  ;;  %3199 = vmatprep.subr.mxu1 %v6614_v44 }
 0x9eb   :  { %3084 = vmatpush1.msra.mxu0 %v6617_v45  ;;  %3200 = vmatpush1.msra.mxu1 %v6620_v46 }
 0x9ec   :  { %3085 = vmatprep.subr.mxu0 %v6623_v47  ;;  %3201 = vmatprep.subr.mxu1 %v6626_v48 }
 0x9ed   :  { %3086 = vmatpush1.msra.mxu0 %v6629_v49  ;;  %3202 = vmatpush1.msra.mxu1 %v6632_v50 }
 0x9ee   :  { %3087 = vmatprep.subr.mxu0 %v6635_v51  ;;  %3203 = vmatprep.subr.mxu1 %v6638_v52 }
 0x9ef   :  { %3088 = vmatpush1.msra.mxu0 %v6641_v53  ;;  %3204 = vmatpush1.msra.mxu1 %v6644_v54 }
 0x9f0   :  { %3089 = vmatprep.subr.mxu0 %v6647_v55  ;;  %3205 = vmatprep.subr.mxu1 %v6650_v56 }
 0x9f1   :  { %3090 = vmatpush1.msra.mxu0 %v6653_v57  ;;  %3206 = vmatpush1.msra.mxu1 %v6656_v58 }
 0x9f2   :  { %3091 = vmatprep.subr.mxu0 %v6659_v59  ;;  %4859 = vmatmul.mubr.msk.f32.vlgmr.msra.gmra.mxu1 %vm1563_vm3, %v2911_v11 }
 0x9f3   :  { %3092 = vmatpush1.msra.mxu0 %v6663_v60  ;;  %3127 = vmatprep.mubr.f32.mxu0 %v7246_v22 }
 0x9f4   :  { %3093 = vmatprep.subr.mxu0 %v6667_v21  ;;  %5204 = vmatprep.subr.mxu1 %v7246_v22 }
 0x9f5   :  { %3094 = vmatpush1.msra.mxu0 %v6671_v2  ;;  %5205 = vmatpush3.msra.mxu1 %v6269_v12  ;;  %v6788_v12 = vld [vmem:[%s7224_s5 + $0x30] sm:$0xff] }
 0x9f6   :  { %4857 = vmatmul.mubr.msk.f32.vlgmr.msra.gmra.mxu0 %vm1563_vm3, %v2799_v0  ;;  %5206 = vmatprep.subr.mxu1 %v7246_v22 }
 0x9f7   :  { %5207 = vmatpush3.msra.mxu1 %v6274_v13  ;;  %5185 = vmatprep.subr.mxu0 %v7246_v22  ;;  %v6797_v13 = vld [vmem:[%s7224_s5 + $0x28] sm:$0xff] }
 0x9f8   :  { %5208 = vmatprep.subr.mxu1 %v7246_v22  ;;  %5186 = vmatpush3.msra.mxu0 %v6779_v29 }
 0x9f9   :  { %5209 = vmatpush3.msra.mxu1 %v6292_v16  ;;  %5187 = vmatprep.subr.mxu0 %v7246_v22  ;;  %v6806_v16 = vld [vmem:[%s7224_s5 + $0x20] sm:$0xff] }
 0x9fa   :  { %5210 = vmatprep.subr.mxu1 %v7246_v22  ;;  %5188 = vmatpush3.msra.mxu0 %v6788_v12 }
 0x9fb   :  { %5211 = vmatpush3.msra.mxu1 %v6306_v6  ;;  %5189 = vmatprep.subr.mxu0 %v7246_v22 }
 0x9fc   :  { %5212 = vmatprep.subr.mxu1 %v7246_v22  ;;  %5190 = vmatpush3.msra.mxu0 %v6797_v13 }
 0x9fd   :  { %5213 = vmatpush3.msra.mxu1 %v6320_v7  ;;  %5191 = vmatprep.subr.mxu0 %v7246_v22 }
 0x9fe   :  { %5214 = vmatprep.subr.mxu1 %v7246_v22  ;;  %5192 = vmatpush3.msra.mxu0 %v6806_v16 }
 0x9ff   :  { %5215 = vmatpush3.msra.mxu1 %v6334_v9  ;;  %5193 = vmatprep.subr.mxu0 %v7246_v22 }
 0xa00   :  { %5216 = vmatprep.subr.mxu1 %v7246_v22  ;;  %5194 = vmatpush3.msra.mxu0 %v6326_v19 }
 0xa01   :  { %5217 = vmatpush3.msra.mxu1 %v6343_v20  ;;  %5195 = vmatprep.subr.mxu0 %v7246_v22 }
 0xa02   :  { %5218 = vmatprep.subr.mxu1 %v7246_v22  ;;  %5196 = vmatpush3.msra.mxu0 %v6358_v25 }
 0xa03   :  { %5219 = vmatpush3.msra.mxu1 %v6363_v26  ;;  %5197 = vmatprep.subr.mxu0 %v7246_v22 }
 0xa04   :  { %5220 = vmatprep.mubr.msk.f32.mxu1 %vm5710_vm2, %v7246_v22  ;;  %3565 = vmatprep.subr.mxu1 %v6705_v14 }
 0xa05   :  { %5198 = vmatpush3.msra.mxu0 %v7247_v31  ;;  %5201 = vmatprep.mubr.msk.f32.mxu0 %vm5710_vm2, %v7246_v22 }
 0xa06   :  { %5199 = vmatprep.subr.mxu0 %v7246_v22 }
 0xa07   :  { %5200 = vmatpush3.msra.mxu0 %v7248_v32 }
 0xa08   :  { %3453 = vmatprep.subr.mxu0 %v6713_v15 }
 0xaa2   :  { %v3056_v6 = vpop.f32.mrf.mxu1 }
 0xaa3   :  { %3061 = vst.msk [vmem:[#allocation5 + $0x8] sm:$0x3] %vm1863_vm4, %v3056_v6 }
 0xaa4   :  { %v5184_v7 = vpop.f32.mrf.mxu1 }
 0xaa6   :  { %v2981_v19 = vpop.f32.mrf.mxu0 }
 0xaa7   :  { %2986 = vst.msk [vmem:[#allocation4 + $0x6] sm:$0x3] %vm1863_vm4, %v2981_v19 }
 0xaa8   :  { %v5165_v9 = vpop.f32.mrf.mxu0 }
 0xab2   :  { %v3241_v20 = vpop.f32.mrf.mxu1 }
 0xab4   :  { %v3243_v25 = vpop.f32.mrf.mxu1 }
 0xab5   :  { %v3248_v26 = vcombine.low %v3241_v20, %v3243_v25 }
 0xab6   :  { %v3129_v31 = vpop.f32.mrf.mxu0 }
 0xab7   :  { %v3255_v1 = vrot.slane %v3248_v26, %v6252_v5 }
 0xab8   :  { %v3131_v28 = vpop.f32.mrf.mxu0 }
 0xab9   :  { %v3136_v17 = vcombine.low %v3129_v31, %v3131_v28  ;;  %v3257_v32 = vadd.f32 %v3255_v1, %v3174_v35 }
 0xabb   :  { %v3143_v18 = vrot.slane %v3136_v17, %v6252_v5  ;;  %3265 = vrot.lane.b32.xlu0 %v3257_v32, %s5709_s2  ;;  %v4860_v3 = vmul.f32 -1.442695, %v3257_v32 }
 0xabd   :  { %v3145_v24 = vadd.f32 %v3143_v18, %v3062_v62  ;;  %5424 = vpow2.f32 %v4860_v3 }
 0xabf   :  { %3153 = vrot.lane.b32.xlu1 %v3145_v24, %s5709_s2  ;;  %v4858_v4 = vmul.f32 -1.442695, %v3145_v24 }
 0xac1   :  { %5426 = vpow2.f32 %v4858_v4 }
 0xaca   :  { %v5425_v23 = vpop.eup %5424 }
 0xacb   :  { %v3261_v61 = vadd.f32 1.0, %v5425_v23 }
 0xacd   :  { %5428 = vrcp.f32 %v3261_v61 }
 0xace   :  { %v5427_v11 = vpop.eup %5426 }
 0xacf   :  { %v3149_v0 = vadd.f32 1.0, %v5427_v11  ;;  %v6885_v11 = vld [vmem:[%s7225_s6 + $0x38] sm:$0xff] }
 0xada   :  { %v5429_v19 = vpop.eup %5428 }
 0xadb   :  { %v3270_v1 = vmul.f32 %v5429_v19, %v6725_v8  ;;  %v3279_v3 = vrot.slane %v5429_v19, 2 }
 0xb2d   :  { %v3266_v63 = vpop.permute.xlu0 %3265 }
 0xb2e   :  { %v3267_v10 = vrot.slane %v3266_v63, 2  ;;  %v6893_v63 = vld [vmem:[%s7225_s6 + $0x30] sm:$0xff] }
 0xb30   :  { %5430 = vtanh.f32 %v3267_v10  ;;  %v6902_v10 = vld [vmem:[%s7225_s6 + $0x28] sm:$0xff] }
 0xb31   :  { %v3154_v6 = vpop.permute.xlu1 %3153  ;;  %5432 = vrcp.f32 %v3149_v0  ;;  %v6911_v0 = vld [vmem:[%s7225_s6 + $0x20] sm:$0xff] }
 0xb32   :  { %v3155_v7 = vrot.slane %v3154_v6, 2  ;;  %v6920_v6 = vld [vmem:[%s7225_s6 + $0x18] sm:$0xff] }
 0xb34   :  { %5434 = vtanh.f32 %v3155_v7  ;;  %v6929_v7 = vld [vmem:[%s7225_s6 + $0x10] sm:$0xff] }
 0xb3d   :  { %v5431_v9 = vpop.eup %5430 }
 0xb3e   :  { %v3271_v20 = vmul.f32 %v5431_v9, %v5429_v19  ;;  %v5433_v25 = vpop.eup %5432  ;;  %v6937_v19 = vld [vmem:[%s7224_s5 + $0x18] sm:$0xff]  ;;  %v6943_v9 = vld [vmem:[%s7225_s6 + $0x8] sm:$0xff] }
 0xb3f   :  { %v3158_v17 = vmul.f32 %v5433_v25, %v6729_v27  ;;  %v3167_v23 = vrot.slane %v5433_v25, 2 }
 0xb40   :  { %3273 = vrot.lane.b32.xlu0 %v3271_v20, %s5709_s2  ;;  %v6951_v20 = vld [vmem:[%s7224_s5 + $0x10] sm:$0xff] }
 0xb41   :  { %v5435_v26 = vpop.eup %5434 }
 0xb42   :  { %v3159_v31 = vmul.f32 %v5435_v26, %v5433_v25  ;;  %v6957_v25 = vld [vmem:[%s7225_s6] sm:$0xff]  ;;  %v6967_v26 = vld [vmem:[%s7224_s5 + $0x8] sm:$0xff] }
 0xb43   :  { %7252 = vst [vmem:[#allocation16_spill] sm:$0xff] %v6967_v26 }
 0xb44   :  { %3161 = vrot.lane.b32.xlu1 %v3159_v31, %s5709_s2  ;;  %v6976_v31 = vld [vmem:[%s7224_s5] sm:$0xff] }
 0xb45   :  { %7253 = vst [vmem:[#allocation19_spill] sm:$0xff] %v6976_v31 }
 0xbb2   :  { %v3274_v28 = vpop.permute.xlu0 %3273 }
 0xbb3   :  { %v6837_v35 = vadd.f32 %v3274_v28, %v3270_v1 }
 0xbb5   :  { %5436 = vtanh.f32 %v6837_v35 }
 0xbb6   :  { %v3162_v32 = vpop.permute.xlu1 %3161 }
 0xbb7   :  { %v6841_v18 = vadd.f32 %v3162_v32, %v3158_v17 }
 0xbb9   :  { %5438 = vtanh.f32 %v6841_v18 }
 0xbc2   :  { %v5437_v62 = vpop.eup %5436 }
 0xbc3   :  { %3282 = vrot.lane.b32.xlu0 %v5437_v62, %s5709_s2 }
 0xbc6   :  { %v5439_v24 = vpop.eup %5438 }
 0xbc7   :  { %3170 = vrot.lane.b32.xlu1 %v5439_v24, %s5709_s2 }
 0xc35   :  { %v3283_v8 = vpop.permute.xlu0 %3282 }
 0xc36   :  { %v3285_v4 = vmul.f32 %v3283_v8, %v3279_v3 }
 0xc38   :  { %5221 = vmatmul.mubr.msk.f32.vlgmr.msra.gmra.mxu1 %vm1563_vm3, %v3285_v4 }
 0xc39   :  { %3566 = vmatpush1.msra.mxu1 %v6579_v33  ;;  %v3171_v27 = vpop.permute.xlu1 %3170  ;;  %3613 = vmatprep.mubr.f32.mxu1 %v7246_v22 }
 0xc3a   :  { %3567 = vmatprep.subr.mxu1 %v6583_v34  ;;  %v3173_v61 = vmul.f32 %v3171_v27, %v3167_v23  ;;  %v3548_v27 = vld [vmem:[#allocation3 + $0x8] sm:$0xf] }
 0xc3b   :  { %3568 = vmatpush1.msra.mxu1 %v6586_v36 }
 0xc3c   :  { %3569 = vmatprep.subr.mxu1 %v6589_v37  ;;  %5202 = vmatmul.mubr.msk.f32.vlgmr.msra.gmra.mxu0 %vm1563_vm3, %v3173_v61 }
 0xc3d   :  { %3454 = vmatpush1.msra.mxu0 %v6593_v30  ;;  %3570 = vmatpush1.msra.mxu1 %v6596_v38 }
 0xc3e   :  { %3455 = vmatprep.subr.mxu0 %v6599_v39  ;;  %3571 = vmatprep.subr.mxu1 %v6602_v40 }
 0xc3f   :  { %3456 = vmatpush1.msra.mxu0 %v6605_v41  ;;  %3572 = vmatpush1.msra.mxu1 %v6608_v42 }
 0xc40   :  { %3457 = vmatprep.subr.mxu0 %v6611_v43  ;;  %3573 = vmatprep.subr.mxu1 %v6614_v44 }
 0xc41   :  { %3458 = vmatpush1.msra.mxu0 %v6617_v45  ;;  %3574 = vmatpush1.msra.mxu1 %v6620_v46 }
 0xc42   :  { %3459 = vmatprep.subr.mxu0 %v6623_v47  ;;  %3575 = vmatprep.subr.mxu1 %v6626_v48 }
 0xc43   :  { %3460 = vmatpush1.msra.mxu0 %v6629_v49  ;;  %3576 = vmatpush1.msra.mxu1 %v6632_v50 }
 0xc44   :  { %3461 = vmatprep.subr.mxu0 %v6635_v51  ;;  %3577 = vmatprep.subr.mxu1 %v6638_v52 }
 0xc45   :  { %3462 = vmatpush1.msra.mxu0 %v6641_v53  ;;  %3578 = vmatpush1.msra.mxu1 %v6644_v54 }
 0xc46   :  { %3463 = vmatprep.subr.mxu0 %v6647_v55  ;;  %3579 = vmatprep.subr.mxu1 %v6650_v56 }
 0xc47   :  { %3464 = vmatpush1.msra.mxu0 %v6653_v57  ;;  %3580 = vmatpush1.msra.mxu1 %v6656_v58 }
 0xc48   :  { %3465 = vmatprep.subr.mxu0 %v6659_v59  ;;  %4865 = vmatmul.mubr.msk.f32.vlgmr.msra.gmra.mxu1 %vm1563_vm3, %v3285_v4 }
 0xc49   :  { %3466 = vmatpush1.msra.mxu0 %v6663_v60  ;;  %3501 = vmatprep.mubr.f32.mxu0 %v7246_v22 }
 0xc4a   :  { %3467 = vmatprep.subr.mxu0 %v6667_v21  ;;  %5242 = vmatprep.subr.mxu1 %v7246_v22 }
 0xc4b   :  { %3468 = vmatpush1.msra.mxu0 %v6671_v2  ;;  %5243 = vmatpush3.msra.mxu1 %v6885_v11 }
 0xc4c   :  { %4863 = vmatmul.mubr.msk.f32.vlgmr.msra.gmra.mxu0 %vm1563_vm3, %v3173_v61  ;;  %5244 = vmatprep.subr.mxu1 %v7246_v22 }
 0xc4d   :  { %5245 = vmatpush3.msra.mxu1 %v6893_v63  ;;  %5223 = vmatprep.subr.mxu0 %v7246_v22 }
 0xc4e   :  { %5246 = vmatprep.subr.mxu1 %v7246_v22  ;;  %5224 = vmatpush3.msra.mxu0 %v6779_v29 }
 0xc4f   :  { %5247 = vmatpush3.msra.mxu1 %v6902_v10  ;;  %5225 = vmatprep.subr.mxu0 %v7246_v22 }
 0xc50   :  { %5248 = vmatprep.subr.mxu1 %v7246_v22  ;;  %5226 = vmatpush3.msra.mxu0 %v6788_v12 }
 0xc51   :  { %5249 = vmatpush3.msra.mxu1 %v6911_v0  ;;  %5227 = vmatprep.subr.mxu0 %v7246_v22 }
 0xc52   :  { %5250 = vmatprep.subr.mxu1 %v7246_v22  ;;  %5228 = vmatpush3.msra.mxu0 %v6797_v13 }
 0xc53   :  { %5251 = vmatpush3.msra.mxu1 %v6920_v6  ;;  %5229 = vmatprep.subr.mxu0 %v7246_v22 }
 0xc54   :  { %5252 = vmatprep.subr.mxu1 %v7246_v22  ;;  %5230 = vmatpush3.msra.mxu0 %v6806_v16 }
 0xc55   :  { %5253 = vmatpush3.msra.mxu1 %v6929_v7  ;;  %5231 = vmatprep.subr.mxu0 %v7246_v22 }
 0xc56   :  { %5254 = vmatprep.subr.mxu1 %v7246_v22  ;;  %5232 = vmatpush3.msra.mxu0 %v6937_v19 }
 0xc57   :  { %5255 = vmatpush3.msra.mxu1 %v6943_v9  ;;  %5233 = vmatprep.subr.mxu0 %v7246_v22 }
 0xc58   :  { %5256 = vmatprep.subr.mxu1 %v7246_v22  ;;  %5234 = vmatpush3.msra.mxu0 %v6951_v20 }
 0xc59   :  { %5257 = vmatpush3.msra.mxu1 %v6957_v25  ;;  %5235 = vmatprep.subr.mxu0 %v7246_v22 }
 0xc5a   :  { %5258 = vmatprep.mubr.msk.f32.mxu1 %vm5710_vm2, %v7246_v22  ;;  %3939 = vmatprep.subr.mxu1 %v6705_v14 }
 0xc5b   :  { %5236 = vmatpush3.msra.mxu0 %v6967_v26  ;;  %5239 = vmatprep.mubr.msk.f32.mxu0 %vm5710_vm2, %v7246_v22 }
 0xc5c   :  { %5237 = vmatprep.subr.mxu0 %v7246_v22 }
 0xc5d   :  { %5238 = vmatpush3.msra.mxu0 %v6976_v31 }
 0xc5e   :  { %3827 = vmatprep.subr.mxu0 %v6713_v15 }
 0xcf8   :  { %v3430_v1 = vpop.f32.mrf.mxu1 }
 0xcf9   :  { %3435 = vst.msk [vmem:[#allocation5 + $0x6] sm:$0x3] %vm1863_vm4, %v3430_v1  ;;  %v3436_v1 = vld [vmem:[#allocation2 + $0x14] sm:$0xf] }
 0xcfa   :  { %v5222_v28 = vpop.f32.mrf.mxu1 }
 0xcfc   :  { %v3355_v17 = vpop.f32.mrf.mxu0 }
 0xcfd   :  { %3360 = vst.msk [vmem:[#allocation4 + $0x8] sm:$0x3] %vm1863_vm4, %v3355_v17 }
 0xcfe   :  { %v5203_v32 = vpop.f32.mrf.mxu0 }
 0xd08   :  { %v3615_v62 = vpop.f32.mrf.mxu1 }
 0xd0a   :  { %v3617_v24 = vpop.f32.mrf.mxu1 }
 0xd0b   :  { %v3622_v3 = vcombine.low %v3615_v62, %v3617_v24 }
 0xd0c   :  { %v3503_v8 = vpop.f32.mrf.mxu0 }
 0xd0d   :  { %v3629_v4 = vrot.slane %v3622_v3, %v6252_v5 }
 0xd0e   :  { %v3505_v23 = vpop.f32.mrf.mxu0 }
 0xd0f   :  { %v3510_v61 = vcombine.low %v3503_v8, %v3505_v23  ;;  %v3631_v31 = vadd.f32 %v3629_v4, %v3548_v27 }
 0xd11   :  { %v3517_v15 = vrot.slane %v3510_v61, %v6252_v5  ;;  %3639 = vrot.lane.b32.xlu0 %v3631_v31, %s5709_s2  ;;  %v4866_v17 = vmul.f32 -1.442695, %v3631_v31 }
 0xd13   :  { %v3519_v28 = vadd.f32 %v3517_v15, %v3436_v1  ;;  %5440 = vpow2.f32 %v4866_v17 }
 0xd15   :  { %3527 = vrot.lane.b32.xlu1 %v3519_v28, %s5709_s2  ;;  %v4864_v32 = vmul.f32 -1.442695, %v3519_v28 }
 0xd17   :  { %5442 = vpow2.f32 %v4864_v32 }
 0xd20   :  { %v5441_v62 = vpop.eup %5440 }
 0xd21   :  { %v3635_v24 = vadd.f32 1.0, %v5441_v62 }
 0xd23   :  { %5444 = vrcp.f32 %v3635_v24 }
 0xd24   :  { %v5443_v26 = vpop.eup %5442 }
 0xd25   :  { %v3523_v8 = vadd.f32 1.0, %v5443_v26 }
 0xd30   :  { %v5445_v27 = vpop.eup %5444 }
 0xd31   :  { %v3644_v17 = vmul.f32 %v5445_v27, %v6837_v35 }
 0xd83   :  { %v3640_v3 = vpop.permute.xlu0 %3639 }
 0xd84   :  { %v3641_v14 = vrot.slane %v3640_v3, 2 }
 0xd86   :  { %5446 = vtanh.f32 %v3641_v14 }
 0xd87   :  { %v3528_v4 = vpop.permute.xlu1 %3527  ;;  %5448 = vrcp.f32 %v3523_v8 }
 0xd88   :  { %v3529_v23 = vrot.slane %v3528_v4, 2  ;;  %v3653_v4 = vrot.slane %v5445_v27, 2 }
 0xd8a   :  { %5450 = vtanh.f32 %v3529_v23 }
 0xd93   :  { %v5447_v15 = vpop.eup %5446 }
 0xd94   :  { %v3645_v61 = vmul.f32 %v5447_v15, %v5445_v27  ;;  %v5449_v1 = vpop.eup %5448 }
 0xd95   :  { %v3532_v14 = vmul.f32 %v5449_v1, %v6841_v18  ;;  %v3541_v15 = vrot.slane %v5449_v1, 2 }
 0xd96   :  { %3647 = vrot.lane.b32.xlu0 %v3645_v61, %s5709_s2 }
 0xd97   :  { %v5451_v31 = vpop.eup %5450 }
 0xd98   :  { %v3533_v28 = vmul.f32 %v5451_v31, %v5449_v1 }
 0xd9a   :  { %3535 = vrot.lane.b32.xlu1 %v3533_v28, %s5709_s2 }
 0xe08   :  { %v3648_v32 = vpop.permute.xlu0 %3647 }
 0xe09   :  { %v6989_v62 = vadd.f32 %v3648_v32, %v3644_v17 }
 0xe0b   :  { %5452 = vtanh.f32 %v6989_v62 }
 0xe0c   :  { %v3536_v26 = vpop.permute.xlu1 %3535 }
 0xe0d   :  { %v6993_v24 = vadd.f32 %v3536_v26, %v3532_v14 }
 0xe0f   :  { %5454 = vtanh.f32 %v6993_v24 }
 0xe18   :  { %v5453_v3 = vpop.eup %5452 }
 0xe19   :  { %3656 = vrot.lane.b32.xlu0 %v5453_v3, %s5709_s2 }
 0xe1c   :  { %v5455_v8 = vpop.eup %5454 }
 0xe1d   :  { %3544 = vrot.lane.b32.xlu1 %v5455_v8, %s5709_s2 }
 0xe8b   :  { %v3657_v35 = vpop.permute.xlu0 %3656 }
 0xe8c   :  { %v3659_v23 = vmul.f32 %v3657_v35, %v3653_v4 }
 0xe8e   :  { %5259 = vmatmul.mubr.msk.f32.vlgmr.msra.gmra.mxu1 %vm1563_vm3, %v3659_v23 }
 0xe8f   :  { %3940 = vmatpush1.msra.mxu1 %v6579_v33  ;;  %v3545_v18 = vpop.permute.xlu1 %3544  ;;  %3987 = vmatprep.mubr.f32.mxu1 %v7246_v22  ;;  %v7254_v33 = vld [vmem:[#allocation17_spill] sm:$0xff] }
 0xe90   :  { %3941 = vmatprep.subr.mxu1 %v6583_v34  ;;  %v3547_v61 = vmul.f32 %v3545_v18, %v3541_v15  ;;  %v7255_v34 = vld [vmem:[#allocation16_spill] sm:$0xff] }
 0xe91   :  { %3942 = vmatpush1.msra.mxu1 %v6586_v36  ;;  %v7256_v36 = vld [vmem:[#allocation19_spill] sm:$0xff] }
 0xe92   :  { %3943 = vmatprep.subr.mxu1 %v6589_v37  ;;  %5240 = vmatmul.mubr.msk.f32.vlgmr.msra.gmra.mxu0 %vm1563_vm3, %v3547_v61  ;;  %v7257_v37 = vld [vmem:[#allocation18_spill] sm:$0xff] }
 0xe93   :  { %3828 = vmatpush1.msra.mxu0 %v6593_v30  ;;  %3944 = vmatpush1.msra.mxu1 %v6596_v38 }
 0xe94   :  { %3829 = vmatprep.subr.mxu0 %v6599_v39  ;;  %3945 = vmatprep.subr.mxu1 %v6602_v40 }
 0xe95   :  { %3830 = vmatpush1.msra.mxu0 %v6605_v41  ;;  %3946 = vmatpush1.msra.mxu1 %v6608_v42 }
 0xe96   :  { %3831 = vmatprep.subr.mxu0 %v6611_v43  ;;  %3947 = vmatprep.subr.mxu1 %v6614_v44 }
 0xe97   :  { %3832 = vmatpush1.msra.mxu0 %v6617_v45  ;;  %3948 = vmatpush1.msra.mxu1 %v6620_v46 }
 0xe98   :  { %3833 = vmatprep.subr.mxu0 %v6623_v47  ;;  %3949 = vmatprep.subr.mxu1 %v6626_v48  ;;  %v3922_v47 = vld [vmem:[#allocation3 + $0x4] sm:$0xf] }
 0xe99   :  { %3834 = vmatpush1.msra.mxu0 %v6629_v49  ;;  %3950 = vmatpush1.msra.mxu1 %v6632_v50 }
 0xe9a   :  { %3835 = vmatprep.subr.mxu0 %v6635_v51  ;;  %3951 = vmatprep.subr.mxu1 %v6638_v52  ;;  %v3810_v51 = vld [vmem:[#allocation2 + $0x18] sm:$0xf] }
 0xe9b   :  { %3836 = vmatpush1.msra.mxu0 %v6641_v53  ;;  %3952 = vmatpush1.msra.mxu1 %v6644_v54 }
 0xe9c   :  { %3837 = vmatprep.subr.mxu0 %v6647_v55  ;;  %3953 = vmatprep.subr.mxu1 %v6650_v56 }
 0xe9d   :  { %3838 = vmatpush1.msra.mxu0 %v6653_v57  ;;  %3954 = vmatpush1.msra.mxu1 %v6656_v58 }
 0xe9e   :  { %3839 = vmatprep.subr.mxu0 %v6659_v59  ;;  %4871 = vmatmul.mubr.msk.f32.vlgmr.msra.gmra.mxu1 %vm1563_vm3, %v3659_v23 }
 0xe9f   :  { %3840 = vmatpush1.msra.mxu0 %v6663_v60  ;;  %3875 = vmatprep.mubr.f32.mxu0 %v7246_v22 }
 0xea0   :  { %3841 = vmatprep.subr.mxu0 %v6667_v21  ;;  %5280 = vmatprep.subr.mxu1 %v7246_v22 }
 0xea1   :  { %3842 = vmatpush1.msra.mxu0 %v6671_v2  ;;  %5281 = vmatpush3.msra.mxu1 %v6885_v11 }
 0xea2   :  { %4869 = vmatmul.mubr.msk.f32.vlgmr.msra.gmra.mxu0 %vm1563_vm3, %v3547_v61  ;;  %5282 = vmatprep.subr.mxu1 %v7246_v22 }
 0xea3   :  { %5283 = vmatpush3.msra.mxu1 %v6893_v63  ;;  %5261 = vmatprep.subr.mxu0 %v7246_v22 }
 0xea4   :  { %5284 = vmatprep.subr.mxu1 %v7246_v22  ;;  %5262 = vmatpush3.msra.mxu0 %v6779_v29 }
 0xea5   :  { %5285 = vmatpush3.msra.mxu1 %v6902_v10  ;;  %5263 = vmatprep.subr.mxu0 %v7246_v22 }
 0xea6   :  { %5286 = vmatprep.subr.mxu1 %v7246_v22  ;;  %5264 = vmatpush3.msra.mxu0 %v6788_v12 }
 0xea7   :  { %5287 = vmatpush3.msra.mxu1 %v6911_v0  ;;  %5265 = vmatprep.subr.mxu0 %v7246_v22 }
 0xea8   :  { %5288 = vmatprep.subr.mxu1 %v7246_v22  ;;  %5266 = vmatpush3.msra.mxu0 %v6797_v13 }
 0xea9   :  { %5289 = vmatpush3.msra.mxu1 %v6920_v6  ;;  %5267 = vmatprep.subr.mxu0 %v7246_v22 }
 0xeaa   :  { %5290 = vmatprep.subr.mxu1 %v7246_v22  ;;  %5268 = vmatpush3.msra.mxu0 %v6806_v16 }
 0xeab   :  { %5291 = vmatpush3.msra.mxu1 %v6929_v7  ;;  %5269 = vmatprep.subr.mxu0 %v7246_v22 }
 0xeac   :  { %5292 = vmatprep.subr.mxu1 %v7246_v22  ;;  %5270 = vmatpush3.msra.mxu0 %v6937_v19 }
 0xead   :  { %5293 = vmatpush3.msra.mxu1 %v6943_v9  ;;  %5271 = vmatprep.subr.mxu0 %v7246_v22 }
 0xeae   :  { %5294 = vmatprep.subr.mxu1 %v7246_v22  ;;  %5272 = vmatpush3.msra.mxu0 %v6951_v20 }
 0xeaf   :  { %5295 = vmatpush3.msra.mxu1 %v6957_v25  ;;  %5273 = vmatprep.subr.mxu0 %v7246_v22 }
 0xeb0   :  { %5296 = vmatprep.mubr.msk.f32.mxu1 %vm5710_vm2, %v7246_v22  ;;  %4313 = vmatprep.subr.mxu1 %v7254_v33 }
 0xeb1   :  { %5274 = vmatpush3.msra.mxu0 %v7255_v34  ;;  %5277 = vmatprep.mubr.msk.f32.mxu0 %vm5710_vm2, %v7246_v22 }
 0xeb2   :  { %5275 = vmatprep.subr.mxu0 %v7246_v22 }
 0xeb3   :  { %5276 = vmatpush3.msra.mxu0 %v7256_v36 }
 0xeb4   :  { %4201 = vmatprep.subr.mxu0 %v7257_v37  ;;  %v5584_v37 = vld [vmem:[#allocation11 + $0x70] sm:$0xff] }
 0xf4e   :  { %v3804_v30 = vpop.f32.mrf.mxu1 }
 0xf4f   :  { %3809 = vst.msk [vmem:[#allocation5 + $0x4] sm:$0x3] %vm1863_vm4, %v3804_v30  ;;  %v5585_v30 = vld [vmem:[#allocation11 + $0x68] sm:$0xff] }
 0xf50   :  { %v5260_v38 = vpop.f32.mrf.mxu1 }
 0xf52   :  { %v3729_v39 = vpop.f32.mrf.mxu0 }
 0xf53   :  { %3734 = vst.msk [vmem:[#allocation4 + $0xa] sm:$0x3] %vm1863_vm4, %v3729_v39  ;;  %v5586_v39 = vld [vmem:[#allocation11 + $0x60] sm:$0xff] }
 0xf54   :  { %v5241_v40 = vpop.f32.mrf.mxu0 }
 0xf55   :  { %v5587_v40 = vld [vmem:[#allocation11 + $0x58] sm:$0xff] }
 0xf5e   :  { %v3989_v41 = vpop.f32.mrf.mxu1 }
 0xf60   :  { %v3991_v42 = vpop.f32.mrf.mxu1 }
 0xf61   :  { %v3996_v43 = vcombine.low %v3989_v41, %v3991_v42  ;;  %v5588_v41 = vld [vmem:[#allocation9 + $0x70] sm:$0xff] }
 0xf62   :  { %v3877_v44 = vpop.f32.mrf.mxu0  ;;  %v5589_v42 = vld [vmem:[#allocation11 + $0x50] sm:$0xff] }
 0xf63   :  { %v4003_v45 = vrot.slane %v3996_v43, %v6252_v5  ;;  %v5590_v43 = vld [vmem:[#allocation9 + $0x68] sm:$0xff] }
 0xf64   :  { %v3879_v46 = vpop.f32.mrf.mxu0 }
 0xf65   :  { %v3884_v48 = vcombine.low %v3877_v44, %v3879_v46  ;;  %v4005_v49 = vadd.f32 %v4003_v45, %v3922_v47  ;;  %v5591_v44 = vld [vmem:[#allocation11 + $0x48] sm:$0xff]  ;;  %v5592_v45 = vld [vmem:[#allocation9 + $0x60] sm:$0xff]  ;;  %v5594_v47 = vld [vmem:[#allocation9 + $0x58] sm:$0xff] }
 0xf66   :  { %v5593_v46 = vld [vmem:[#allocation11 + $0x40] sm:$0xff] }
 0xf67   :  { %v3891_v50 = vrot.slane %v3884_v48, %v6252_v5  ;;  %4013 = vrot.lane.b32.xlu0 %v4005_v49, %s5709_s2  ;;  %v4872_v53 = vmul.f32 -1.442695, %v4005_v49  ;;  %v5595_v48 = vld [vmem:[#allocation11 + $0x38] sm:$0xff]  ;;  %v5596_v49 = vld [vmem:[#allocation9 + $0x50] sm:$0xff] }
 0xf69   :  { %v3893_v52 = vadd.f32 %v3891_v50, %v3810_v51  ;;  %5456 = vpow2.f32 %v4872_v53  ;;  %v5597_v50 = vld [vmem:[#allocation11 + $0x30] sm:$0xff]  ;;  %v5598_v51 = vld [vmem:[#allocation9 + $0x48] sm:$0xff]  ;;  %v5600_v53 = vld [vmem:[#allocation9 + $0x40] sm:$0xff] }
 0xf6b   :  { %3901 = vrot.lane.b32.xlu1 %v3893_v52, %s5709_s2  ;;  %v4870_v54 = vmul.f32 -1.442695, %v3893_v52  ;;  %v5599_v52 = vld [vmem:[#allocation11 + $0x28] sm:$0xff] }
 0xf6d   :  { %5458 = vpow2.f32 %v4870_v54  ;;  %v5601_v54 = vld [vmem:[#allocation11 + $0x20] sm:$0xff] }
 0xf76   :  { %v5457_v55 = vpop.eup %5456 }
 0xf77   :  { %v4009_v56 = vadd.f32 1.0, %v5457_v55  ;;  %v5602_v55 = vld [vmem:[#allocation9 + $0x38] sm:$0xff] }
 0xf79   :  { %5460 = vrcp.f32 %v4009_v56  ;;  %v5603_v56 = vld [vmem:[#allocation11 + $0x18] sm:$0xff] }
 0xf7a   :  { %v5459_v57 = vpop.eup %5458 }
 0xf7b   :  { %v3897_v60 = vadd.f32 1.0, %v5459_v57  ;;  %v5604_v57 = vld [vmem:[#allocation9 + $0x30] sm:$0xff] }
 0xf86   :  { %v5461_v27 = vpop.eup %5460 }
 0xf87   :  { %v4018_v14 = vmul.f32 %v5461_v27, %v6989_v62  ;;  %v4027_v18 = vrot.slane %v5461_v27, 2 }
 0xfd9   :  { %v4014_v58 = vpop.permute.xlu0 %4013 }
 0xfda   :  { %v4015_v59 = vrot.slane %v4014_v58, 2  ;;  %v5605_v58 = vld [vmem:[#allocation11 + $0x10] sm:$0xff] }
 0xfdc   :  { %5462 = vtanh.f32 %v4015_v59  ;;  %v5606_v59 = vld [vmem:[#allocation9 + $0x28] sm:$0xff] }
 0xfdd   :  { %v3902_v21 = vpop.permute.xlu1 %3901  ;;  %5464 = vrcp.f32 %v3897_v60  ;;  %v5607_v60 = vld [vmem:[#allocation11 + $0x8] sm:$0xff] }
 0xfde   :  { %v3903_v2 = vrot.slane %v3902_v21, 2  ;;  %v5608_v21 = vld [vmem:[#allocation9 + $0x20] sm:$0xff] }
 0xfe0   :  { %5466 = vtanh.f32 %v3903_v2  ;;  %v5609_v2 = vld [vmem:[#allocation11] sm:$0xff] }
 0xfe9   :  { %v5463_v1 = vpop.eup %5462 }
 0xfea   :  { %v4019_v31 = vmul.f32 %v5463_v1, %v5461_v27  ;;  %v5465_v28 = vpop.eup %5464  ;;  %v5610_v27 = vld [vmem:[#allocation9 + $0x18] sm:$0xff]  ;;  %v5611_v1 = vld [vmem:[#allocation9 + $0x10] sm:$0xff] }
 0xfeb   :  { %v3906_v8 = vmul.f32 %v5465_v28, %v6993_v24  ;;  %v3915_v33 = vrot.slane %v5465_v28, 2 }
 0xfec   :  { %4021 = vrot.lane.b32.xlu0 %v4019_v31, %s5709_s2  ;;  %v5612_v31 = vld [vmem:[#allocation9 + $0x8] sm:$0xff] }
 0xfed   :  { %v5467_v17 = vpop.eup %5466 }
 0xfee   :  { %v3907_v32 = vmul.f32 %v5467_v17, %v5465_v28  ;;  %v5613_v28 = vld [vmem:[#allocation9] sm:$0xff] }
 0xff0   :  { %3909 = vrot.lane.b32.xlu1 %v3907_v32, %s5709_s2 }
0x105e   :  { %v4022_v26 = vpop.permute.xlu0 %4021 }
0x105f   :  { %v7081_v3 = vadd.f32 %v4022_v26, %v4018_v14 }
0x1061   :  { %5468 = vtanh.f32 %v7081_v3 }
0x1062   :  { %v3910_v4 = vpop.permute.xlu1 %3909 }
0x1063   :  { %v7085_v35 = vadd.f32 %v3910_v4, %v3906_v8 }
0x1065   :  { %5470 = vtanh.f32 %v7085_v35 }
0x106e   :  { %v5469_v23 = vpop.eup %5468 }
0x106f   :  { %4030 = vrot.lane.b32.xlu0 %v5469_v23, %s5709_s2 }
0x1072   :  { %v5471_v15 = vpop.eup %5470 }
0x1073   :  { %3918 = vrot.lane.b32.xlu1 %v5471_v15, %s5709_s2 }
0x10e1   :  { %v4031_v62 = vpop.permute.xlu0 %4030 }
0x10e2   :  { %v4033_v61 = vmul.f32 %v4031_v62, %v4027_v18 }
0x10e4   :  { %5297 = vmatmul.mubr.msk.f32.vlgmr.msra.gmra.mxu1 %vm1563_vm3, %v4033_v61 }
0x10e5   :  { %4314 = vmatpush1.msra.mxu1 %v5584_v37  ;;  %v3919_v24 = vpop.permute.xlu1 %3918  ;;  %4361 = vmatprep.mubr.f32.mxu1 %v7246_v22 }
0x10e6   :  { %4315 = vmatprep.subr.mxu1 %v5585_v30  ;;  %v3921_v38 = vmul.f32 %v3919_v24, %v3915_v33 }
0x10e7   :  { %4316 = vmatpush1.msra.mxu1 %v5586_v39 }
0x10e8   :  { %4317 = vmatprep.subr.mxu1 %v5587_v40  ;;  %5278 = vmatmul.mubr.msk.f32.vlgmr.msra.gmra.mxu0 %vm1563_vm3, %v3921_v38  ;;  %v4591_v40 = vld [vmem:[#allocation5 + $0x4] sm:$0x3] }
0x10e9   :  { %4202 = vmatpush1.msra.mxu0 %v5588_v41  ;;  %4318 = vmatpush1.msra.mxu1 %v5589_v42  ;;  %v4590_v42 = vld [vmem:[#allocation4 + $0x4] sm:$0x3] }
0x10ea   :  { %4203 = vmatprep.subr.mxu0 %v5590_v43  ;;  %4319 = vmatprep.subr.mxu1 %v5591_v44  ;;  %v4592_v44 = vadd.f32 %v4591_v40, %v4590_v42 }
0x10eb   :  { %4204 = vmatpush1.msra.mxu0 %v5592_v45  ;;  %4320 = vmatpush1.msra.mxu1 %v5593_v46 }
0x10ec   :  { %4205 = vmatprep.subr.mxu0 %v5594_v47  ;;  %4321 = vmatprep.subr.mxu1 %v5595_v48  ;;  %v7154_v47 = vld [vmem:[%s7226_s7] ss:$0 sm:$0xff] }
0x10ed   :  { %4206 = vmatpush1.msra.mxu0 %v5596_v49  ;;  %4322 = vmatpush1.msra.mxu1 %v5597_v50  ;;  %v4593_v48 = vadd.f32 %v7154_v47, %v4592_v44  ;;  %v4577_v49 = vld [vmem:[#allocation4 + $0x2] sm:$0x3] }
0x10ee   :  { %4207 = vmatprep.subr.mxu0 %v5598_v51  ;;  %4323 = vmatprep.subr.mxu1 %v5599_v52  ;;  %v4616_v51 = vld [vmem:[#allocation4 + $0x8] sm:$0x3]  ;;  %v4617_v52 = vld [vmem:[#allocation5 + $0x8] sm:$0x3] }
0x10ef   :  { %4208 = vmatpush1.msra.mxu0 %v5600_v53  ;;  %4324 = vmatpush1.msra.mxu1 %v5601_v54  ;;  %v4618_v54 = vadd.f32 %v4617_v52, %v4616_v51 }
0x10f0   :  { %4209 = vmatprep.subr.mxu0 %v5602_v55  ;;  %4325 = vmatprep.subr.mxu1 %v5603_v56  ;;  %v4643_v56 = vld [vmem:[#allocation5 + $0xc] sm:$0x3] }
0x10f1   :  { %4210 = vmatpush1.msra.mxu0 %v5604_v57  ;;  %4326 = vmatpush1.msra.mxu1 %v5605_v58  ;;  %v4619_v58 = vadd.f32 %v7154_v47, %v4618_v54 }
0x10f2   :  { %4211 = vmatprep.subr.mxu0 %v5606_v59  ;;  %4327 = vmatprep.subr.mxu1 %v5607_v60 }
0x10f3   :  { %4212 = vmatpush1.msra.mxu0 %v5608_v21  ;;  %4328 = vmatpush1.msra.mxu1 %v5609_v2 }
0x10f4   :  { %4213 = vmatprep.subr.mxu0 %v5610_v27  ;;  %4877 = vmatmul.mubr.msk.f32.vlgmr.msra.gmra.mxu1 %vm1563_vm3, %v4033_v61 }
0x10f5   :  { %4214 = vmatpush1.msra.mxu0 %v5611_v1  ;;  %4249 = vmatprep.mubr.f32.mxu0 %v7246_v22 }
0x10f6   :  { %4215 = vmatprep.subr.mxu0 %v5612_v31  ;;  %5318 = vmatprep.subr.mxu1 %v7246_v22 }
0x10f7   :  { %4216 = vmatpush1.msra.mxu0 %v5613_v28  ;;  %5319 = vmatpush3.msra.mxu1 %v6885_v11 }
0x10f8   :  { %4875 = vmatmul.mubr.msk.f32.vlgmr.msra.gmra.mxu0 %vm1563_vm3, %v3921_v38  ;;  %5320 = vmatprep.subr.mxu1 %v7246_v22 }
0x10f9   :  { %5321 = vmatpush3.msra.mxu1 %v6893_v63  ;;  %5299 = vmatprep.subr.mxu0 %v7246_v22 }
0x10fa   :  { %5322 = vmatprep.subr.mxu1 %v7246_v22  ;;  %5300 = vmatpush3.msra.mxu0 %v6779_v29 }
0x10fb   :  { %5323 = vmatpush3.msra.mxu1 %v6902_v10  ;;  %5301 = vmatprep.subr.mxu0 %v7246_v22 }
0x10fc   :  { %5324 = vmatprep.subr.mxu1 %v7246_v22  ;;  %5302 = vmatpush3.msra.mxu0 %v6788_v12 }
0x10fd   :  { %5325 = vmatpush3.msra.mxu1 %v6911_v0  ;;  %5303 = vmatprep.subr.mxu0 %v7246_v22 }
0x10fe   :  { %5326 = vmatprep.subr.mxu1 %v7246_v22  ;;  %5304 = vmatpush3.msra.mxu0 %v6797_v13 }
0x10ff   :  { %5327 = vmatpush3.msra.mxu1 %v6920_v6  ;;  %5305 = vmatprep.subr.mxu0 %v7246_v22 }
0x1100   :  { %5328 = vmatprep.subr.mxu1 %v7246_v22  ;;  %5306 = vmatpush3.msra.mxu0 %v6806_v16 }
0x1101   :  { %5329 = vmatpush3.msra.mxu1 %v6929_v7  ;;  %5307 = vmatprep.subr.mxu0 %v7246_v22 }
0x1102   :  { %5330 = vmatprep.subr.mxu1 %v7246_v22  ;;  %5308 = vmatpush3.msra.mxu0 %v6937_v19  ;;  %v4296_v19 = vld [vmem:[#allocation3] sm:$0xf] }
0x1103   :  { %5331 = vmatpush3.msra.mxu1 %v6943_v9  ;;  %5309 = vmatprep.subr.mxu0 %v7246_v22 }
0x1104   :  { %5332 = vmatprep.subr.mxu1 %v7246_v22  ;;  %5310 = vmatpush3.msra.mxu0 %v6951_v20 }
0x1105   :  { %5333 = vmatpush3.msra.mxu1 %v6957_v25  ;;  %5334 = vmatprep.mubr.msk.f32.mxu1 %vm5710_vm2, %v7246_v22 }
0x1106   :  { %5311 = vmatprep.subr.mxu0 %v7246_v22  ;;  %5315 = vmatprep.mubr.msk.f32.mxu0 %vm5710_vm2, %v7246_v22 }
0x1107   :  { %5312 = vmatpush3.msra.mxu0 %v7255_v34  ;;  %v4184_v34 = vld [vmem:[#allocation2 + $0x1c] sm:$0xf] }
0x1108   :  { %5313 = vmatprep.subr.mxu0 %v7246_v22 }
0x1109   :  { %5314 = vmatpush3.msra.mxu0 %v7256_v36 }
0x110a   :  { %5337 = vmatprep.subr.mxu0 %v7246_v22 }
0x11a4   :  { %v4178_v29 = vpop.f32.mrf.mxu1 }
0x11a5   :  { %4183 = vst.msk [vmem:[#allocation5 + $0x2] sm:$0x3] %vm1863_vm4, %v4178_v29 }
0x11a6   :  { %v5298_v12 = vpop.f32.mrf.mxu1 }
0x11a8   :  { %v4103_v13 = vpop.f32.mrf.mxu0 }
0x11a9   :  { %4108 = vst.msk [vmem:[#allocation4 + $0xc] sm:$0x3] %vm1863_vm4, %v4103_v13 }
0x11aa   :  { %v5279_v16 = vpop.f32.mrf.mxu0 }
0x11b0   :  { %v4642_v55 = vld [vmem:[#allocation4 + $0xc] sm:$0x3] }
0x11b1   :  { %v4644_v59 = vadd.f32 %v4643_v56, %v4642_v55  ;;  %v4671_v56 = vld [vmem:[%s7227_s8 + $0x18] sm:$0xff] }
0x11b3   :  { %v4645_v21 = vadd.f32 %v7154_v47, %v4644_v59  ;;  %v4668_v59 = vld [vmem:[%s7227_s8] sm:$0xff] }
0x11b4   :  { %v4363_v11 = vpop.f32.mrf.mxu1 }
0x11b6   :  { %v4365_v63 = vpop.f32.mrf.mxu1 }
0x11b7   :  { %v4370_v10 = vcombine.low %v4363_v11, %v4365_v63 }
0x11b8   :  { %v4251_v0 = vpop.f32.mrf.mxu0 }
0x11b9   :  { %v4377_v6 = vrot.slane %v4370_v10, %v6252_v5 }
0x11ba   :  { %v4253_v7 = vpop.f32.mrf.mxu0 }
0x11bb   :  { %v4258_v9 = vcombine.low %v4251_v0, %v4253_v7  ;;  %v4379_v20 = vadd.f32 %v4377_v6, %v4296_v19 }
0x11bd   :  { %v4265_v25 = vrot.slane %v4258_v9, %v6252_v5  ;;  %4387 = vrot.lane.b32.xlu0 %v4379_v20, %s5709_s2  ;;  %v4878_v17 = vmul.f32 -1.442695, %v4379_v20 }
0x11bf   :  { %v4267_v36 = vadd.f32 %v4265_v25, %v4184_v34  ;;  %5472 = vpow2.f32 %v4878_v17 }
0x11c1   :  { %4275 = vrot.lane.b32.xlu1 %v4267_v36, %s5709_s2  ;;  %v4876_v32 = vmul.f32 -1.442695, %v4267_v36 }
0x11c3   :  { %5474 = vpow2.f32 %v4876_v32  ;;  %v4604_v32 = vld [vmem:[#allocation5 + $0x6] sm:$0x3] }
0x11cc   :  { %v5473_v14 = vpop.eup %5472 }
0x11cd   :  { %v4383_v26 = vadd.f32 1.0, %v5473_v14 }
0x11cf   :  { %5476 = vrcp.f32 %v4383_v26  ;;  %v4603_v26 = vld [vmem:[#allocation4 + $0x6] sm:$0x3] }
0x11d0   :  { %v5475_v8 = vpop.eup %5474 }
0x11d1   :  { %v4271_v15 = vadd.f32 1.0, %v5475_v8  ;;  %v4605_v8 = vadd.f32 %v4604_v32, %v4603_v26 }
0x11dc   :  { %v7139_v62 = vpop.eup %5476 }
0x11dd   :  { %v4392_v38 = vmul.f32 %v7139_v62, %v7081_v3  ;;  %v4578_v3 = vld [vmem:[#allocation5 + $0x2] sm:$0x3]  ;;  %v4401_v19 = vrot.slane %v7139_v62, 2 }
0x11de   :  { %v4579_v50 = vadd.f32 %v4578_v3, %v4577_v49 }
0x122f   :  { %v4388_v4 = vpop.permute.xlu0 %4387 }
0x1230   :  { %v4389_v23 = vrot.slane %v4388_v4, 2 }
0x1232   :  { %5478 = vtanh.f32 %v4389_v23  ;;  %v4629_v23 = vld [vmem:[#allocation4 + $0xa] sm:$0x3] }
0x1233   :  { %v4276_v18 = vpop.permute.xlu1 %4275  ;;  %5480 = vrcp.f32 %v4271_v15 }
0x1234   :  { %v4277_v5 = vrot.slane %v4276_v18, 2  ;;  %v4630_v18 = vld [vmem:[#allocation5 + $0xa] sm:$0x3] }
0x1236   :  { %5482 = vtanh.f32 %v4277_v5  ;;  %v4606_v5 = vadd.f32 %v7154_v47, %v4605_v8 }
0x123f   :  { %v5479_v61 = vpop.eup %5478 }
0x1240   :  { %v4393_v33 = vmul.f32 %v5479_v61, %v7139_v62  ;;  %v7142_v37 = vpop.eup %5480  ;;  %v4631_v62 = vadd.f32 %v4630_v18, %v4629_v23  ;;  %v4558_v61 = vld [vmem:[#allocation4] sm:$0x3] }
0x1241   :  { %v4280_v43 = vmul.f32 %v7142_v37, %v7085_v35  ;;  %v4580_v35 = vadd.f32 %v7154_v47, %v4579_v50  ;;  %v4289_v25 = vrot.slane %v7142_v37, 2 }
0x1242   :  { %4395 = vrot.lane.b32.xlu0 %v4393_v33, %s5709_s2 }
0x1243   :  { %v5483_v24 = vpop.eup %5482 }
0x1244   :  { %v4281_v30 = vmul.f32 %v5483_v24, %v7142_v37 }
0x1246   :  { %4283 = vrot.lane.b32.xlu1 %v4281_v30, %s5709_s2  ;;  %v4632_v30 = vadd.f32 %v7154_v47, %v4631_v62 }
0x12b4   :  { %v4396_v39 = vpop.permute.xlu0 %4395 }
0x12b5   :  { %v4398_v41 = vadd.f32 %v4396_v39, %v4392_v38  ;;  %v4656_v39 = vld [vmem:[#allocation5 + $0xe] sm:$0x3] }
0x12b7   :  { %5484 = vtanh.f32 %v4398_v41 }
0x12b8   :  { %v4284_v45 = vpop.permute.xlu1 %4283 }
0x12b9   :  { %v4286_v46 = vadd.f32 %v4284_v45, %v4280_v43 }
0x12bb   :  { %5486 = vtanh.f32 %v4286_v46 }
0x12bc   :  { %5488 = vtanh.f32 %v4593_v48 }
0x12bd   :  { %5490 = vtanh.f32 %v4580_v35 }
0x12be   :  { %5492 = vtanh.f32 %v4619_v58  ;;  %v4669_v58 = vld [vmem:[%s7227_s8 + $0x8] sm:$0xff] }
0x12bf   :  { %5494 = vtanh.f32 %v4645_v21 }
0x12c4   :  { %v5485_v53 = vpop.eup %5484 }
0x12c5   :  { %4404 = vrot.lane.b32.xlu0 %v5485_v53, %s5709_s2 }
0x12c8   :  { %v5487_v57 = vpop.eup %5486 }
0x12c9   :  { %4292 = vrot.lane.b32.xlu1 %v5487_v57, %s5709_s2  ;;  %v5489_v60 = vpop.eup %5488  ;;  %v4670_v57 = vld [vmem:[%s7227_s8 + $0x10] sm:$0xff] }
0x12ca   :  { %v4595_v2 = vmul.f32 1.442695, %v5489_v60  ;;  %v5491_v27 = vpop.eup %5490 }
0x12cb   :  { %v4582_v1 = vmul.f32 1.442695, %v5491_v27  ;;  %v5493_v31 = vpop.eup %5492 }
0x12cc   :  { %5496 = vpow2.f32 %v4595_v2  ;;  %v4621_v28 = vmul.f32 1.442695, %v5493_v31  ;;  %v5495_v29 = vpop.eup %5494 }
0x12cd   :  { %5498 = vpow2.f32 %v4582_v1  ;;  %v4647_v13 = vmul.f32 1.442695, %v5495_v29 }
0x12ce   :  { %5500 = vpow2.f32 %v4621_v28 }
0x12cf   :  { %5502 = vpow2.f32 %v4647_v13 }
0x12d0   :  { %5504 = vtanh.f32 %v4606_v5 }
0x12d9   :  { %v7162_v12 = vpop.eup %5496 }
0x12da   :  { %v4597_v16 = vsel %vm1863_vm4, %v7162_v12, 0.0  ;;  %v7166_v11 = vpop.eup %5498 }
0x12db   :  { %v4584_v63 = vsel %vm1863_vm4, %v7166_v11, 0.0  ;;  %v7170_v10 = vpop.eup %5500 }
0x12dc   :  { %v4623_v0 = vsel %vm1863_vm4, %v7170_v10, 0.0  ;;  %v7174_v6 = vpop.eup %5502 }
0x12dd   :  { %v4649_v7 = vsel %vm1863_vm4, %v7174_v6, 0.0  ;;  %v5505_v42 = vpop.eup %5504 }
0x12de   :  { %v4608_v45 = vmul.f32 1.442695, %v5505_v42 }
0x12e4   :  { %4598 = vadd.xlane.f32.xlu0 %v4597_v16 }
0x12ed   :  { %4585 = vadd.xlane.f32.xlu1 %v4584_v63 }
0x12f1   :  { %4624 = vadd.xlane.f32.xlu1 %v4623_v0 }
0x12f5   :  { %4650 = vadd.xlane.f32.xlu1 %v4649_v7 }
0x1337   :  { %v4405_v9 = vpop.permute.xlu0 %4404 }
0x1338   :  { %v4407_v20 = vmul.f32 %v4405_v9, %v4401_v19 }
0x133a   :  { %5335 = vmatmul.mubr.msk.f32.vlgmr.msra.gmra.mxu1 %vm1563_vm3, %v4407_v20 }
0x133b   :  { %v4293_v34 = vpop.permute.xlu1 %4292 }
0x133c   :  { %v4295_v36 = vmul.f32 %v4293_v34, %v4289_v25 }
0x133e   :  { %5316 = vmatmul.mubr.msk.f32.vlgmr.msra.gmra.mxu0 %vm1563_vm3, %v4295_v36 }
0x133f   :  { %5345 = vmatprep.mubr.msk.f32.mxu0 %vm5710_vm2, %v7246_v22  ;;  %5338 = vmatpush3.msra.mxu0 %v4671_v56 }
0x1340   :  { %5339 = vmatprep.subr.mxu0 %v7246_v22 }
0x1341   :  { %5340 = vmatpush3.msra.mxu0 %v4670_v57 }
0x1342   :  { %5341 = vmatprep.subr.mxu0 %v7246_v22 }
0x1343   :  { %5342 = vmatpush3.msra.mxu0 %v4669_v58 }
0x1344   :  { %5343 = vmatprep.subr.mxu0 %v7246_v22 }
0x1345   :  { %5344 = vmatpush3.msra.mxu0 %v4668_v59 }
0x136d   :  { %v4599_v21 = vpop.xlane.xlu0 %4598 }
0x1376   :  { %v4586_v60 = vpop.xlane.xlu1 %4585 }
0x137a   :  { %v4625_v2 = vpop.xlane.xlu1 %4624 }
0x137e   :  { %v4651_v31 = vpop.xlane.xlu1 %4650 }
0x13fa   :  { %v4552_v17 = vpop.f32.mrf.mxu1 }
0x13fb   :  { %4556 = vst.msk [vmem:[#allocation5] sm:$0x3] %vm1863_vm4, %v4552_v17 }
0x13fc   :  { %v5336_v14 = vpop.f32.mrf.mxu1 }
0x13fe   :  { %v4477_v4 = vpop.f32.mrf.mxu0 }
0x13ff   :  { %4482 = vst.msk [vmem:[#allocation4 + $0xe] sm:$0x3] %vm1863_vm4, %v4477_v4 }
0x1400   :  { %v5317_v15 = vpop.f32.mrf.mxu0 }
0x1402   :  { %v4559_v33 = vld [vmem:[#allocation5] sm:$0x3] }
0x1403   :  { %v4560_v37 = vadd.f32 %v4559_v33, %v4558_v61 }
0x1405   :  { %v4567_v24 = vadd.f32 %v7154_v47, %v4560_v37 }
0x1406   :  { %v4655_v38 = vld [vmem:[#allocation4 + $0xe] sm:$0x3] }
0x1407   :  { %5506 = vtanh.f32 %v4567_v24  ;;  %v4657_v40 = vadd.f32 %v4656_v39, %v4655_v38 }
0x1408   :  { %5508 = vtanh.f32 %v4632_v30 }
0x1409   :  { %v4658_v41 = vadd.f32 %v7154_v47, %v4657_v40 }
0x140b   :  { %5510 = vtanh.f32 %v4658_v41 }
0x1414   :  { %v5507_v43 = vpop.eup %5506 }
0x1415   :  { %v4569_v44 = vmul.f32 1.442695, %v5507_v43  ;;  %v5509_v46 = vpop.eup %5508 }
0x1416   :  { %v4634_v48 = vmul.f32 1.442695, %v5509_v46 }
0x1417   :  { %5512 = vpow2.f32 %v4569_v44 }
0x1418   :  { %5514 = vpow2.f32 %v4608_v45  ;;  %v5511_v3 = vpop.eup %5510 }
0x1419   :  { %5516 = vpow2.f32 %v4634_v48  ;;  %v4660_v49 = vmul.f32 1.442695, %v5511_v3 }
0x141b   :  { %5518 = vpow2.f32 %v4660_v49 }
0x141c   :  { %5520 = vrcp.f32 %v4586_v60 }
0x141d   :  { %5522 = vrcp.f32 %v4599_v21 }
0x1424   :  { %v5513_v50 = vpop.eup %5512 }
0x1425   :  { %v4571_v51 = vsel %vm1863_vm4, %v5513_v50, 0.0  ;;  %v5515_v52 = vpop.eup %5514 }
0x1426   :  { %4572 = vadd.xlane.f32.xlu0 %v4571_v51  ;;  %v4610_v47 = vsel %vm1863_vm4, %v5515_v52, 0.0  ;;  %v5517_v53 = vpop.eup %5516 }
0x1427   :  { %v4636_v35 = vsel %vm1863_vm4, %v5517_v53, 0.0 }
0x1428   :  { %v5519_v54 = vpop.eup %5518 }
0x1429   :  { %v4662_v55 = vsel %vm1863_vm4, %v5519_v54, 0.0  ;;  %v5521_v29 = vpop.eup %5520 }
0x142a   :  { %4611 = vadd.xlane.f32.xlu0 %v4610_v47  ;;  %v5523_v16 = vpop.eup %5522  ;;  %v4588_v63 = vmul.f32 %v5521_v29, %v7166_v11 }
0x142b   :  { %v4601_v19 = vmul.f32 %v5523_v16, %v7162_v12  ;;  %v4882_v12 = vld [vmem:[%s7228_s9] ss:$0 sm:$0xff] }
0x142e   :  { %4637 = vadd.xlane.f32.xlu0 %v4636_v35 }
0x1432   :  { %4663 = vadd.xlane.f32.xlu0 %v4662_v55 }
0x14af   :  { %v4573_v27 = vpop.xlane.xlu0 %4572 }
0x14b0   :  { %5524 = vrcp.f32 %v4573_v27 }
0x14b1   :  { %5526 = vrcp.f32 %v4625_v2 }
0x14b3   :  { %v4612_v1 = vpop.xlane.xlu0 %4611 }
0x14b4   :  { %5528 = vrcp.f32 %v4612_v1 }
0x14b5   :  { %5530 = vrcp.f32 %v4651_v31 }
0x14b7   :  { %v4638_v28 = vpop.xlane.xlu0 %4637 }
0x14b8   :  { %5532 = vrcp.f32 %v4638_v28 }
0x14bb   :  { %v4664_v13 = vpop.xlane.xlu0 %4663 }
0x14bc   :  { %5534 = vrcp.f32 %v4664_v13 }
0x14bd   :  { %v5525_v22 = vpop.eup %5524 }
0x14be   :  { %v4575_v0 = vmul.f32 %v5525_v22, %v5513_v50  ;;  %v5527_v7 = vpop.eup %5526 }
0x14bf   :  { %v4627_v17 = vmul.f32 %v5527_v7, %v7170_v10 }
0x14c0   :  { %v4589_v9 = vadd.f32 %v4588_v63, %v4575_v0 }
0x14c1   :  { %v5529_v20 = vpop.eup %5528 }
0x14c2   :  { %v4602_v25 = vadd.f32 %v4601_v19, %v4589_v9  ;;  %v4614_v34 = vmul.f32 %v5529_v20, %v5515_v52  ;;  %v5531_v36 = vpop.eup %5530 }
0x14c3   :  { %v4653_v4 = vmul.f32 %v5531_v36, %v7174_v6 }
0x14c4   :  { %v4615_v32 = vadd.f32 %v4614_v34, %v4602_v25 }
0x14c5   :  { %v5533_v14 = vpop.eup %5532 }
0x14c6   :  { %v4640_v26 = vmul.f32 %v5533_v14, %v5517_v53  ;;  %v4628_v8 = vadd.f32 %v4627_v17, %v4615_v32 }
0x14c8   :  { %v4641_v23 = vadd.f32 %v4640_v26, %v4628_v8 }
0x14c9   :  { %v5535_v15 = vpop.eup %5534 }
0x14ca   :  { %v4666_v11 = vmul.f32 %v5535_v15, %v5519_v54  ;;  %v4654_v18 = vadd.f32 %v4653_v4, %v4641_v23 }
0x14cc   :  { %v4667_v5 = vadd.f32 %v4666_v11, %v4654_v18 }
0x14ce   :  { %5346 = vmatmul.mubr.msk.f32.vlgmr.msra.gmra.mxu0 %vm4679_vm5, %v4667_v5 }
0x158e   :  { %v4749_v10 = vpop.f32.mrf.mxu0 }
0x158f   :  { %v4750_v62 = vadd.f32 %v4882_v12, %v4749_v10 }
0x1590   :  { %v5347_v61 = vpop.f32.mrf.mxu0 }
0x1591   :  { %4754 = vst.msk [vmem:[#allocation12] sm:$0x3] %vm4753_vm6, %v4750_v62 }
0x1592   :  { %5685 = shalt.err (!%p5682_p5)
}
0x1593   :  { %4764 = dma.vmem_to_hbm [thread:$0]  %s4762_s27, 32, %s7229_s10, [#allocation8]  }
0x1594   :  { %5698 = dma.done.wait [#allocation8], 32  }
0x1595   :  { %5699 = vsyncadd [#allocation8], 4294967264 }
0x1596   :  { %4768 = vsyncpa [#allocation7], 1 }
0x1597   :  { %4769 = vsyncpa [#allocation10], 1 }
0x1598   :  { %4770 = vsyncpa [#allocation8], 1 }

</bundles_post_ra>
